<compile_context>
chip_gen: v7x
topology: tpu7x:2x2x1
jax: 0.10.0
libtpu: 0.0.40
codegen_flags: <defaults>
</compile_context>

<pallas_src>
import functools
import math

import jax
import jax.numpy as jnp
from jax.experimental import pallas as pl
from jax.experimental.pallas import tpu as pltpu

EPS = 1e-5          # nn.LayerNorm default eps
PTR_C = 10.0        # Attention(C=10)
MASK_NEG = 1e9      # additive attention-mask bias magnitude


# ------------------------------------------------------------------
# In-kernel helpers (pure functions on values, called from the kernels)
# ------------------------------------------------------------------
def _layer_norm(x, g, b):
    mu = jnp.mean(x, axis=-1, keepdims=True)
    xc = x - mu
    var = jnp.mean(xc * xc, axis=-1, keepdims=True)
    return xc * jax.lax.rsqrt(var + EPS) * g + b


def _softmax_last(x, approx):
    m = jnp.max(x, axis=-1, keepdims=True)
    e = jnp.exp(x - m)
    s = jnp.sum(e, axis=-1, keepdims=True)
    if approx:
        return e * pl.reciprocal(s, approx=True)
    return e / s


def _encoder_layer(x2d, rec2d, bias, B, N, H, n_heads, d_k,
                   wqv, wk, proj_w, proj_b,
                   ln1g, ln1b, w1, b1, w2, b2, ln2g, ln2b):
    """One EncoderLayer (post-LN path) on a flattened (B*N, H) activation."""
    scale = 1.0 / math.sqrt(d_k)

    # Fused Q|V projection (from src) and K projection (from rec_src).
    qv = jnp.dot(x2d, wqv, preferred_element_type=jnp.float32)     # (BN, 2H)
    k2 = jnp.dot(rec2d, wk, preferred_element_type=jnp.float32)    # (BN, H)
    q3 = qv[:, :H].reshape(B, N, H)
    v3 = qv[:, H:].reshape(B, N, H)
    k3 = k2.reshape(B, N, H)

    # Per-head scores stacked along the query axis -> ONE masked softmax.
    scores = []
    for h in range(n_heads):
        sl = slice(h * d_k, (h + 1) * d_k)
        scores.append(jnp.einsum('bqd,bkd->bqk', q3[:, :, sl], k3[:, :, sl],
                                 preferred_element_type=jnp.float32))
    scores = jnp.concatenate(scores, axis=1) * scale                # (B, nh*N, N)
    scores = scores + bias[:, None, :]                              # additive mask
    attn = _softmax_last(scores, approx=True)

    # Per-head weighted sums, concat heads, single output projection.
    heads = []
    for h in range(n_heads):
        sl = slice(h * d_k, (h + 1) * d_k)
        heads.append(jnp.einsum('bqk,bkd->bqd',
                                attn[:, h * N:(h + 1) * N, :], v3[:, :, sl],
                                preferred_element_type=jnp.float32))
    heads = jnp.concatenate(heads, axis=-1).reshape(B * N, H)       # (BN, H)

    proj = jnp.dot(heads, proj_w, preferred_element_type=jnp.float32) + proj_b
    x2d = _layer_norm(x2d + proj, ln1g, ln1b)

    ff = jnp.dot(x2d, w1, preferred_element_type=jnp.float32) + b1
    ff = jnp.maximum(ff, 0.0)
    ff = jnp.dot(ff, w2, preferred_element_type=jnp.float32) + b2
    x2d = _layer_norm(x2d + ff, ln2g, ln2b)
    return x2d


def _decoder_core(x, h0, c0, enc2d, log_mask, B, N, H,
                  w_ih, w_hh, b_ih, b_hh, W1, W2, b2, V):
    """LSTMCell + pointer Attention (is_glimpse=False)."""
    # LSTMCell (PyTorch gate order i, f, g, o); weights pre-transposed (H, 4H).
    gates = (jnp.dot(x, w_ih, preferred_element_type=jnp.float32) + b_ih
             + jnp.dot(h0, w_hh, preferred_element_type=jnp.float32) + b_hh)
    i = jax.nn.sigmoid(gates[:, 0 * H:1 * H])
    f = jax.nn.sigmoid(gates[:, 1 * H:2 * H])
    g = jnp.tanh(gates[:, 2 * H:3 * H])
    o = jax.nn.sigmoid(gates[:, 3 * H:4 * H])
    c = f * c0 + i * g
    h = o * jnp.tanh(c)

    # Pointer attention (W1 has no bias).
    w1e = jnp.dot(enc2d, W1, preferred_element_type=jnp.float32).reshape(B, N, H)
    w2h = jnp.dot(h, W2, preferred_element_type=jnp.float32) + b2    # (B, H)
    u = jnp.tanh(w1e + w2h[:, None, :])                              # (B, N, H)
    a = jnp.sum(u * V, axis=-1)                                      # u @ V -> (B, N)
    a = PTR_C * jnp.tanh(a)
    logits = a + log_mask                                            # mask.float().log()
    policy = _softmax_last(logits, approx=False)                     # exact division
    return policy, h, c


# ------------------------------------------------------------------
# Fused kernel: full encoder stack + decoder step in one pallas_call
# ------------------------------------------------------------------
def agent_fused_kernel(n_heads,
                       enc_in_ref, rec_ref, adj_mask_ref,
                       dec_in_ref, h0_ref, c0_ref, ptr_mask_ref,
                       wqv_ref, wk_ref, projw_ref, projb_ref,
                       ln1g_ref, ln1b_ref, w1_ref, b1_ref, w2_ref, b2_ref,
                       ln2g_ref, ln2b_ref,
                       wih_ref, whh_ref, bih_ref, bhh_ref,
                       dW1_ref, dW2_ref, db2_ref, V_ref,
                       enc_out_ref, policy_ref, h_ref, c_ref):
    B, N, H = enc_in_ref.shape
    d_k = H // n_heads
    n_layers = wqv_ref.shape[0]

    x2d = enc_in_ref[...].reshape(B * N, H)
    rec2d = rec_ref[...].reshape(B * N, H)
    # additive bias: 0 where mask==1, -1e9 where mask==0
    bias = (adj_mask_ref[...] - 1.0) * MASK_NEG                      # (B, N)

    for l in range(n_layers):                                        # static unroll
        x2d = _encoder_layer(x2d, rec2d, bias, B, N, H, n_heads, d_k,
                             wqv_ref[l], wk_ref[l], projw_ref[l], projb_ref[l],
                             ln1g_ref[l], ln1b_ref[l],
                             w1_ref[l], b1_ref[l], w2_ref[l], b2_ref[l],
                             ln2g_ref[l], ln2b_ref[l])

    enc_out_ref[...] = x2d.reshape(B, N, H)

    log_mask = jnp.log(ptr_mask_ref[...])
    policy, h, c = _decoder_core(dec_in_ref[...], h0_ref[...], c0_ref[...],
                                 x2d, log_mask, B, N, H,
                                 wih_ref[...], whh_ref[...], bih_ref[...],
                                 bhh_ref[...], dW1_ref[...], dW2_ref[...],
                                 db2_ref[...], V_ref[...])
    policy_ref[...] = policy
    h_ref[...] = h
    c_ref[...] = c


# Encoder-only kernel (first_step=True path: decoder is skipped).
def encoder_only_kernel(n_heads,
                        enc_in_ref, rec_ref, adj_mask_ref,
                        wqv_ref, wk_ref, projw_ref, projb_ref,
                        ln1g_ref, ln1b_ref, w1_ref, b1_ref, w2_ref, b2_ref,
                        ln2g_ref, ln2b_ref,
                        enc_out_ref):
    B, N, H = enc_in_ref.shape
    d_k = H // n_heads
    n_layers = wqv_ref.shape[0]

    x2d = enc_in_ref[...].reshape(B * N, H)
    rec2d = rec_ref[...].reshape(B * N, H)
    bias = (adj_mask_ref[...] - 1.0) * MASK_NEG

    for l in range(n_layers):
        x2d = _encoder_layer(x2d, rec2d, bias, B, N, H, n_heads, d_k,
                             wqv_ref[l], wk_ref[l], projw_ref[l], projb_ref[l],
                             ln1g_ref[l], ln1b_ref[l],
                             w1_ref[l], b1_ref[l], w2_ref[l], b2_ref[l],
                             ln2g_ref[l], ln2b_ref[l])
    enc_out_ref[...] = x2d.reshape(B, N, H)


# ------------------------------------------------------------------
# Wrapper: Agent forward (encoder stack -> decoder) in one kernel launch
# ------------------------------------------------------------------
def agent_forward(params, enc_inputs, enc_hidden, adj_mask,
                  dec_input, dec_hidden, mask, first_step=False):
    B, N, H = enc_inputs.shape
    n_heads = params['n_heads']
    vmem = pl.BlockSpec(memory_space=pltpu.MemorySpace.VMEM)

    enc_weights = (params['wqv'], params['wk'], params['proj_w'], params['proj_b'],
                   params['ln1_g'], params['ln1_b'], params['w1'], params['b1'],
                   params['w2'], params['b2'], params['ln2_g'], params['ln2_b'])

    if first_step:
        kernel = functools.partial(encoder_only_kernel, n_heads)
        enc_out = pl.pallas_call(
            kernel,
            out_shape=jax.ShapeDtypeStruct((B, N, H), jnp.float32),
            in_specs=[vmem] * (3 + len(enc_weights)),
            out_specs=vmem,
        )(enc_inputs, enc_hidden, adj_mask, *enc_weights)
        return None, None, enc_out

    h0, c0 = dec_hidden
    dec_weights = (params['w_ih'], params['w_hh'], params['b_ih'], params['b_hh'],
                   params['dec_W1'], params['dec_W2'], params['dec_b2'], params['V'])

    kernel = functools.partial(agent_fused_kernel, n_heads)
    enc_out, policy, h, c = pl.pallas_call(
        kernel,
        out_shape=(jax.ShapeDtypeStruct((B, N, H), jnp.float32),
                   jax.ShapeDtypeStruct((B, N), jnp.float32),
                   jax.ShapeDtypeStruct((B, H), jnp.float32),
                   jax.ShapeDtypeStruct((B, H), jnp.float32)),
        in_specs=[vmem] * (7 + len(enc_weights) + len(dec_weights)),
        out_specs=(vmem, vmem, vmem, vmem),
    )(enc_inputs, enc_hidden, adj_mask, dec_input, h0, c0, mask,
      *enc_weights, *dec_weights)
    return policy, (h, c), enc_out


# ------------------------------------------------------------------
# Parameter init (PyTorch-layout) + one-time packing into kernel layout
# ------------------------------------------------------------------
def _xavier(key, shape):
    if len(shape) >= 2:
        fan_out, fan_in = shape[-2], shape[-1]
    else:
        fan_out = fan_in = shape[0]
    limit = math.sqrt(6.0 / (fan_in + fan_out))
    return jax.random.uniform(key, shape, jnp.float32, -limit, limit)


def _uniform(key, shape, scale):
    return jax.random.uniform(key, shape, jnp.float32, -scale, scale)


def init_agent_params(key, H, n_heads, d_ff, n_layers):
    d_k = H // n_heads
    keys = iter(jax.random.split(key, 8 * n_layers + 16))
    nxt = lambda: next(keys)

    layers = []
    for _ in range(n_layers):
        layers.append(dict(
            wq=_xavier(nxt(), (n_heads, H, d_k)),
            wk=_xavier(nxt(), (n_heads, H, d_k)),
            wv=_xavier(nxt(), (n_heads, H, d_k)),
            proj_w=_xavier(nxt(), (H, H)),          # (out, in) like nn.Linear
            proj_b=jnp.zeros((1, H), jnp.float32),
            ln1_g=jnp.ones((1, H), jnp.float32),
            ln1_b=jnp.zeros((1, H), jnp.float32),
            w1=_xavier(nxt(), (d_ff, H)),
            b1=jnp.zeros((1, d_ff), jnp.float32),
            w2=_xavier(nxt(), (H, d_ff)),
            b2=jnp.zeros((1, H), jnp.float32),
            ln2_g=jnp.ones((1, H), jnp.float32),
            ln2_b=jnp.zeros((1, H), jnp.float32),
        ))

    inv = 1.0 / math.sqrt(H)
    decoder = dict(
        w_ih=_xavier(nxt(), (4 * H, H)),
        w_hh=_xavier(nxt(), (4 * H, H)),
        b_ih=_uniform(nxt(), (1, 4 * H), inv),
        b_hh=_uniform(nxt(), (1, 4 * H), inv),
        W1=_xavier(nxt(), (H, H)),
        W2=_xavier(nxt(), (H, H)),
        b2=_uniform(nxt(), (1, H), inv),
        V=_xavier(nxt(), (H, 1)),
        first_h0=_uniform(nxt(), (1, H), inv),
        c0=_uniform(nxt(), (1, H), inv),
    )
    return dict(layers=layers, decoder=decoder)


def pack_agent_params(raw):
    """One-time re-layout: pre-transpose / pre-pack weights so every in-kernel
    contraction is a plain (M, K) @ (K, N) matmul and the layer stack is one
    stacked tensor per parameter."""
    layers = raw['layers']
    dec = raw['decoder']
    H = layers[0]['proj_w'].shape[0]
    n_heads = layers[0]['wq'].shape[0]

    def flat(w):  # (nh, H, dk) -> (H, nh*dk), heads concatenated along lanes
        return jnp.transpose(w, (1, 0, 2)).reshape(H, -1)

    packed = dict(
        n_heads=n_heads,
        wqv=jnp.stack([jnp.concatenate([flat(lp['wq']), flat(lp['wv'])], axis=1)
                       for lp in layers]),                      # (L, H, 2H)
        wk=jnp.stack([flat(lp['wk']) for lp in layers]),        # (L, H, H)
        proj_w=jnp.stack([lp['proj_w'].T for lp in layers]),    # (L, H, H) in-first
        proj_b=jnp.stack([lp['proj_b'] for lp in layers]),
        ln1_g=jnp.stack([lp['ln1_g'] for lp in layers]),
        ln1_b=jnp.stack([lp['ln1_b'] for lp in layers]),
        w1=jnp.stack([lp['w1'].T for lp in layers]),            # (L, H, d_ff)
        b1=jnp.stack([lp['b1'] for lp in layers]),
        w2=jnp.stack([lp['w2'].T for lp in layers]),            # (L, d_ff, H)
        b2=jnp.stack([lp['b2'] for lp in layers]),
        ln2_g=jnp.stack([lp['ln2_g'] for lp in layers]),
        ln2_b=jnp.stack([lp['ln2_b'] for lp in layers]),
        # decoder
        w_ih=dec['w_ih'].T,                                     # (H, 4H)
        w_hh=dec['w_hh'].T,                                     # (H, 4H)
        b_ih=dec['b_ih'],
        b_hh=dec['b_hh'],
        dec_W1=dec['W1'].T,                                     # (H, H) in-first
        dec_W2=dec['W2'].T,
        dec_b2=dec['b2'],
        V=dec['V'].reshape(1, 1, H),                            # broadcastable
        first_h0=dec['first_h0'],
        c0=dec['c0'],
    )
    return packed


if __name__ == "__main__":
    B, N, H = 2, 8, 32
    n_heads, d_ff, n_layers = 4, 64, 2

    key = jax.random.PRNGKey(0)
    kp, k1, k2, k3 = jax.random.split(key, 4)
    raw_params = init_agent_params(kp, H, n_heads, d_ff, n_layers)
    params = pack_agent_params(raw_params)

    enc_inputs = jax.random.normal(k1, (B, N, H), jnp.float32)   # already embedded
    enc_hidden = jax.random.normal(k2, (B, N, H), jnp.float32)   # rec_src (keys)
    dec_input = jax.random.normal(k3, (B, H), jnp.float32)

    adj_mask = jnp.ones((B, N), jnp.float32).at[:, -1].set(0.0)  # attn mask (0 = masked)
    mask = jnp.ones((B, N), jnp.float32).at[:, 0].set(0.0)       # pointer mask

    dec_h = jnp.tile(params['first_h0'], (B, 1))
    dec_c = jnp.tile(params['c0'], (B, 1))

    policy, (h, c), enc_outputs = agent_forward(
        params, enc_inputs, enc_hidden, adj_mask,
        dec_input, (dec_h, dec_c), mask, first_step=False)

    jax.block_until_ready((policy, h, c, enc_outputs))

    assert policy.shape == (B, N)
    assert h.shape == (B, H) and c.shape == (B, H)
    assert enc_outputs.shape == (B, N, H)
    assert bool(jnp.all(jnp.isfinite(policy)))
    assert bool(jnp.allclose(jnp.sum(policy, axis=1), 1.0, atol=1e-4))
    assert bool(jnp.all(policy[:, 0] < 1e-6))   # masked pointer position gets ~0 prob

    print("KERNEL_OK")
</pallas_src>

<mosaic_0001>
module attributes {stable_mosaic.version = 11 : i64} {
  func.func @agent_fused_kernel(%arg0: memref<2x8x32xf32, #tpu.memory_space<vmem>>, %arg1: memref<2x8x32xf32, #tpu.memory_space<vmem>>, %arg2: memref<2x8xf32, #tpu.memory_space<vmem>>, %arg3: memref<2x32xf32, #tpu.memory_space<vmem>>, %arg4: memref<2x32xf32, #tpu.memory_space<vmem>>, %arg5: memref<2x32xf32, #tpu.memory_space<vmem>>, %arg6: memref<2x8xf32, #tpu.memory_space<vmem>>, %arg7: memref<2x32x64xf32, #tpu.memory_space<vmem>>, %arg8: memref<2x32x32xf32, #tpu.memory_space<vmem>>, %arg9: memref<2x32x32xf32, #tpu.memory_space<vmem>>, %arg10: memref<2x1x32xf32, #tpu.memory_space<vmem>>, %arg11: memref<2x1x32xf32, #tpu.memory_space<vmem>>, %arg12: memref<2x1x32xf32, #tpu.memory_space<vmem>>, %arg13: memref<2x32x64xf32, #tpu.memory_space<vmem>>, %arg14: memref<2x1x64xf32, #tpu.memory_space<vmem>>, %arg15: memref<2x64x32xf32, #tpu.memory_space<vmem>>, %arg16: memref<2x1x32xf32, #tpu.memory_space<vmem>>, %arg17: memref<2x1x32xf32, #tpu.memory_space<vmem>>, %arg18: memref<2x1x32xf32, #tpu.memory_space<vmem>>, %arg19: memref<32x128xf32, #tpu.memory_space<vmem>>, %arg20: memref<32x128xf32, #tpu.memory_space<vmem>>, %arg21: memref<1x128xf32, #tpu.memory_space<vmem>>, %arg22: memref<1x128xf32, #tpu.memory_space<vmem>>, %arg23: memref<32x32xf32, #tpu.memory_space<vmem>>, %arg24: memref<32x32xf32, #tpu.memory_space<vmem>>, %arg25: memref<1x32xf32, #tpu.memory_space<vmem>>, %arg26: memref<1x1x32xf32, #tpu.memory_space<vmem>>, %arg27: memref<2x8x32xf32, #tpu.memory_space<vmem>>, %arg28: memref<2x8xf32, #tpu.memory_space<vmem>>, %arg29: memref<2x32xf32, #tpu.memory_space<vmem>>, %arg30: memref<2x32xf32, #tpu.memory_space<vmem>>) attributes {dimension_semantics = [], scalar_prefetch = 0 : i64, scratch_operands = 0 : i64, tpu.core_type = #tpu.core_type<tc>} {
    %c0 = arith.constant 0 : index
    %c0_0 = arith.constant 0 : index
    %c0_1 = arith.constant 0 : index
    %0 = vector.load %arg0[%c0, %c0_0, %c0_1] : memref<2x8x32xf32, #tpu.memory_space<vmem>>, vector<2x8x32xf32>
    %1 = vector.shape_cast %0 : vector<2x8x32xf32> to vector<16x32xf32>
    %c0_2 = arith.constant 0 : index
    %c0_3 = arith.constant 0 : index
    %c0_4 = arith.constant 0 : index
    %2 = vector.load %arg1[%c0_2, %c0_3, %c0_4] : memref<2x8x32xf32, #tpu.memory_space<vmem>>, vector<2x8x32xf32>
    %3 = vector.shape_cast %2 : vector<2x8x32xf32> to vector<16x32xf32>
    %c0_5 = arith.constant 0 : index
    %c0_6 = arith.constant 0 : index
    %4 = vector.load %arg2[%c0_5, %c0_6] : memref<2x8xf32, #tpu.memory_space<vmem>>, vector<2x8xf32>
    %cst = arith.constant 1.000000e+00 : f32
    %5 = vector.broadcast %cst : f32 to vector<2x8xf32>
    %6 = arith.subf %4, %5 : vector<2x8xf32>
    %cst_7 = arith.constant 1.000000e+09 : f32
    %7 = vector.broadcast %cst_7 : f32 to vector<2x8xf32>
    %8 = arith.mulf %6, %7 : vector<2x8xf32>
    %c0_8 = arith.constant 0 : index
    %c0_9 = arith.constant 0 : index
    %c0_10 = arith.constant 0 : index
    %9 = vector.load %arg7[%c0_8, %c0_9, %c0_10] : memref<2x32x64xf32, #tpu.memory_space<vmem>>, vector<1x32x64xf32>
    %10 = vector.shape_cast %9 : vector<1x32x64xf32> to vector<32x64xf32>
    %c0_11 = arith.constant 0 : index
    %c0_12 = arith.constant 0 : index
    %c0_13 = arith.constant 0 : index
    %11 = vector.load %arg8[%c0_11, %c0_12, %c0_13] : memref<2x32x32xf32, #tpu.memory_space<vmem>>, vector<1x32x32xf32>
    %12 = vector.shape_cast %11 : vector<1x32x32xf32> to vector<32x32xf32>
    %c0_14 = arith.constant 0 : index
    %c0_15 = arith.constant 0 : index
    %c0_16 = arith.constant 0 : index
    %13 = vector.load %arg9[%c0_14, %c0_15, %c0_16] : memref<2x32x32xf32, #tpu.memory_space<vmem>>, vector<1x32x32xf32>
    %14 = vector.shape_cast %13 : vector<1x32x32xf32> to vector<32x32xf32>
    %c0_17 = arith.constant 0 : index
    %c0_18 = arith.constant 0 : index
    %c0_19 = arith.constant 0 : index
    %15 = vector.load %arg10[%c0_17, %c0_18, %c0_19] : memref<2x1x32xf32, #tpu.memory_space<vmem>>, vector<1x1x32xf32>
    %16 = vector.shape_cast %15 : vector<1x1x32xf32> to vector<1x32xf32>
    %c0_20 = arith.constant 0 : index
    %c0_21 = arith.constant 0 : index
    %c0_22 = arith.constant 0 : index
    %17 = vector.load %arg11[%c0_20, %c0_21, %c0_22] : memref<2x1x32xf32, #tpu.memory_space<vmem>>, vector<1x1x32xf32>
    %18 = vector.shape_cast %17 : vector<1x1x32xf32> to vector<1x32xf32>
    %c0_23 = arith.constant 0 : index
    %c0_24 = arith.constant 0 : index
    %c0_25 = arith.constant 0 : index
    %19 = vector.load %arg12[%c0_23, %c0_24, %c0_25] : memref<2x1x32xf32, #tpu.memory_space<vmem>>, vector<1x1x32xf32>
    %20 = vector.shape_cast %19 : vector<1x1x32xf32> to vector<1x32xf32>
    %c0_26 = arith.constant 0 : index
    %c0_27 = arith.constant 0 : index
    %c0_28 = arith.constant 0 : index
    %21 = vector.load %arg13[%c0_26, %c0_27, %c0_28] : memref<2x32x64xf32, #tpu.memory_space<vmem>>, vector<1x32x64xf32>
    %22 = vector.shape_cast %21 : vector<1x32x64xf32> to vector<32x64xf32>
    %c0_29 = arith.constant 0 : index
    %c0_30 = arith.constant 0 : index
    %c0_31 = arith.constant 0 : index
    %23 = vector.load %arg14[%c0_29, %c0_30, %c0_31] : memref<2x1x64xf32, #tpu.memory_space<vmem>>, vector<1x1x64xf32>
    %24 = vector.shape_cast %23 : vector<1x1x64xf32> to vector<1x64xf32>
    %c0_32 = arith.constant 0 : index
    %c0_33 = arith.constant 0 : index
    %c0_34 = arith.constant 0 : index
    %25 = vector.load %arg15[%c0_32, %c0_33, %c0_34] : memref<2x64x32xf32, #tpu.memory_space<vmem>>, vector<1x64x32xf32>
    %26 = vector.shape_cast %25 : vector<1x64x32xf32> to vector<64x32xf32>
    %c0_35 = arith.constant 0 : index
    %c0_36 = arith.constant 0 : index
    %c0_37 = arith.constant 0 : index
    %27 = vector.load %arg16[%c0_35, %c0_36, %c0_37] : memref<2x1x32xf32, #tpu.memory_space<vmem>>, vector<1x1x32xf32>
    %28 = vector.shape_cast %27 : vector<1x1x32xf32> to vector<1x32xf32>
    %c0_38 = arith.constant 0 : index
    %c0_39 = arith.constant 0 : index
    %c0_40 = arith.constant 0 : index
    %29 = vector.load %arg17[%c0_38, %c0_39, %c0_40] : memref<2x1x32xf32, #tpu.memory_space<vmem>>, vector<1x1x32xf32>
    %30 = vector.shape_cast %29 : vector<1x1x32xf32> to vector<1x32xf32>
    %c0_41 = arith.constant 0 : index
    %c0_42 = arith.constant 0 : index
    %c0_43 = arith.constant 0 : index
    %31 = vector.load %arg18[%c0_41, %c0_42, %c0_43] : memref<2x1x32xf32, #tpu.memory_space<vmem>>, vector<1x1x32xf32>
    %32 = vector.shape_cast %31 : vector<1x1x32xf32> to vector<1x32xf32>
    %cst_44 = arith.constant dense<0.000000e+00> : vector<16x64xf32>
    %33 = tpu.matmul %1, %10, %cst_44 {dimension_numbers = #tpu.dot_dimension_numbers<[1], [0], [0], [1], [0, 0, 1, 1], [], []>} : vector<16x32xf32>, vector<32x64xf32>, vector<16x64xf32> -> vector<16x64xf32>
    %cst_45 = arith.constant dense<0.000000e+00> : vector<16x32xf32>
    %34 = tpu.matmul %3, %12, %cst_45 {dimension_numbers = #tpu.dot_dimension_numbers<[1], [0], [0], [1], [0, 0, 1, 1], [], []>} : vector<16x32xf32>, vector<32x32xf32>, vector<16x32xf32> -> vector<16x32xf32>
    %35 = vector.extract_strided_slice %33 {offsets = [0, 0], sizes = [16, 32], strides = [1, 1]} : vector<16x64xf32> to vector<16x32xf32>
    %36 = vector.shape_cast %35 : vector<16x32xf32> to vector<2x8x32xf32>
    %37 = vector.extract_strided_slice %33 {offsets = [0, 32], sizes = [16, 32], strides = [1, 1]} : vector<16x64xf32> to vector<16x32xf32>
    %38 = vector.shape_cast %37 : vector<16x32xf32> to vector<2x8x32xf32>
    %39 = vector.shape_cast %34 : vector<16x32xf32> to vector<2x8x32xf32>
    %40 = vector.extract_strided_slice %36 {offsets = [0, 0, 0], sizes = [2, 8, 8], strides = [1, 1, 1]} : vector<2x8x32xf32> to vector<2x8x8xf32>
    %41 = vector.extract_strided_slice %39 {offsets = [0, 0, 0], sizes = [2, 8, 8], strides = [1, 1, 1]} : vector<2x8x32xf32> to vector<2x8x8xf32>
    "tpu.trace_start"() <{level = 10 : i32, message = "bqd,bkd->bqk"}> : () -> ()
    %cst_46 = arith.constant dense<0.000000e+00> : vector<2x8x8xf32>
    %42 = tpu.matmul %40, %41, %cst_46 {dimension_numbers = #tpu.dot_dimension_numbers<[2], [2], [1], [1], [0, 0, 0, 1, 1, 1], [0], [0]>} : vector<2x8x8xf32>, vector<2x8x8xf32>, vector<2x8x8xf32> -> vector<2x8x8xf32>
    "tpu.trace_stop"() : () -> ()
    %43 = vector.extract_strided_slice %36 {offsets = [0, 0, 8], sizes = [2, 8, 8], strides = [1, 1, 1]} : vector<2x8x32xf32> to vector<2x8x8xf32>
    %44 = vector.extract_strided_slice %39 {offsets = [0, 0, 8], sizes = [2, 8, 8], strides = [1, 1, 1]} : vector<2x8x32xf32> to vector<2x8x8xf32>
    "tpu.trace_start"() <{level = 10 : i32, message = "bqd,bkd->bqk"}> : () -> ()
    %cst_47 = arith.constant dense<0.000000e+00> : vector<2x8x8xf32>
    %45 = tpu.matmul %43, %44, %cst_47 {dimension_numbers = #tpu.dot_dimension_numbers<[2], [2], [1], [1], [0, 0, 0, 1, 1, 1], [0], [0]>} : vector<2x8x8xf32>, vector<2x8x8xf32>, vector<2x8x8xf32> -> vector<2x8x8xf32>
    "tpu.trace_stop"() : () -> ()
    %46 = vector.extract_strided_slice %36 {offsets = [0, 0, 16], sizes = [2, 8, 8], strides = [1, 1, 1]} : vector<2x8x32xf32> to vector<2x8x8xf32>
    %47 = vector.extract_strided_slice %39 {offsets = [0, 0, 16], sizes = [2, 8, 8], strides = [1, 1, 1]} : vector<2x8x32xf32> to vector<2x8x8xf32>
    "tpu.trace_start"() <{level = 10 : i32, message = "bqd,bkd->bqk"}> : () -> ()
    %cst_48 = arith.constant dense<0.000000e+00> : vector<2x8x8xf32>
    %48 = tpu.matmul %46, %47, %cst_48 {dimension_numbers = #tpu.dot_dimension_numbers<[2], [2], [1], [1], [0, 0, 0, 1, 1, 1], [0], [0]>} : vector<2x8x8xf32>, vector<2x8x8xf32>, vector<2x8x8xf32> -> vector<2x8x8xf32>
    "tpu.trace_stop"() : () -> ()
    %49 = vector.extract_strided_slice %36 {offsets = [0, 0, 24], sizes = [2, 8, 8], strides = [1, 1, 1]} : vector<2x8x32xf32> to vector<2x8x8xf32>
    %50 = vector.extract_strided_slice %39 {offsets = [0, 0, 24], sizes = [2, 8, 8], strides = [1, 1, 1]} : vector<2x8x32xf32> to vector<2x8x8xf32>
    "tpu.trace_start"() <{level = 10 : i32, message = "bqd,bkd->bqk"}> : () -> ()
    %cst_49 = arith.constant dense<0.000000e+00> : vector<2x8x8xf32>
    %51 = tpu.matmul %49, %50, %cst_49 {dimension_numbers = #tpu.dot_dimension_numbers<[2], [2], [1], [1], [0, 0, 0, 1, 1, 1], [0], [0]>} : vector<2x8x8xf32>, vector<2x8x8xf32>, vector<2x8x8xf32> -> vector<2x8x8xf32>
    "tpu.trace_stop"() : () -> ()
    %52 = tpu.concatenate %42, %45, %48, %51 in 1 : vector<2x8x8xf32>, vector<2x8x8xf32>, vector<2x8x8xf32>, vector<2x8x8xf32> -> vector<2x32x8xf32>
    %cst_50 = arith.constant 0.353553385 : f32
    %53 = vector.broadcast %cst_50 : f32 to vector<2x32x8xf32>
    %54 = arith.mulf %52, %53 : vector<2x32x8xf32>
    %55 = vector.shape_cast %8 : vector<2x8xf32> to vector<2x1x8xf32>
    %56 = vector.broadcast %55 : vector<2x1x8xf32> to vector<2x32x8xf32>
    %57 = arith.addf %54, %56 : vector<2x32x8xf32>
    %cst_51 = arith.constant dense<0xFF800000> : vector<2x32xf32>
    %58 = vector.multi_reduction <maximumf>, %57, %cst_51 [2] : vector<2x32x8xf32> to vector<2x32xf32>
    %59 = vector.shape_cast %58 : vector<2x32xf32> to vector<2x32x1xf32>
    %60 = vector.broadcast %59 : vector<2x32x1xf32> to vector<2x32x8xf32>
    %61 = arith.subf %57, %60 : vector<2x32x8xf32>
    %62 = math.exp %61 : vector<2x32x8xf32>
    %cst_52 = arith.constant dense<0.000000e+00> : vector<2x32xf32>
    %63 = vector.multi_reduction <add>, %62, %cst_52 [2] : vector<2x32x8xf32> to vector<2x32xf32>
    %64 = vector.shape_cast %63 : vector<2x32xf32> to vector<2x32x1xf32>
    %65 = tpu.reciprocal %64 {approx = true} : vector<2x32x1xf32> -> vector<2x32x1xf32>
    %66 = vector.broadcast %65 : vector<2x32x1xf32> to vector<2x32x8xf32>
    %67 = arith.mulf %62, %66 : vector<2x32x8xf32>
    %68 = vector.extract_strided_slice %67 {offsets = [0, 0, 0], sizes = [2, 8, 8], strides = [1, 1, 1]} : vector<2x32x8xf32> to vector<2x8x8xf32>
    %69 = vector.extract_strided_slice %38 {offsets = [0, 0, 0], sizes = [2, 8, 8], strides = [1, 1, 1]} : vector<2x8x32xf32> to vector<2x8x8xf32>
    "tpu.trace_start"() <{level = 10 : i32, message = "bqk,bkd->bqd"}> : () -> ()
    %cst_53 = arith.constant dense<0.000000e+00> : vector<2x8x8xf32>
    %70 = tpu.matmul %68, %69, %cst_53 {dimension_numbers = #tpu.dot_dimension_numbers<[2], [1], [1], [2], [0, 0, 0, 1, 1, 2], [0], [0]>} : vector<2x8x8xf32>, vector<2x8x8xf32>, vector<2x8x8xf32> -> vector<2x8x8xf32>
    "tpu.trace_stop"() : () -> ()
    %71 = vector.extract_strided_slice %67 {offsets = [0, 8, 0], sizes = [2, 8, 8], strides = [1, 1, 1]} : vector<2x32x8xf32> to vector<2x8x8xf32>
    %72 = vector.extract_strided_slice %38 {offsets = [0, 0, 8], sizes = [2, 8, 8], strides = [1, 1, 1]} : vector<2x8x32xf32> to vector<2x8x8xf32>
    "tpu.trace_start"() <{level = 10 : i32, message = "bqk,bkd->bqd"}> : () -> ()
    %cst_54 = arith.constant dense<0.000000e+00> : vector<2x8x8xf32>
    %73 = tpu.matmul %71, %72, %cst_54 {dimension_numbers = #tpu.dot_dimension_numbers<[2], [1], [1], [2], [0, 0, 0, 1, 1, 2], [0], [0]>} : vector<2x8x8xf32>, vector<2x8x8xf32>, vector<2x8x8xf32> -> vector<2x8x8xf32>
    "tpu.trace_stop"() : () -> ()
    %74 = vector.extract_strided_slice %67 {offsets = [0, 16, 0], sizes = [2, 8, 8], strides = [1, 1, 1]} : vector<2x32x8xf32> to vector<2x8x8xf32>
    %75 = vector.extract_strided_slice %38 {offsets = [0, 0, 16], sizes = [2, 8, 8], strides = [1, 1, 1]} : vector<2x8x32xf32> to vector<2x8x8xf32>
    "tpu.trace_start"() <{level = 10 : i32, message = "bqk,bkd->bqd"}> : () -> ()
    %cst_55 = arith.constant dense<0.000000e+00> : vector<2x8x8xf32>
    %76 = tpu.matmul %74, %75, %cst_55 {dimension_numbers = #tpu.dot_dimension_numbers<[2], [1], [1], [2], [0, 0, 0, 1, 1, 2], [0], [0]>} : vector<2x8x8xf32>, vector<2x8x8xf32>, vector<2x8x8xf32> -> vector<2x8x8xf32>
    "tpu.trace_stop"() : () -> ()
    %77 = vector.extract_strided_slice %67 {offsets = [0, 24, 0], sizes = [2, 8, 8], strides = [1, 1, 1]} : vector<2x32x8xf32> to vector<2x8x8xf32>
    %78 = vector.extract_strided_slice %38 {offsets = [0, 0, 24], sizes = [2, 8, 8], strides = [1, 1, 1]} : vector<2x8x32xf32> to vector<2x8x8xf32>
    "tpu.trace_start"() <{level = 10 : i32, message = "bqk,bkd->bqd"}> : () -> ()
    %cst_56 = arith.constant dense<0.000000e+00> : vector<2x8x8xf32>
    %79 = tpu.matmul %77, %78, %cst_56 {dimension_numbers = #tpu.dot_dimension_numbers<[2], [1], [1], [2], [0, 0, 0, 1, 1, 2], [0], [0]>} : vector<2x8x8xf32>, vector<2x8x8xf32>, vector<2x8x8xf32> -> vector<2x8x8xf32>
    "tpu.trace_stop"() : () -> ()
    %80 = tpu.concatenate %70, %73, %76, %79 in 2 : vector<2x8x8xf32>, vector<2x8x8xf32>, vector<2x8x8xf32>, vector<2x8x8xf32> -> vector<2x8x32xf32>
    %81 = vector.shape_cast %80 : vector<2x8x32xf32> to vector<16x32xf32>
    %cst_57 = arith.constant dense<0.000000e+00> : vector<16x32xf32>
    %82 = tpu.matmul %81, %14, %cst_57 {dimension_numbers = #tpu.dot_dimension_numbers<[1], [0], [0], [1], [0, 0, 1, 1], [], []>} : vector<16x32xf32>, vector<32x32xf32>, vector<16x32xf32> -> vector<16x32xf32>
    %83 = vector.broadcast %16 : vector<1x32xf32> to vector<16x32xf32>
    %84 = arith.addf %82, %83 : vector<16x32xf32>
    %85 = arith.addf %1, %84 : vector<16x32xf32>
    %cst_58 = arith.constant dense<0.000000e+00> : vector<16xf32>
    %86 = vector.multi_reduction <add>, %85, %cst_58 [1] : vector<16x32xf32> to vector<16xf32>
    %87 = vector.shape_cast %86 : vector<16xf32> to vector<16x1xf32>
    %cst_59 = arith.constant 3.200000e+01 : f32
    %88 = vector.broadcast %cst_59 : f32 to vector<16x1xf32>
    %89 = arith.divf %87, %88 : vector<16x1xf32>
    %90 = vector.broadcast %89 : vector<16x1xf32> to vector<16x32xf32>
    %91 = arith.subf %85, %90 : vector<16x32xf32>
    %92 = arith.mulf %91, %91 : vector<16x32xf32>
    %cst_60 = arith.constant dense<0.000000e+00> : vector<16xf32>
    %93 = vector.multi_reduction <add>, %92, %cst_60 [1] : vector<16x32xf32> to vector<16xf32>
    %94 = vector.shape_cast %93 : vector<16xf32> to vector<16x1xf32>
    %cst_61 = arith.constant 3.200000e+01 : f32
    %95 = vector.broadcast %cst_61 : f32 to vector<16x1xf32>
    %96 = arith.divf %94, %95 : vector<16x1xf32>
    %cst_62 = arith.constant 9.99999974E-6 : f32
    %97 = vector.broadcast %cst_62 : f32 to vector<16x1xf32>
    %98 = arith.addf %96, %97 : vector<16x1xf32>
    %99 = math.rsqrt %98 : vector<16x1xf32>
    %100 = vector.broadcast %99 : vector<16x1xf32> to vector<16x32xf32>
    %101 = arith.mulf %91, %100 : vector<16x32xf32>
    %102 = vector.broadcast %18 : vector<1x32xf32> to vector<16x32xf32>
    %103 = arith.mulf %101, %102 : vector<16x32xf32>
    %104 = vector.broadcast %20 : vector<1x32xf32> to vector<16x32xf32>
    %105 = arith.addf %103, %104 : vector<16x32xf32>
    %cst_63 = arith.constant dense<0.000000e+00> : vector<16x64xf32>
    %106 = tpu.matmul %105, %22, %cst_63 {dimension_numbers = #tpu.dot_dimension_numbers<[1], [0], [0], [1], [0, 0, 1, 1], [], []>} : vector<16x32xf32>, vector<32x64xf32>, vector<16x64xf32> -> vector<16x64xf32>
    %107 = vector.broadcast %24 : vector<1x64xf32> to vector<16x64xf32>
    %108 = arith.addf %106, %107 : vector<16x64xf32>
    %cst_64 = arith.constant 0.000000e+00 : f32
    %109 = vector.broadcast %cst_64 : f32 to vector<16x64xf32>
    %110 = arith.maximumf %108, %109 : vector<16x64xf32>
    %cst_65 = arith.constant dense<0.000000e+00> : vector<16x32xf32>
    %111 = tpu.matmul %110, %26, %cst_65 {dimension_numbers = #tpu.dot_dimension_numbers<[1], [0], [0], [1], [0, 0, 1, 1], [], []>} : vector<16x64xf32>, vector<64x32xf32>, vector<16x32xf32> -> vector<16x32xf32>
    %112 = vector.broadcast %28 : vector<1x32xf32> to vector<16x32xf32>
    %113 = arith.addf %111, %112 : vector<16x32xf32>
    %114 = arith.addf %105, %113 : vector<16x32xf32>
    %cst_66 = arith.constant dense<0.000000e+00> : vector<16xf32>
    %115 = vector.multi_reduction <add>, %114, %cst_66 [1] : vector<16x32xf32> to vector<16xf32>
    %116 = vector.shape_cast %115 : vector<16xf32> to vector<16x1xf32>
    %cst_67 = arith.constant 3.200000e+01 : f32
    %117 = vector.broadcast %cst_67 : f32 to vector<16x1xf32>
    %118 = arith.divf %116, %117 : vector<16x1xf32>
    %119 = vector.broadcast %118 : vector<16x1xf32> to vector<16x32xf32>
    %120 = arith.subf %114, %119 : vector<16x32xf32>
    %121 = arith.mulf %120, %120 : vector<16x32xf32>
    %cst_68 = arith.constant dense<0.000000e+00> : vector<16xf32>
    %122 = vector.multi_reduction <add>, %121, %cst_68 [1] : vector<16x32xf32> to vector<16xf32>
    %123 = vector.shape_cast %122 : vector<16xf32> to vector<16x1xf32>
    %cst_69 = arith.constant 3.200000e+01 : f32
    %124 = vector.broadcast %cst_69 : f32 to vector<16x1xf32>
    %125 = arith.divf %123, %124 : vector<16x1xf32>
    %cst_70 = arith.constant 9.99999974E-6 : f32
    %126 = vector.broadcast %cst_70 : f32 to vector<16x1xf32>
    %127 = arith.addf %125, %126 : vector<16x1xf32>
    %128 = math.rsqrt %127 : vector<16x1xf32>
    %129 = vector.broadcast %128 : vector<16x1xf32> to vector<16x32xf32>
    %130 = arith.mulf %120, %129 : vector<16x32xf32>
    %131 = vector.broadcast %30 : vector<1x32xf32> to vector<16x32xf32>
    %132 = arith.mulf %130, %131 : vector<16x32xf32>
    %133 = vector.broadcast %32 : vector<1x32xf32> to vector<16x32xf32>
    %134 = arith.addf %132, %133 : vector<16x32xf32>
    %c1 = arith.constant 1 : index
    %c0_71 = arith.constant 0 : index
    %c0_72 = arith.constant 0 : index
    %135 = vector.load %arg7[%c1, %c0_71, %c0_72] : memref<2x32x64xf32, #tpu.memory_space<vmem>>, vector<1x32x64xf32>
    %136 = vector.shape_cast %135 : vector<1x32x64xf32> to vector<32x64xf32>
    %c1_73 = arith.constant 1 : index
    %c0_74 = arith.constant 0 : index
    %c0_75 = arith.constant 0 : index
    %137 = vector.load %arg8[%c1_73, %c0_74, %c0_75] : memref<2x32x32xf32, #tpu.memory_space<vmem>>, vector<1x32x32xf32>
    %138 = vector.shape_cast %137 : vector<1x32x32xf32> to vector<32x32xf32>
    %c1_76 = arith.constant 1 : index
    %c0_77 = arith.constant 0 : index
    %c0_78 = arith.constant 0 : index
    %139 = vector.load %arg9[%c1_76, %c0_77, %c0_78] : memref<2x32x32xf32, #tpu.memory_space<vmem>>, vector<1x32x32xf32>
    %140 = vector.shape_cast %139 : vector<1x32x32xf32> to vector<32x32xf32>
    %c1_79 = arith.constant 1 : index
    %c0_80 = arith.constant 0 : index
    %c0_81 = arith.constant 0 : index
    %141 = vector.load %arg10[%c1_79, %c0_80, %c0_81] : memref<2x1x32xf32, #tpu.memory_space<vmem>>, vector<1x1x32xf32>
    %142 = vector.shape_cast %141 : vector<1x1x32xf32> to vector<1x32xf32>
    %c1_82 = arith.constant 1 : index
    %c0_83 = arith.constant 0 : index
    %c0_84 = arith.constant 0 : index
    %143 = vector.load %arg11[%c1_82, %c0_83, %c0_84] : memref<2x1x32xf32, #tpu.memory_space<vmem>>, vector<1x1x32xf32>
    %144 = vector.shape_cast %143 : vector<1x1x32xf32> to vector<1x32xf32>
    %c1_85 = arith.constant 1 : index
    %c0_86 = arith.constant 0 : index
    %c0_87 = arith.constant 0 : index
    %145 = vector.load %arg12[%c1_85, %c0_86, %c0_87] : memref<2x1x32xf32, #tpu.memory_space<vmem>>, vector<1x1x32xf32>
    %146 = vector.shape_cast %145 : vector<1x1x32xf32> to vector<1x32xf32>
    %c1_88 = arith.constant 1 : index
    %c0_89 = arith.constant 0 : index
    %c0_90 = arith.constant 0 : index
    %147 = vector.load %arg13[%c1_88, %c0_89, %c0_90] : memref<2x32x64xf32, #tpu.memory_space<vmem>>, vector<1x32x64xf32>
    %148 = vector.shape_cast %147 : vector<1x32x64xf32> to vector<32x64xf32>
    %c1_91 = arith.constant 1 : index
    %c0_92 = arith.constant 0 : index
    %c0_93 = arith.constant 0 : index
    %149 = vector.load %arg14[%c1_91, %c0_92, %c0_93] : memref<2x1x64xf32, #tpu.memory_space<vmem>>, vector<1x1x64xf32>
    %150 = vector.shape_cast %149 : vector<1x1x64xf32> to vector<1x64xf32>
    %c1_94 = arith.constant 1 : index
    %c0_95 = arith.constant 0 : index
    %c0_96 = arith.constant 0 : index
    %151 = vector.load %arg15[%c1_94, %c0_95, %c0_96] : memref<2x64x32xf32, #tpu.memory_space<vmem>>, vector<1x64x32xf32>
    %152 = vector.shape_cast %151 : vector<1x64x32xf32> to vector<64x32xf32>
    %c1_97 = arith.constant 1 : index
    %c0_98 = arith.constant 0 : index
    %c0_99 = arith.constant 0 : index
    %153 = vector.load %arg16[%c1_97, %c0_98, %c0_99] : memref<2x1x32xf32, #tpu.memory_space<vmem>>, vector<1x1x32xf32>
    %154 = vector.shape_cast %153 : vector<1x1x32xf32> to vector<1x32xf32>
    %c1_100 = arith.constant 1 : index
    %c0_101 = arith.constant 0 : index
    %c0_102 = arith.constant 0 : index
    %155 = vector.load %arg17[%c1_100, %c0_101, %c0_102] : memref<2x1x32xf32, #tpu.memory_space<vmem>>, vector<1x1x32xf32>
    %156 = vector.shape_cast %155 : vector<1x1x32xf32> to vector<1x32xf32>
    %c1_103 = arith.constant 1 : index
    %c0_104 = arith.constant 0 : index
    %c0_105 = arith.constant 0 : index
    %157 = vector.load %arg18[%c1_103, %c0_104, %c0_105] : memref<2x1x32xf32, #tpu.memory_space<vmem>>, vector<1x1x32xf32>
    %158 = vector.shape_cast %157 : vector<1x1x32xf32> to vector<1x32xf32>
    %cst_106 = arith.constant dense<0.000000e+00> : vector<16x64xf32>
    %159 = tpu.matmul %134, %136, %cst_106 {dimension_numbers = #tpu.dot_dimension_numbers<[1], [0], [0], [1], [0, 0, 1, 1], [], []>} : vector<16x32xf32>, vector<32x64xf32>, vector<16x64xf32> -> vector<16x64xf32>
    %cst_107 = arith.constant dense<0.000000e+00> : vector<16x32xf32>
    %160 = tpu.matmul %3, %138, %cst_107 {dimension_numbers = #tpu.dot_dimension_numbers<[1], [0], [0], [1], [0, 0, 1, 1], [], []>} : vector<16x32xf32>, vector<32x32xf32>, vector<16x32xf32> -> vector<16x32xf32>
    %161 = vector.extract_strided_slice %159 {offsets = [0, 0], sizes = [16, 32], strides = [1, 1]} : vector<16x64xf32> to vector<16x32xf32>
    %162 = vector.shape_cast %161 : vector<16x32xf32> to vector<2x8x32xf32>
    %163 = vector.extract_strided_slice %159 {offsets = [0, 32], sizes = [16, 32], strides = [1, 1]} : vector<16x64xf32> to vector<16x32xf32>
    %164 = vector.shape_cast %163 : vector<16x32xf32> to vector<2x8x32xf32>
    %165 = vector.shape_cast %160 : vector<16x32xf32> to vector<2x8x32xf32>
    %166 = vector.extract_strided_slice %162 {offsets = [0, 0, 0], sizes = [2, 8, 8], strides = [1, 1, 1]} : vector<2x8x32xf32> to vector<2x8x8xf32>
    %167 = vector.extract_strided_slice %165 {offsets = [0, 0, 0], sizes = [2, 8, 8], strides = [1, 1, 1]} : vector<2x8x32xf32> to vector<2x8x8xf32>
    "tpu.trace_start"() <{level = 10 : i32, message = "bqd,bkd->bqk"}> : () -> ()
    %cst_108 = arith.constant dense<0.000000e+00> : vector<2x8x8xf32>
    %168 = tpu.matmul %166, %167, %cst_108 {dimension_numbers = #tpu.dot_dimension_numbers<[2], [2], [1], [1], [0, 0, 0, 1, 1, 1], [0], [0]>} : vector<2x8x8xf32>, vector<2x8x8xf32>, vector<2x8x8xf32> -> vector<2x8x8xf32>
    "tpu.trace_stop"() : () -> ()
    %169 = vector.extract_strided_slice %162 {offsets = [0, 0, 8], sizes = [2, 8, 8], strides = [1, 1, 1]} : vector<2x8x32xf32> to vector<2x8x8xf32>
    %170 = vector.extract_strided_slice %165 {offsets = [0, 0, 8], sizes = [2, 8, 8], strides = [1, 1, 1]} : vector<2x8x32xf32> to vector<2x8x8xf32>
    "tpu.trace_start"() <{level = 10 : i32, message = "bqd,bkd->bqk"}> : () -> ()
    %cst_109 = arith.constant dense<0.000000e+00> : vector<2x8x8xf32>
    %171 = tpu.matmul %169, %170, %cst_109 {dimension_numbers = #tpu.dot_dimension_numbers<[2], [2], [1], [1], [0, 0, 0, 1, 1, 1], [0], [0]>} : vector<2x8x8xf32>, vector<2x8x8xf32>, vector<2x8x8xf32> -> vector<2x8x8xf32>
    "tpu.trace_stop"() : () -> ()
    %172 = vector.extract_strided_slice %162 {offsets = [0, 0, 16], sizes = [2, 8, 8], strides = [1, 1, 1]} : vector<2x8x32xf32> to vector<2x8x8xf32>
    %173 = vector.extract_strided_slice %165 {offsets = [0, 0, 16], sizes = [2, 8, 8], strides = [1, 1, 1]} : vector<2x8x32xf32> to vector<2x8x8xf32>
    "tpu.trace_start"() <{level = 10 : i32, message = "bqd,bkd->bqk"}> : () -> ()
    %cst_110 = arith.constant dense<0.000000e+00> : vector<2x8x8xf32>
    %174 = tpu.matmul %172, %173, %cst_110 {dimension_numbers = #tpu.dot_dimension_numbers<[2], [2], [1], [1], [0, 0, 0, 1, 1, 1], [0], [0]>} : vector<2x8x8xf32>, vector<2x8x8xf32>, vector<2x8x8xf32> -> vector<2x8x8xf32>
    "tpu.trace_stop"() : () -> ()
    %175 = vector.extract_strided_slice %162 {offsets = [0, 0, 24], sizes = [2, 8, 8], strides = [1, 1, 1]} : vector<2x8x32xf32> to vector<2x8x8xf32>
    %176 = vector.extract_strided_slice %165 {offsets = [0, 0, 24], sizes = [2, 8, 8], strides = [1, 1, 1]} : vector<2x8x32xf32> to vector<2x8x8xf32>
    "tpu.trace_start"() <{level = 10 : i32, message = "bqd,bkd->bqk"}> : () -> ()
    %cst_111 = arith.constant dense<0.000000e+00> : vector<2x8x8xf32>
    %177 = tpu.matmul %175, %176, %cst_111 {dimension_numbers = #tpu.dot_dimension_numbers<[2], [2], [1], [1], [0, 0, 0, 1, 1, 1], [0], [0]>} : vector<2x8x8xf32>, vector<2x8x8xf32>, vector<2x8x8xf32> -> vector<2x8x8xf32>
    "tpu.trace_stop"() : () -> ()
    %178 = tpu.concatenate %168, %171, %174, %177 in 1 : vector<2x8x8xf32>, vector<2x8x8xf32>, vector<2x8x8xf32>, vector<2x8x8xf32> -> vector<2x32x8xf32>
    %cst_112 = arith.constant 0.353553385 : f32
    %179 = vector.broadcast %cst_112 : f32 to vector<2x32x8xf32>
    %180 = arith.mulf %178, %179 : vector<2x32x8xf32>
    %181 = vector.shape_cast %8 : vector<2x8xf32> to vector<2x1x8xf32>
    %182 = vector.broadcast %181 : vector<2x1x8xf32> to vector<2x32x8xf32>
    %183 = arith.addf %180, %182 : vector<2x32x8xf32>
    %cst_113 = arith.constant dense<0xFF800000> : vector<2x32xf32>
    %184 = vector.multi_reduction <maximumf>, %183, %cst_113 [2] : vector<2x32x8xf32> to vector<2x32xf32>
    %185 = vector.shape_cast %184 : vector<2x32xf32> to vector<2x32x1xf32>
    %186 = vector.broadcast %185 : vector<2x32x1xf32> to vector<2x32x8xf32>
    %187 = arith.subf %183, %186 : vector<2x32x8xf32>
    %188 = math.exp %187 : vector<2x32x8xf32>
    %cst_114 = arith.constant dense<0.000000e+00> : vector<2x32xf32>
    %189 = vector.multi_reduction <add>, %188, %cst_114 [2] : vector<2x32x8xf32> to vector<2x32xf32>
    %190 = vector.shape_cast %189 : vector<2x32xf32> to vector<2x32x1xf32>
    %191 = tpu.reciprocal %190 {approx = true} : vector<2x32x1xf32> -> vector<2x32x1xf32>
    %192 = vector.broadcast %191 : vector<2x32x1xf32> to vector<2x32x8xf32>
    %193 = arith.mulf %188, %192 : vector<2x32x8xf32>
    %194 = vector.extract_strided_slice %193 {offsets = [0, 0, 0], sizes = [2, 8, 8], strides = [1, 1, 1]} : vector<2x32x8xf32> to vector<2x8x8xf32>
    %195 = vector.extract_strided_slice %164 {offsets = [0, 0, 0], sizes = [2, 8, 8], strides = [1, 1, 1]} : vector<2x8x32xf32> to vector<2x8x8xf32>
    "tpu.trace_start"() <{level = 10 : i32, message = "bqk,bkd->bqd"}> : () -> ()
    %cst_115 = arith.constant dense<0.000000e+00> : vector<2x8x8xf32>
    %196 = tpu.matmul %194, %195, %cst_115 {dimension_numbers = #tpu.dot_dimension_numbers<[2], [1], [1], [2], [0, 0, 0, 1, 1, 2], [0], [0]>} : vector<2x8x8xf32>, vector<2x8x8xf32>, vector<2x8x8xf32> -> vector<2x8x8xf32>
    "tpu.trace_stop"() : () -> ()
    %197 = vector.extract_strided_slice %193 {offsets = [0, 8, 0], sizes = [2, 8, 8], strides = [1, 1, 1]} : vector<2x32x8xf32> to vector<2x8x8xf32>
    %198 = vector.extract_strided_slice %164 {offsets = [0, 0, 8], sizes = [2, 8, 8], strides = [1, 1, 1]} : vector<2x8x32xf32> to vector<2x8x8xf32>
    "tpu.trace_start"() <{level = 10 : i32, message = "bqk,bkd->bqd"}> : () -> ()
    %cst_116 = arith.constant dense<0.000000e+00> : vector<2x8x8xf32>
    %199 = tpu.matmul %197, %198, %cst_116 {dimension_numbers = #tpu.dot_dimension_numbers<[2], [1], [1], [2], [0, 0, 0, 1, 1, 2], [0], [0]>} : vector<2x8x8xf32>, vector<2x8x8xf32>, vector<2x8x8xf32> -> vector<2x8x8xf32>
    "tpu.trace_stop"() : () -> ()
    %200 = vector.extract_strided_slice %193 {offsets = [0, 16, 0], sizes = [2, 8, 8], strides = [1, 1, 1]} : vector<2x32x8xf32> to vector<2x8x8xf32>
    %201 = vector.extract_strided_slice %164 {offsets = [0, 0, 16], sizes = [2, 8, 8], strides = [1, 1, 1]} : vector<2x8x32xf32> to vector<2x8x8xf32>
    "tpu.trace_start"() <{level = 10 : i32, message = "bqk,bkd->bqd"}> : () -> ()
    %cst_117 = arith.constant dense<0.000000e+00> : vector<2x8x8xf32>
    %202 = tpu.matmul %200, %201, %cst_117 {dimension_numbers = #tpu.dot_dimension_numbers<[2], [1], [1], [2], [0, 0, 0, 1, 1, 2], [0], [0]>} : vector<2x8x8xf32>, vector<2x8x8xf32>, vector<2x8x8xf32> -> vector<2x8x8xf32>
    "tpu.trace_stop"() : () -> ()
    %203 = vector.extract_strided_slice %193 {offsets = [0, 24, 0], sizes = [2, 8, 8], strides = [1, 1, 1]} : vector<2x32x8xf32> to vector<2x8x8xf32>
    %204 = vector.extract_strided_slice %164 {offsets = [0, 0, 24], sizes = [2, 8, 8], strides = [1, 1, 1]} : vector<2x8x32xf32> to vector<2x8x8xf32>
    "tpu.trace_start"() <{level = 10 : i32, message = "bqk,bkd->bqd"}> : () -> ()
    %cst_118 = arith.constant dense<0.000000e+00> : vector<2x8x8xf32>
    %205 = tpu.matmul %203, %204, %cst_118 {dimension_numbers = #tpu.dot_dimension_numbers<[2], [1], [1], [2], [0, 0, 0, 1, 1, 2], [0], [0]>} : vector<2x8x8xf32>, vector<2x8x8xf32>, vector<2x8x8xf32> -> vector<2x8x8xf32>
    "tpu.trace_stop"() : () -> ()
    %206 = tpu.concatenate %196, %199, %202, %205 in 2 : vector<2x8x8xf32>, vector<2x8x8xf32>, vector<2x8x8xf32>, vector<2x8x8xf32> -> vector<2x8x32xf32>
    %207 = vector.shape_cast %206 : vector<2x8x32xf32> to vector<16x32xf32>
    %cst_119 = arith.constant dense<0.000000e+00> : vector<16x32xf32>
    %208 = tpu.matmul %207, %140, %cst_119 {dimension_numbers = #tpu.dot_dimension_numbers<[1], [0], [0], [1], [0, 0, 1, 1], [], []>} : vector<16x32xf32>, vector<32x32xf32>, vector<16x32xf32> -> vector<16x32xf32>
    %209 = vector.broadcast %142 : vector<1x32xf32> to vector<16x32xf32>
    %210 = arith.addf %208, %209 : vector<16x32xf32>
    %211 = arith.addf %134, %210 : vector<16x32xf32>
    %cst_120 = arith.constant dense<0.000000e+00> : vector<16xf32>
    %212 = vector.multi_reduction <add>, %211, %cst_120 [1] : vector<16x32xf32> to vector<16xf32>
    %213 = vector.shape_cast %212 : vector<16xf32> to vector<16x1xf32>
    %cst_121 = arith.constant 3.200000e+01 : f32
    %214 = vector.broadcast %cst_121 : f32 to vector<16x1xf32>
    %215 = arith.divf %213, %214 : vector<16x1xf32>
    %216 = vector.broadcast %215 : vector<16x1xf32> to vector<16x32xf32>
    %217 = arith.subf %211, %216 : vector<16x32xf32>
    %218 = arith.mulf %217, %217 : vector<16x32xf32>
    %cst_122 = arith.constant dense<0.000000e+00> : vector<16xf32>
    %219 = vector.multi_reduction <add>, %218, %cst_122 [1] : vector<16x32xf32> to vector<16xf32>
    %220 = vector.shape_cast %219 : vector<16xf32> to vector<16x1xf32>
    %cst_123 = arith.constant 3.200000e+01 : f32
    %221 = vector.broadcast %cst_123 : f32 to vector<16x1xf32>
    %222 = arith.divf %220, %221 : vector<16x1xf32>
    %cst_124 = arith.constant 9.99999974E-6 : f32
    %223 = vector.broadcast %cst_124 : f32 to vector<16x1xf32>
    %224 = arith.addf %222, %223 : vector<16x1xf32>
    %225 = math.rsqrt %224 : vector<16x1xf32>
    %226 = vector.broadcast %225 : vector<16x1xf32> to vector<16x32xf32>
    %227 = arith.mulf %217, %226 : vector<16x32xf32>
    %228 = vector.broadcast %144 : vector<1x32xf32> to vector<16x32xf32>
    %229 = arith.mulf %227, %228 : vector<16x32xf32>
    %230 = vector.broadcast %146 : vector<1x32xf32> to vector<16x32xf32>
    %231 = arith.addf %229, %230 : vector<16x32xf32>
    %cst_125 = arith.constant dense<0.000000e+00> : vector<16x64xf32>
    %232 = tpu.matmul %231, %148, %cst_125 {dimension_numbers = #tpu.dot_dimension_numbers<[1], [0], [0], [1], [0, 0, 1, 1], [], []>} : vector<16x32xf32>, vector<32x64xf32>, vector<16x64xf32> -> vector<16x64xf32>
    %233 = vector.broadcast %150 : vector<1x64xf32> to vector<16x64xf32>
    %234 = arith.addf %232, %233 : vector<16x64xf32>
    %cst_126 = arith.constant 0.000000e+00 : f32
    %235 = vector.broadcast %cst_126 : f32 to vector<16x64xf32>
    %236 = arith.maximumf %234, %235 : vector<16x64xf32>
    %cst_127 = arith.constant dense<0.000000e+00> : vector<16x32xf32>
    %237 = tpu.matmul %236, %152, %cst_127 {dimension_numbers = #tpu.dot_dimension_numbers<[1], [0], [0], [1], [0, 0, 1, 1], [], []>} : vector<16x64xf32>, vector<64x32xf32>, vector<16x32xf32> -> vector<16x32xf32>
    %238 = vector.broadcast %154 : vector<1x32xf32> to vector<16x32xf32>
    %239 = arith.addf %237, %238 : vector<16x32xf32>
    %240 = arith.addf %231, %239 : vector<16x32xf32>
    %cst_128 = arith.constant dense<0.000000e+00> : vector<16xf32>
    %241 = vector.multi_reduction <add>, %240, %cst_128 [1] : vector<16x32xf32> to vector<16xf32>
    %242 = vector.shape_cast %241 : vector<16xf32> to vector<16x1xf32>
    %cst_129 = arith.constant 3.200000e+01 : f32
    %243 = vector.broadcast %cst_129 : f32 to vector<16x1xf32>
    %244 = arith.divf %242, %243 : vector<16x1xf32>
    %245 = vector.broadcast %244 : vector<16x1xf32> to vector<16x32xf32>
    %246 = arith.subf %240, %245 : vector<16x32xf32>
    %247 = arith.mulf %246, %246 : vector<16x32xf32>
    %cst_130 = arith.constant dense<0.000000e+00> : vector<16xf32>
    %248 = vector.multi_reduction <add>, %247, %cst_130 [1] : vector<16x32xf32> to vector<16xf32>
    %249 = vector.shape_cast %248 : vector<16xf32> to vector<16x1xf32>
    %cst_131 = arith.constant 3.200000e+01 : f32
    %250 = vector.broadcast %cst_131 : f32 to vector<16x1xf32>
    %251 = arith.divf %249, %250 : vector<16x1xf32>
    %cst_132 = arith.constant 9.99999974E-6 : f32
    %252 = vector.broadcast %cst_132 : f32 to vector<16x1xf32>
    %253 = arith.addf %251, %252 : vector<16x1xf32>
    %254 = math.rsqrt %253 : vector<16x1xf32>
    %255 = vector.broadcast %254 : vector<16x1xf32> to vector<16x32xf32>
    %256 = arith.mulf %246, %255 : vector<16x32xf32>
    %257 = vector.broadcast %156 : vector<1x32xf32> to vector<16x32xf32>
    %258 = arith.mulf %256, %257 : vector<16x32xf32>
    %259 = vector.broadcast %158 : vector<1x32xf32> to vector<16x32xf32>
    %260 = arith.addf %258, %259 : vector<16x32xf32>
    %261 = vector.shape_cast %260 : vector<16x32xf32> to vector<2x8x32xf32>
    %c0_133 = arith.constant 0 : index
    %c0_134 = arith.constant 0 : index
    %c0_135 = arith.constant 0 : index
    %262 = vector.load %arg27[%c0_133, %c0_134, %c0_135] : memref<2x8x32xf32, #tpu.memory_space<vmem>>, vector<2x8x32xf32>
    tpu.vector_store %arg27[%c0_133, %c0_134, %c0_135], %261 {strides = array<i32>} : memref<2x8x32xf32, #tpu.memory_space<vmem>>, vector<2x8x32xf32>,
    %c0_136 = arith.constant 0 : index
    %c0_137 = arith.constant 0 : index
    %263 = vector.load %arg6[%c0_136, %c0_137] : memref<2x8xf32, #tpu.memory_space<vmem>>, vector<2x8xf32>
    %264 = math.log %263 : vector<2x8xf32>
    %c0_138 = arith.constant 0 : index
    %c0_139 = arith.constant 0 : index
    %265 = vector.load %arg3[%c0_138, %c0_139] : memref<2x32xf32, #tpu.memory_space<vmem>>, vector<2x32xf32>
    %c0_140 = arith.constant 0 : index
    %c0_141 = arith.constant 0 : index
    %266 = vector.load %arg4[%c0_140, %c0_141] : memref<2x32xf32, #tpu.memory_space<vmem>>, vector<2x32xf32>
    %c0_142 = arith.constant 0 : index
    %c0_143 = arith.constant 0 : index
    %267 = vector.load %arg5[%c0_142, %c0_143] : memref<2x32xf32, #tpu.memory_space<vmem>>, vector<2x32xf32>
    %c0_144 = arith.constant 0 : index
    %c0_145 = arith.constant 0 : index
    %268 = vector.load %arg19[%c0_144, %c0_145] : memref<32x128xf32, #tpu.memory_space<vmem>>, vector<32x128xf32>
    %c0_146 = arith.constant 0 : index
    %c0_147 = arith.constant 0 : index
    %269 = vector.load %arg20[%c0_146, %c0_147] : memref<32x128xf32, #tpu.memory_space<vmem>>, vector<32x128xf32>
    %c0_148 = arith.constant 0 : index
    %c0_149 = arith.constant 0 : index
    %270 = vector.load %arg21[%c0_148, %c0_149] : memref<1x128xf32, #tpu.memory_space<vmem>>, vector<1x128xf32>
    %c0_150 = arith.constant 0 : index
    %c0_151 = arith.constant 0 : index
    %271 = vector.load %arg22[%c0_150, %c0_151] : memref<1x128xf32, #tpu.memory_space<vmem>>, vector<1x128xf32>
    %c0_152 = arith.constant 0 : index
    %c0_153 = arith.constant 0 : index
    %272 = vector.load %arg23[%c0_152, %c0_153] : memref<32x32xf32, #tpu.memory_space<vmem>>, vector<32x32xf32>
    %c0_154 = arith.constant 0 : index
    %c0_155 = arith.constant 0 : index
    %273 = vector.load %arg24[%c0_154, %c0_155] : memref<32x32xf32, #tpu.memory_space<vmem>>, vector<32x32xf32>
    %c0_156 = arith.constant 0 : index
    %c0_157 = arith.constant 0 : index
    %274 = vector.load %arg25[%c0_156, %c0_157] : memref<1x32xf32, #tpu.memory_space<vmem>>, vector<1x32xf32>
    %c0_158 = arith.constant 0 : index
    %c0_159 = arith.constant 0 : index
    %c0_160 = arith.constant 0 : index
    %275 = vector.load %arg26[%c0_158, %c0_159, %c0_160] : memref<1x1x32xf32, #tpu.memory_space<vmem>>, vector<1x1x32xf32>
    %cst_161 = arith.constant dense<0.000000e+00> : vector<2x128xf32>
    %276 = tpu.matmul %265, %268, %cst_161 {dimension_numbers = #tpu.dot_dimension_numbers<[1], [0], [0], [1], [0, 0, 1, 1], [], []>} : vector<2x32xf32>, vector<32x128xf32>, vector<2x128xf32> -> vector<2x128xf32>
    %277 = vector.broadcast %270 : vector<1x128xf32> to vector<2x128xf32>
    %278 = arith.addf %276, %277 : vector<2x128xf32>
    %cst_162 = arith.constant dense<0.000000e+00> : vector<2x128xf32>
    %279 = tpu.matmul %266, %269, %cst_162 {dimension_numbers = #tpu.dot_dimension_numbers<[1], [0], [0], [1], [0, 0, 1, 1], [], []>} : vector<2x32xf32>, vector<32x128xf32>, vector<2x128xf32> -> vector<2x128xf32>
    %280 = arith.addf %278, %279 : vector<2x128xf32>
    %281 = vector.broadcast %271 : vector<1x128xf32> to vector<2x128xf32>
    %282 = arith.addf %280, %281 : vector<2x128xf32>
    %283 = vector.extract_strided_slice %282 {offsets = [0, 0], sizes = [2, 32], strides = [1, 1]} : vector<2x128xf32> to vector<2x32xf32>
    %284 = arith.negf %283 : vector<2x32xf32>
    %285 = math.exp %284 : vector<2x32xf32>
    %cst_163 = arith.constant 1.000000e+00 : f32
    %286 = vector.broadcast %cst_163 : f32 to vector<2x32xf32>
    %287 = arith.addf %286, %285 : vector<2x32xf32>
    %288 = arith.divf %286, %287 : vector<2x32xf32>
    %289 = vector.extract_strided_slice %282 {offsets = [0, 32], sizes = [2, 32], strides = [1, 1]} : vector<2x128xf32> to vector<2x32xf32>
    %290 = arith.negf %289 : vector<2x32xf32>
    %291 = math.exp %290 : vector<2x32xf32>
    %cst_164 = arith.constant 1.000000e+00 : f32
    %292 = vector.broadcast %cst_164 : f32 to vector<2x32xf32>
    %293 = arith.addf %292, %291 : vector<2x32xf32>
    %294 = arith.divf %292, %293 : vector<2x32xf32>
    %295 = vector.extract_strided_slice %282 {offsets = [0, 64], sizes = [2, 32], strides = [1, 1]} : vector<2x128xf32> to vector<2x32xf32>
    %296 = math.tanh %295 : vector<2x32xf32>
    %297 = vector.extract_strided_slice %282 {offsets = [0, 96], sizes = [2, 32], strides = [1, 1]} : vector<2x128xf32> to vector<2x32xf32>
    %298 = arith.negf %297 : vector<2x32xf32>
    %299 = math.exp %298 : vector<2x32xf32>
    %cst_165 = arith.constant 1.000000e+00 : f32
    %300 = vector.broadcast %cst_165 : f32 to vector<2x32xf32>
    %301 = arith.addf %300, %299 : vector<2x32xf32>
    %302 = arith.divf %300, %301 : vector<2x32xf32>
    %303 = arith.mulf %294, %267 : vector<2x32xf32>
    %304 = arith.mulf %288, %296 : vector<2x32xf32>
    %305 = arith.addf %303, %304 : vector<2x32xf32>
    %306 = math.tanh %305 : vector<2x32xf32>
    %307 = arith.mulf %302, %306 : vector<2x32xf32>
    %cst_166 = arith.constant dense<0.000000e+00> : vector<16x32xf32>
    %308 = tpu.matmul %260, %272, %cst_166 {dimension_numbers = #tpu.dot_dimension_numbers<[1], [0], [0], [1], [0, 0, 1, 1], [], []>} : vector<16x32xf32>, vector<32x32xf32>, vector<16x32xf32> -> vector<16x32xf32>
    %309 = vector.shape_cast %308 : vector<16x32xf32> to vector<2x8x32xf32>
    %cst_167 = arith.constant dense<0.000000e+00> : vector<2x32xf32>
    %310 = tpu.matmul %307, %273, %cst_167 {dimension_numbers = #tpu.dot_dimension_numbers<[1], [0], [0], [1], [0, 0, 1, 1], [], []>} : vector<2x32xf32>, vector<32x32xf32>, vector<2x32xf32> -> vector<2x32xf32>
    %311 = vector.broadcast %274 : vector<1x32xf32> to vector<2x32xf32>
    %312 = arith.addf %310, %311 : vector<2x32xf32>
    %313 = vector.shape_cast %312 : vector<2x32xf32> to vector<2x1x32xf32>
    %314 = vector.broadcast %313 : vector<2x1x32xf32> to vector<2x8x32xf32>
    %315 = arith.addf %309, %314 : vector<2x8x32xf32>
    %316 = math.tanh %315 : vector<2x8x32xf32>
    %317 = vector.broadcast %275 : vector<1x1x32xf32> to vector<2x8x32xf32>
    %318 = arith.mulf %316, %317 : vector<2x8x32xf32>
    %cst_168 = arith.constant dense<0.000000e+00> : vector<2x8xf32>
    %319 = vector.multi_reduction <add>, %318, %cst_168 [2] : vector<2x8x32xf32> to vector<2x8xf32>
    %320 = math.tanh %319 : vector<2x8xf32>
    %cst_169 = arith.constant 1.000000e+01 : f32
    %321 = vector.broadcast %cst_169 : f32 to vector<2x8xf32>
    %322 = arith.mulf %321, %320 : vector<2x8xf32>
    %323 = arith.addf %322, %264 : vector<2x8xf32>
    %cst_170 = arith.constant dense<0xFF800000> : vector<2xf32>
    %324 = vector.multi_reduction <maximumf>, %323, %cst_170 [1] : vector<2x8xf32> to vector<2xf32>
    %325 = vector.shape_cast %324 : vector<2xf32> to vector<2x1xf32>
    %326 = vector.broadcast %325 : vector<2x1xf32> to vector<2x8xf32>
    %327 = arith.subf %323, %326 : vector<2x8xf32>
    %328 = math.exp %327 : vector<2x8xf32>
    %cst_171 = arith.constant dense<0.000000e+00> : vector<2xf32>
    %329 = vector.multi_reduction <add>, %328, %cst_171 [1] : vector<2x8xf32> to vector<2xf32>
    %330 = vector.shape_cast %329 : vector<2xf32> to vector<2x1xf32>
    %331 = vector.broadcast %330 : vector<2x1xf32> to vector<2x8xf32>
    %332 = arith.divf %328, %331 : vector<2x8xf32>
    %c0_172 = arith.constant 0 : index
    %c0_173 = arith.constant 0 : index
    %333 = vector.load %arg28[%c0_172, %c0_173] : memref<2x8xf32, #tpu.memory_space<vmem>>, vector<2x8xf32>
    tpu.vector_store %arg28[%c0_172, %c0_173], %332 {strides = array<i32>} : memref<2x8xf32, #tpu.memory_space<vmem>>, vector<2x8xf32>,
    %c0_174 = arith.constant 0 : index
    %c0_175 = arith.constant 0 : index
    %334 = vector.load %arg29[%c0_174, %c0_175] : memref<2x32xf32, #tpu.memory_space<vmem>>, vector<2x32xf32>
    tpu.vector_store %arg29[%c0_174, %c0_175], %307 {strides = array<i32>} : memref<2x32xf32, #tpu.memory_space<vmem>>, vector<2x32xf32>,
    %c0_176 = arith.constant 0 : index
    %c0_177 = arith.constant 0 : index
    %335 = vector.load %arg30[%c0_176, %c0_177] : memref<2x32xf32, #tpu.memory_space<vmem>>, vector<2x32xf32>
    tpu.vector_store %arg30[%c0_176, %c0_177], %305 {strides = array<i32>} : memref<2x32xf32, #tpu.memory_space<vmem>>, vector<2x32xf32>,
    return
  }
}

</mosaic_0001>

<bundles_post_ra>
// kernel: tpu_custom_call.1
= control target key start
LH: loop header
LB: loop body
LE: loop exit
PB: predicated region body
PF: predicated region fallthrough
CT: control target
= control target key end

     0   :  { %s6208_s6 = smov 1   ;;  %s6209_s10 = smov 2   ;;  %s7129_s0 = inlined_call_operand.smem [shape: u32[31], index: -1, kind: input, shape index: {}] }
   0x1   :  { %s6285_s5 = sld [smem:[%s7129_s0]]   ;;  %s6210_s14 = smov 3  }
   0x2   :  { %s6290_s9 = sld [smem:[%s7129_s0 + %s6208_s6]]   ;;  %s6211_s18 = smov 4  }
   0x3   :  { %s6295_s13 = sld [smem:[%s7129_s0 + %s6209_s10]]   ;;  %s6212_s22 = smov 5  }
   0x4   :  { %s6300_s17 = sld [smem:[%s7129_s0 + %s6210_s14]]   ;;  %s6213_s26 = smov 6  }
   0x5   :  { %s6305_s21 = sld [smem:[%s7129_s0 + %s6211_s18]]   ;;  %s6214_s30 = smov 7  }
   0x6   :  { %s6310_s25 = sld [smem:[%s7129_s0 + %s6212_s22]]   ;;  %s6215_s4 = smov 8  }
   0x7   :  { %s6315_s29 = sld [smem:[%s7129_s0 + %s6213_s26]]   ;;  %s6216_s10 = smov 9  }
   0x8   :  { %s6320_s3 = sld [smem:[%s7129_s0 + %s6214_s30]]   ;;  %s6217_s15 = smov 10  }
   0x9   :  { %s6325_s8 = sld [smem:[%s7129_s0 + %s6215_s4]]   ;;  %s6218_s20 = smov 11  }
   0xa   :  { %s6330_s14 = sld [smem:[%s7129_s0 + %s6216_s10]]   ;;  %s6219_s26 = smov 12  }
   0xb   :  { %s6335_s19 = sld [smem:[%s7129_s0 + %s6217_s15]]   ;;  %s6220_s1 = smov 13  }
   0xc   :  { %s6340_s24 = sld [smem:[%s7129_s0 + %s6218_s20]]   ;;  %s6221_s7 = smov 14  }
   0xd   :  { %s6345_s30 = sld [smem:[%s7129_s0 + %s6219_s26]]   ;;  %s6222_s15 = smov 15  }
   0xe   :  { %7139 = sst [smem:[#allocation46_spill]] %s6320_s3  ;;  %s6223_s22 = smov 16  }
   0xf   :  { %7140 = sst [smem:[#allocation47_spill]] %s6325_s8  ;;  %s6224_s28 = smov 17  }
  0x10   :  { %7141 = sst [smem:[#allocation48_spill]] %s6330_s14 }
  0x11   :  { %s6350_s6 = sld [smem:[%s7129_s0 + %s6220_s1]]  }
  0x12   :  { %s6355_s12 = sld [smem:[%s7129_s0 + %s6221_s7]]   ;;  %s6225_s7 = smov 18  }
  0x13   :  { %s6360_s20 = sld [smem:[%s7129_s0 + %s6222_s15]]   ;;  %s6226_s15 = smov 19  }
  0x14   :  { %s6365_s27 = sld [smem:[%s7129_s0 + %s6223_s22]]   ;;  %s6227_s22 = smov 20  }
  0x15   :  { %s6370_s4 = sld [smem:[%s7129_s0 + %s6224_s28]]   ;;  %s6228_s28 = smov 21  }
  0x16   :  { %s6375_s14 = sld [smem:[%s7129_s0 + %s6225_s7]]   ;;  %s6229_s7 = smov 22  }
  0x17   :  { %s6385_s8 = sld [smem:[%s7129_s0 + %s6227_s22]]   ;;  %s6231_s22 = smov 24  }
  0x18   :  { %s6390_s3 = sld [smem:[%s7129_s0 + %s6228_s28]]   ;;  %s6232_s28 = smov 25  }
  0x19   :  { %7142 = sst [smem:[#allocation49_spill]] %s6360_s20 }
  0x1a   :  { %s6380_s20 = sld [smem:[%s7129_s0 + %s6226_s15]]   ;;  %s6230_s15 = smov 23  }
  0x1c   :  { %7143 = sst [smem:[#allocation50_spill]] %s6375_s14 }
  0x1d   :  { %7145 = sst [smem:[#allocation52_spill]] %s6385_s8 }
  0x1e   :  { %7146 = sst [smem:[#allocation53_spill]] %s6390_s3 }
  0x1f   :  { %s6395_s14 = sld [smem:[%s7129_s0 + %s6229_s7]]   ;;  %s6233_s7 = smov 26  }
  0x20   :  { %7144 = sst [smem:[#allocation51_spill]] %s6380_s20 }
  0x21   :  { %s6400_s20 = sld [smem:[%s7129_s0 + %s6230_s15]]   ;;  %s6234_s15 = smov 27  }
  0x22   :  { %s6405_s8 = sld [smem:[%s7129_s0 + %s6231_s22]]   ;;  %s6235_s22 = smov 28  }
  0x23   :  { %s6410_s3 = sld [smem:[%s7129_s0 + %s6232_s28]]   ;;  %s6236_s28 = smov 29  }
  0x25   :  { %7147 = sst [smem:[#allocation54_spill]] %s6395_s14 }
  0x26   :  { %s6415_s14 = sld [smem:[%s7129_s0 + %s6233_s7]]   ;;  %s6237_s7 = smov 30  }
  0x27   :  { %7148 = sst [smem:[#allocation55_spill]] %s6400_s20 }
  0x28   :  { %7149 = sst [smem:[#allocation56_spill]] %s6405_s8 }
  0x29   :  { %7150 = sst [smem:[#allocation57_spill]] %s6410_s3 }
  0x2a   :  { %s6420_s20 = sld [smem:[%s7129_s0 + %s6234_s15]]  }
  0x2b   :  { %s6425_s8 = sld [smem:[%s7129_s0 + %s6235_s22]]  }
  0x2c   :  { %7151 = sst [smem:[#allocation58_spill]] %s6415_s14 }
  0x2d   :  { %s6430_s3 = sld [smem:[%s7129_s0 + %s6236_s28]]  }
  0x2e   :  { %s6435_s14 = sld [smem:[%s7129_s0 + %s6237_s7]]  }
  0x2f   :  { %67 = vsyncpa [#allocation3], 0 }
  0x30   :  { %68 = vsyncpa [#allocation6], 0 }
  0x31   :  { %69 = vsyncpa [#allocation9], 0 }
  0x32   :  { %70 = vsyncpa [#allocation12], 0 }
  0x33   :  { %71 = vsyncpa [#allocation15], 0 }
  0x34   :  { %72 = vsyncpa [#allocation18], 0 }
  0x35   :  { %73 = vsyncpa [#allocation21], 0 }
  0x36   :  { %74 = vsyncpa [#allocation24], 0 }
  0x37   :  { %75 = vsyncpa [#allocation27], 0 }
  0x38   :  { %76 = vsyncpa [#allocation4], 0 }
  0x39   :  { %77 = vsyncpa [#allocation30], 0 }
  0x3a   :  { %78 = vsyncpa [#allocation33], 0  ;;  %s6238_s15 = smov [#allocation5]   ;;  %s6239_s18 = smov [#allocation8]  }
  0x3b   :  { %s96_s16 = sshll.u32 %s6238_s15, 4  ;;  %s119_s0 = sshll.u32 %s6239_s18, 4  ;;  %s97_s16 = int_to_ptr.vmem [resolvable:$true] %s96_s16  ;;  %s120_s0 = int_to_ptr.vmem [resolvable:$true] %s119_s0 }
  0x3c   :  { %s5744_s22 = scalar_lea.hbm %s6290_s9, 256 }
  0x3d   :  { %p5745_p0 = scmp.ne.s32.totalorder %s6290_s9, %s5744_s22  ;;  %p5748_p1 = scmp.lt.u32.totalorder %s5744_s22, %s6290_s9 }
  0x3f   :  { %p5750_p2 = pnand %p5748_p1, %p5745_p0 }
  0x41   :  { %5753 = shalt.err (!%p5750_p2)
}
  0x42   :  { %s5754_s23 = scalar_lea.vmem %s97_s16, 256  ;;  %p5759_p4 = scmp.lt.s32.totalorder %s97_s16, %s97_s16 }
  0x43   :  { %p5755_p3 = scmp.ne.s32.totalorder %s97_s16, %s5754_s23  ;;  %p5760_p5 = scmp.lt.s32.totalorder %s5754_s23, %s5754_s23 }
  0x45   :  { %p5761_p6 = por %p5760_p5, %p5759_p4 }
  0x47   :  { %p5762_p7 = pnand %p5761_p6, %p5755_p3 }
  0x49   :  { %5765 = shalt.err (!%p5762_p7)
}
  0x4a   :  { %s6240_s26 = smov 128   ;;  %s6241_s28 = smov 8  }
  0x4b   :  { %102 = dma.hbm_to_vmem [thread:$0]  %s6290_s9, 256, %s97_s16, [#allocation6], %s6240_s26, %s6240_s26, %s6241_s28  }
  0x4c   :  { %s5766_s1 = scalar_lea.hbm %s6300_s17, 32 }
  0x4d   :  { %p5767_p8 = scmp.ne.s32.totalorder %s6300_s17, %s5766_s1  ;;  %p5770_p9 = scmp.lt.u32.totalorder %s5766_s1, %s6300_s17 }
  0x4f   :  { %p5772_p10 = pnand %p5770_p9, %p5767_p8 }
  0x51   :  { %5775 = shalt.err (!%p5772_p10)
}
  0x52   :  { %s5776_s2 = scalar_lea.vmem %s120_s0, 32  ;;  %p5781_p12 = scmp.lt.s32.totalorder %s120_s0, %s120_s0 }
  0x53   :  { %p5777_p11 = scmp.ne.s32.totalorder %s120_s0, %s5776_s2  ;;  %p5782_p13 = scmp.lt.s32.totalorder %s5776_s2, %s5776_s2 }
  0x55   :  { %p5783_p0 = por %p5782_p13, %p5781_p12 }
  0x57   :  { %p5784_p1 = pnand %p5783_p0, %p5777_p11 }
  0x59   :  { %5787 = shalt.err (!%p5784_p1)
}
  0x5a   :  { %122 = dma.hbm_to_vmem [thread:$0]  %s6300_s17, 32, %s120_s0, [#allocation9]  }
  0x5b   :  { %s6242_s7 = smov [#allocation11]   ;;  %s6243_s9 = smov [#allocation14]  }
  0x5c   :  { %s139_s10 = sshll.u32 %s6242_s7, 4  ;;  %s164_s11 = sshll.u32 %s6243_s9, 4  ;;  %s140_s10 = int_to_ptr.vmem [resolvable:$true] %s139_s10  ;;  %s6448_s11 = int_to_ptr.vmem [resolvable:$true] %s164_s11 }
  0x5d   :  { %s5788_s15 = scalar_lea.hbm %s6310_s25, 32 }
  0x5e   :  { %p5789_p2 = scmp.ne.s32.totalorder %s6310_s25, %s5788_s15  ;;  %p5792_p3 = scmp.lt.u32.totalorder %s5788_s15, %s6310_s25 }
  0x60   :  { %p5794_p4 = pnand %p5792_p3, %p5789_p2 }
  0x62   :  { %5797 = shalt.err (!%p5794_p4)
}
  0x63   :  { %s5798_s16 = scalar_lea.vmem %s140_s10, 32  ;;  %p5803_p6 = scmp.lt.s32.totalorder %s140_s10, %s140_s10 }
  0x64   :  { %p5799_p5 = scmp.ne.s32.totalorder %s140_s10, %s5798_s16  ;;  %p5804_p7 = scmp.lt.s32.totalorder %s5798_s16, %s5798_s16 }
  0x66   :  { %p5805_p8 = por %p5804_p7, %p5803_p6 }
  0x68   :  { %p5806_p9 = pnand %p5805_p8, %p5799_p5 }
  0x6a   :  { %5809 = shalt.err (!%p5806_p9)
}
  0x6b   :  { %142 = dma.hbm_to_vmem [thread:$0]  %s6310_s25, 32, %s140_s10, [#allocation12]  }
  0x6c   :  { %s5810_s17 = scalar_lea.hbm %s6335_s19, 32 }
  0x6d   :  { %p5811_p10 = scmp.ne.s32.totalorder %s6335_s19, %s5810_s17  ;;  %p5814_p11 = scmp.lt.u32.totalorder %s5810_s17, %s6335_s19 }
  0x6f   :  { %p5816_p12 = pnand %p5814_p11, %p5811_p10 }
  0x71   :  { %5819 = shalt.err (!%p5816_p12)
}
  0x72   :  { %s5820_s18 = scalar_lea.vmem %s6448_s11, 32  ;;  %p5825_p0 = scmp.lt.s32.totalorder %s6448_s11, %s6448_s11 }
  0x73   :  { %p5821_p13 = scmp.ne.s32.totalorder %s6448_s11, %s5820_s18  ;;  %p5826_p1 = scmp.lt.s32.totalorder %s5820_s18, %s5820_s18 }
  0x75   :  { %p5827_p2 = por %p5826_p1, %p5825_p0 }
  0x77   :  { %p5828_p3 = pnand %p5827_p2, %p5821_p13 }
  0x79   :  { %5831 = shalt.err (!%p5828_p3)
}
  0x7a   :  { %s6244_s0 = smov 16   ;;  %s6245_s25 = smov 1  }
  0x7b   :  { %170 = dma.hbm_to_vmem [thread:$0]  %s6335_s19, 32, %s6448_s11, [#allocation15], %s6244_s0, %s6244_s0, %s6245_s25  }
  0x7c   :  { %s6246_s22 = smov [#allocation17]   ;;  %s6247_s1 = smov [#allocation20]  }
  0x7d   :  { %s188_s23 = sshll.u32 %s6246_s22, 4  ;;  %s212_s2 = sshll.u32 %s6247_s1, 4  ;;  %s189_s23 = int_to_ptr.vmem [resolvable:$true] %s188_s23  ;;  %s6466_s2 = int_to_ptr.vmem [resolvable:$true] %s212_s2 }
  0x7e   :  { %s5832_s7 = scalar_lea.hbm %s6345_s30, 32 }
  0x7f   :  { %p5833_p4 = scmp.ne.s32.totalorder %s6345_s30, %s5832_s7  ;;  %p5836_p5 = scmp.lt.u32.totalorder %s5832_s7, %s6345_s30 }
  0x81   :  { %p5838_p6 = pnand %p5836_p5, %p5833_p4 }
  0x83   :  { %5841 = shalt.err (!%p5838_p6)
}
  0x84   :  { %s5842_s10 = scalar_lea.vmem %s189_s23, 32  ;;  %p5847_p8 = scmp.lt.s32.totalorder %s189_s23, %s189_s23 }
  0x85   :  { %p5843_p7 = scmp.ne.s32.totalorder %s189_s23, %s5842_s10  ;;  %p5848_p9 = scmp.lt.s32.totalorder %s5842_s10, %s5842_s10 }
  0x87   :  { %p5849_p10 = por %p5848_p9, %p5847_p8 }
  0x89   :  { %p5850_p11 = pnand %p5849_p10, %p5843_p7 }
  0x8b   :  { %5853 = shalt.err (!%p5850_p11)
}
  0x8c   :  { %194 = dma.hbm_to_vmem [thread:$0]  %s6345_s30, 32, %s189_s23, [#allocation18], %s6244_s0, %s6244_s0, %s6245_s25  }
  0x8d   :  { %s5854_s19 = scalar_lea.hbm %s6355_s12, 32 }
  0x8e   :  { %p5855_p12 = scmp.ne.s32.totalorder %s6355_s12, %s5854_s19  ;;  %p5858_p13 = scmp.lt.u32.totalorder %s5854_s19, %s6355_s12 }
  0x90   :  { %p5860_p0 = pnand %p5858_p13, %p5855_p12 }
  0x92   :  { %5863 = shalt.err (!%p5860_p0)
}
  0x93   :  { %s5864_s9 = scalar_lea.vmem %s6466_s2, 32  ;;  %p5869_p2 = scmp.lt.s32.totalorder %s6466_s2, %s6466_s2 }
  0x94   :  { %p5865_p1 = scmp.ne.s32.totalorder %s6466_s2, %s5864_s9  ;;  %p5870_p3 = scmp.lt.s32.totalorder %s5864_s9, %s5864_s9 }
  0x96   :  { %p5871_p4 = por %p5870_p3, %p5869_p2 }
  0x98   :  { %p5872_p5 = pnand %p5871_p4, %p5865_p1 }
  0x9a   :  { %5875 = shalt.err (!%p5872_p5)
}
  0x9b   :  { %218 = dma.hbm_to_vmem [thread:$0]  %s6355_s12, 32, %s6466_s2, [#allocation21], %s6244_s0, %s6244_s0, %s6245_s25  }
  0x9c   :  { %s6248_s30 = smov [#allocation23]   ;;  %s6249_s15 = smov [#allocation2]  }
  0x9d   :  { %s238_s11 = sshll.u32 %s6248_s30, 4  ;;  %s84_s16 = sshll.u32 %s6249_s15, 4  ;;  %s239_s11 = int_to_ptr.vmem [resolvable:$true] %s238_s11  ;;  %s6487_s16 = int_to_ptr.vmem [resolvable:$true] %s84_s16 }
  0x9e   :  { %s5876_s17 = scalar_lea.hbm %s6370_s4, 32 }
  0x9f   :  { %p5877_p6 = scmp.ne.s32.totalorder %s6370_s4, %s5876_s17  ;;  %p5880_p7 = scmp.lt.u32.totalorder %s5876_s17, %s6370_s4 }
  0xa1   :  { %p5882_p8 = pnand %p5880_p7, %p5877_p6 }
  0xa3   :  { %5885 = shalt.err (!%p5882_p8)
}
  0xa4   :  { %s5886_s18 = scalar_lea.vmem %s239_s11, 32  ;;  %p5891_p10 = scmp.lt.s32.totalorder %s239_s11, %s239_s11 }
  0xa5   :  { %p5887_p9 = scmp.ne.s32.totalorder %s239_s11, %s5886_s18  ;;  %p5892_p11 = scmp.lt.s32.totalorder %s5886_s18, %s5886_s18 }
  0xa7   :  { %p5893_p12 = por %p5892_p11, %p5891_p10 }
  0xa9   :  { %p5894_p13 = pnand %p5893_p12, %p5887_p9 }
  0xab   :  { %5897 = shalt.err (!%p5894_p13)
}
  0xac   :  { %244 = dma.hbm_to_vmem [thread:$0]  %s6370_s4, 32, %s239_s11, [#allocation24], %s6244_s0, %s6244_s0, %s6245_s25  }
  0xad   :  { %s5898_s12 = scalar_lea.hbm %s6285_s5, 256 }
  0xae   :  { %p5899_p0 = scmp.ne.s32.totalorder %s6285_s5, %s5898_s12  ;;  %p5902_p1 = scmp.lt.u32.totalorder %s5898_s12, %s6285_s5 }
  0xb0   :  { %p5904_p2 = pnand %p5902_p1, %p5899_p0 }
  0xb2   :  { %5907 = shalt.err (!%p5904_p2)
}
  0xb3   :  { %s5908_s22 = scalar_lea.vmem %s6487_s16, 256  ;;  %p5913_p4 = scmp.lt.s32.totalorder %s6487_s16, %s6487_s16 }
  0xb4   :  { %p5909_p3 = scmp.ne.s32.totalorder %s6487_s16, %s5908_s22  ;;  %p5914_p5 = scmp.lt.s32.totalorder %s5908_s22, %s5908_s22 }
  0xb6   :  { %p5915_p6 = por %p5914_p5, %p5913_p4 }
  0xb8   :  { %p5916_p7 = pnand %p5915_p6, %p5909_p3 }
  0xba   :  { %5919 = shalt.err (!%p5916_p7)
}
  0xbb   :  { %90 = dma.hbm_to_vmem [thread:$0]  %s6285_s5, 256, %s6487_s16, [#allocation3], %s6240_s26, %s6240_s26, %s6241_s28  }
  0xbc   :  { %s6250_s4 = smov [#allocation7]   ;;  %s6251_s1 = smov [#allocation10]  }
  0xbd   :  { %s109_s23 = sshll.u32 %s6250_s4, 4  ;;  %s129_s2 = sshll.u32 %s6251_s1, 4  ;;  %s110_s23 = int_to_ptr.vmem [resolvable:$true] %s109_s23  ;;  %s130_s2 = int_to_ptr.vmem [resolvable:$true] %s129_s2 }
  0xbe   :  { %s5920_s7 = scalar_lea.hbm %s6295_s13, 32 }
  0xbf   :  { %p5921_p8 = scmp.ne.s32.totalorder %s6295_s13, %s5920_s7  ;;  %p5924_p9 = scmp.lt.u32.totalorder %s5920_s7, %s6295_s13 }
  0xc1   :  { %p5926_p10 = pnand %p5924_p9, %p5921_p8 }
  0xc3   :  { %5929 = shalt.err (!%p5926_p10)
}
  0xc4   :  { %s5930_s10 = scalar_lea.vmem %s110_s23, 32  ;;  %p5935_p12 = scmp.lt.s32.totalorder %s110_s23, %s110_s23 }
  0xc5   :  { %p5931_p11 = scmp.ne.s32.totalorder %s110_s23, %s5930_s10  ;;  %p5936_p13 = scmp.lt.s32.totalorder %s5930_s10, %s5930_s10 }
  0xc7   :  { %p5937_p0 = por %p5936_p13, %p5935_p12 }
  0xc9   :  { %p5938_p1 = pnand %p5937_p0, %p5931_p11 }
  0xcb   :  { %5941 = shalt.err (!%p5938_p1)
}
  0xcc   :  { %112 = dma.hbm_to_vmem [thread:$0]  %s6295_s13, 32, %s110_s23, [#allocation6]  }
  0xcd   :  { %s5942_s5 = scalar_lea.hbm %s6305_s21, 32 }
  0xce   :  { %p5943_p2 = scmp.ne.s32.totalorder %s6305_s21, %s5942_s5  ;;  %p5946_p3 = scmp.lt.u32.totalorder %s5942_s5, %s6305_s21 }
  0xd0   :  { %p5948_p4 = pnand %p5946_p3, %p5943_p2 }
  0xd2   :  { %5951 = shalt.err (!%p5948_p4)
}
  0xd3   :  { %s5952_s19 = scalar_lea.vmem %s130_s2, 32  ;;  %p5957_p6 = scmp.lt.s32.totalorder %s130_s2, %s130_s2 }
  0xd4   :  { %p5953_p5 = scmp.ne.s32.totalorder %s130_s2, %s5952_s19  ;;  %p5958_p7 = scmp.lt.s32.totalorder %s5952_s19, %s5952_s19 }
  0xd6   :  { %p5959_p8 = por %p5958_p7, %p5957_p6 }
  0xd8   :  { %p5960_p9 = pnand %p5959_p8, %p5953_p5 }
  0xda   :  { %5963 = shalt.err (!%p5960_p9)
}
  0xdb   :  { %132 = dma.hbm_to_vmem [thread:$0]  %s6305_s21, 32, %s130_s2, [#allocation9]  }
  0xdc   :  { %s6252_s9 = smov [#allocation13]   ;;  %s6253_s13 = smov [#allocation16]  }
  0xdd   :  { %s149_s30 = sshll.u32 %s6252_s9, 4  ;;  %s176_s11 = sshll.u32 %s6253_s13, 4  ;;  %s150_s30 = int_to_ptr.vmem [resolvable:$true] %s149_s30  ;;  %s6516_s11 = int_to_ptr.vmem [resolvable:$true] %s176_s11 }
  0xde   :  { %s5964_s15 = scalar_lea.hbm %s6315_s29, 32 }
  0xdf   :  { %p5965_p10 = scmp.ne.s32.totalorder %s6315_s29, %s5964_s15  ;;  %p5968_p11 = scmp.lt.u32.totalorder %s5964_s15, %s6315_s29 }
  0xe1   :  { %p5970_p12 = pnand %p5968_p11, %p5965_p10 }
  0xe3   :  { %5973 = shalt.err (!%p5970_p12)
}
  0xe4   :  { %s5974_s16 = scalar_lea.vmem %s150_s30, 32  ;;  %p5979_p0 = scmp.lt.s32.totalorder %s150_s30, %s150_s30 }
  0xe5   :  { %p5975_p13 = scmp.ne.s32.totalorder %s150_s30, %s5974_s16  ;;  %p5980_p1 = scmp.lt.s32.totalorder %s5974_s16, %s5974_s16 }
  0xe7   :  { %p5981_p2 = por %p5980_p1, %p5979_p0 }
  0xe9   :  { %p5982_p3 = pnand %p5981_p2, %p5975_p13 }
  0xeb   :  { %5985 = shalt.err (!%p5982_p3)
}
  0xec   :  { %152 = dma.hbm_to_vmem [thread:$0]  %s6315_s29, 32, %s150_s30, [#allocation12]  }
  0xed   :  { %s5986_s21 = scalar_lea.hbm %s6340_s24, 32 }
  0xee   :  { %p5987_p4 = scmp.ne.s32.totalorder %s6340_s24, %s5986_s21  ;;  %p5990_p5 = scmp.lt.u32.totalorder %s5986_s21, %s6340_s24 }
  0xf0   :  { %p5992_p6 = pnand %p5990_p5, %p5987_p4 }
  0xf2   :  { %5995 = shalt.err (!%p5992_p6)
}
  0xf3   :  { %s5996_s17 = scalar_lea.vmem %s6516_s11, 32  ;;  %p6001_p8 = scmp.lt.s32.totalorder %s6516_s11, %s6516_s11 }
  0xf4   :  { %p5997_p7 = scmp.ne.s32.totalorder %s6516_s11, %s5996_s17  ;;  %p6002_p9 = scmp.lt.s32.totalorder %s5996_s17, %s5996_s17 }
  0xf6   :  { %p6003_p10 = por %p6002_p9, %p6001_p8 }
  0xf8   :  { %p6004_p11 = pnand %p6003_p10, %p5997_p7 }
  0xfa   :  { %6007 = shalt.err (!%p6004_p11)
}
  0xfb   :  { %182 = dma.hbm_to_vmem [thread:$0]  %s6340_s24, 32, %s6516_s11, [#allocation15], %s6244_s0, %s6244_s0, %s6245_s25  }
  0xfc   :  { %s6254_s29 = smov [#allocation19]   ;;  %s6255_s12 = smov [#allocation22]  }
  0xfd   :  { %s200_s18 = sshll.u32 %s6254_s29, 4  ;;  %s226_s22 = sshll.u32 %s6255_s12, 4  ;;  %s201_s18 = int_to_ptr.vmem [resolvable:$true] %s200_s18  ;;  %s6534_s22 = int_to_ptr.vmem [resolvable:$true] %s226_s22 }
  0xfe   :  { %s6008_s4 = scalar_lea.hbm %s6350_s6, 1024 }
  0xff   :  { %p6009_p12 = scmp.ne.s32.totalorder %s6350_s6, %s6008_s4  ;;  %p6012_p13 = scmp.lt.u32.totalorder %s6008_s4, %s6350_s6 }
 0x101   :  { %p6014_p0 = pnand %p6012_p13, %p6009_p12 }
 0x103   :  { %6017 = shalt.err (!%p6014_p0)
}
 0x104   :  { %s6018_s23 = scalar_lea.vmem %s201_s18, 1024  ;;  %p6023_p2 = scmp.lt.s32.totalorder %s201_s18, %s201_s18 }
 0x105   :  { %p6019_p1 = scmp.ne.s32.totalorder %s201_s18, %s6018_s23  ;;  %p6024_p3 = scmp.lt.s32.totalorder %s6018_s23, %s6018_s23 }
 0x107   :  { %p6025_p4 = por %p6024_p3, %p6023_p2 }
 0x109   :  { %p6026_p5 = pnand %p6025_p4, %p6019_p1 }
 0x10b   :  { %6029 = shalt.err (!%p6026_p5)
}
 0x10c   :  { %206 = dma.hbm_to_vmem [thread:$0]  %s6350_s6, 1024, %s201_s18, [#allocation18], %s6240_s26, %s6240_s26, %s6241_s28  }
 0x10d   :  { %s6030_s24 = scalar_lea.hbm %s6365_s27, 32 }
 0x10e   :  { %p6031_p6 = scmp.ne.s32.totalorder %s6365_s27, %s6030_s24  ;;  %p6034_p7 = scmp.lt.u32.totalorder %s6030_s24, %s6365_s27 }
 0x110   :  { %p6036_p8 = pnand %p6034_p7, %p6031_p6 }
 0x112   :  { %6039 = shalt.err (!%p6036_p8)
}
 0x113   :  { %s6040_s1 = scalar_lea.vmem %s6534_s22, 32  ;;  %p6045_p10 = scmp.lt.s32.totalorder %s6534_s22, %s6534_s22 }
 0x114   :  { %p6041_p9 = scmp.ne.s32.totalorder %s6534_s22, %s6040_s1  ;;  %p6046_p11 = scmp.lt.s32.totalorder %s6040_s1, %s6040_s1 }
 0x116   :  { %p6047_p12 = por %p6046_p11, %p6045_p10 }
 0x118   :  { %p6048_p13 = pnand %p6047_p12, %p6041_p9 }
 0x11a   :  { %6051 = shalt.err (!%p6048_p13)
}
 0x11b   :  { %s7152_s6 = sld [smem:[#allocation55_spill]]  ;;  %s6256_s2 = smov [#allocation25]  }
 0x11c   :  { %232 = dma.hbm_to_vmem [thread:$0]  %s6365_s27, 32, %s6534_s22, [#allocation21], %s6244_s0, %s6244_s0, %s6245_s25  }
 0x11d   :  { %s260_s7 = sshll.u32 %s6256_s2, 4  ;;  %s6257_s10 = smov [#allocation26]   ;;  %s261_s7 = int_to_ptr.vmem [resolvable:$true] %s260_s7 }
 0x11e   :  { %s272_s5 = sshll.u32 %s6257_s10, 4  ;;  %s6555_s5 = int_to_ptr.vmem [resolvable:$true] %s272_s5 }
 0x121   :  { %s6052_s19 = scalar_lea.hbm %s7152_s6, 512 }
 0x122   :  { %p6053_p0 = scmp.ne.s32.totalorder %s7152_s6, %s6052_s19  ;;  %p6056_p1 = scmp.lt.u32.totalorder %s6052_s19, %s7152_s6 }
 0x124   :  { %p6058_p2 = pnand %p6056_p1, %p6053_p0 }
 0x126   :  { %6061 = shalt.err (!%p6058_p2)
}
 0x127   :  { %s6062_s9 = scalar_lea.vmem %s261_s7, 512  ;;  %p6067_p4 = scmp.lt.s32.totalorder %s261_s7, %s261_s7 }
 0x128   :  { %p6063_p3 = scmp.ne.s32.totalorder %s261_s7, %s6062_s9  ;;  %p6068_p5 = scmp.lt.s32.totalorder %s6062_s9, %s6062_s9 }
 0x12a   :  { %p6069_p6 = por %p6068_p5, %p6067_p4 }
 0x12c   :  { %p6070_p7 = pnand %p6069_p6, %p6063_p3 }
 0x12e   :  { %6073 = shalt.err (!%p6070_p7)
}
 0x12f   :  { %s7153_s27 = sld [smem:[#allocation56_spill]] }
 0x130   :  { %266 = dma.hbm_to_vmem [thread:$0]  %s7152_s6, 512, %s261_s7, [#allocation24], %s6240_s26, %s6240_s26, %s6241_s28  }
 0x135   :  { %s6074_s25 = scalar_lea.hbm %s7153_s27, 512 }
 0x136   :  { %p6075_p8 = scmp.ne.s32.totalorder %s7153_s27, %s6074_s25  ;;  %p6078_p9 = scmp.lt.u32.totalorder %s6074_s25, %s7153_s27 }
 0x138   :  { %p6080_p10 = pnand %p6078_p9, %p6075_p8 }
 0x13a   :  { %6083 = shalt.err (!%p6080_p10)
}
 0x13b   :  { %s6084_s30 = scalar_lea.vmem %s6555_s5, 512  ;;  %p6089_p12 = scmp.lt.s32.totalorder %s6555_s5, %s6555_s5 }
 0x13c   :  { %p6085_p11 = scmp.ne.s32.totalorder %s6555_s5, %s6084_s30  ;;  %p6090_p13 = scmp.lt.s32.totalorder %s6084_s30, %s6084_s30 }
 0x13e   :  { %p6091_p0 = por %p6090_p13, %p6089_p12 }
 0x140   :  { %p6092_p1 = pnand %p6091_p0, %p6085_p11 }
 0x142   :  { %6095 = shalt.err (!%p6092_p1)
}
 0x143   :  { %278 = dma.hbm_to_vmem [thread:$0]  %s7153_s27, 512, %s6555_s5, [#allocation27], %s6240_s26, %s6240_s26, %s6241_s28  }
 0x144   :  { %6184 = dma.done.wait [#allocation3], 256  }
 0x145   :  { %6185 = vsyncadd [#allocation3], 4294967040 }
 0x146   :  { %6186 = dma.done.wait [#allocation6], 288  }
 0x147   :  { %6187 = vsyncadd [#allocation6], 4294967008 }
 0x148   :  { %6188 = dma.done.wait [#allocation9], 64  }
 0x149   :  { %6189 = vsyncadd [#allocation9], 4294967232 }
 0x14a   :  { %6190 = dma.done.wait [#allocation12], 64  }
 0x14b   :  { %6191 = vsyncadd [#allocation12], 4294967232 }
 0x14c   :  { %6192 = dma.done.wait [#allocation15], 64  }
 0x14d   :  { %6193 = vsyncadd [#allocation15], 4294967232 }
 0x14e   :  { %6194 = dma.done.wait [#allocation18], 1056  }
 0x14f   :  { %6195 = vsyncadd [#allocation18], 4294966240 }
 0x150   :  { %6196 = dma.done.wait [#allocation21], 64  }
 0x151   :  { %6197 = vsyncadd [#allocation21], 4294967232 }
 0x152   :  { %6198 = dma.done.wait [#allocation24], 544  }
 0x153   :  { %6199 = vsyncadd [#allocation24], 4294966752 }
 0x154   :  { %6200 = dma.done.wait [#allocation27], 512  }
 0x155   :  { %6201 = vsyncadd [#allocation27], 4294966784  ;;  %s7154_s13 = sld [smem:[#allocation46_spill]]  ;;  %s7155_s11 = sld [smem:[#allocation47_spill]]  ;;  %vm369_vm0 = vcmask 261120   ;;  %v6584_v11 = vld [vmem:[#allocation2] sm:$0xff]  ;;  %v1165_v35 = vlaneseq }
 0x156   :  { %5123 = vmatprep.mubr.msk.f32.mxu0 %vm369_vm0, %v6584_v11  ;;  %v6588_v13 = vld [vmem:[#allocation5] sm:$0xff]  ;;  %v6592_v14 = vld [vmem:[#allocation2 + $0x8] sm:$0xff]  ;;  %v6594_v15 = vld [vmem:[#allocation5 + $0x8] sm:$0xff]  ;;  %v6258_v16 = vmov 0.0   ;;  %vm6259_vm1 = vmmov 0   ;;  %vm532_vm2 = vcmask 64512  }
 0x157   :  { %5134 = vmatprep.mubr.msk.f32.mxu1 %vm369_vm0, %v6588_v13  ;;  %s6260_s15 = smov 120   ;;  %s6261_s16 = smov 112   ;;  %v6263_v33 = vmov 1966171168   ;;  %v335_v36 = vld [vmem:[#allocation7] sm:$0x3] }
 0x158   :  { %s6262_s21 = smov 104   ;;  %v1163_v34 = vunpack.c.l.s4 %v6263_v33  ;;  %v4848_v37 = vadd.f32 -1.0, %v335_v36  ;;  %v6671_v39 = vshrl.u32 %v1165_v35, 7  ;;  %s6264_s17 = smov 96   ;;  %vm1924_vm3 = vcmask 130048  }
 0x159   :  { %s6265_s29 = smov 88   ;;  %s6266_s18 = smov 80   ;;  %vm1927_vm4 = vcmask 195584   ;;  %vm2157_vm5 = vcmask 523264   ;;  %vm4745_vm6 = vcmask 254976   ;;  %vm4665_vm7 = vcmask 1041409  }
 0x15a   :  { %v1164_v38 = vunpack.c.0.s8 %v1163_v34  ;;  %v337_v40 = vmul.f32 1e+09, %v4848_v37  ;;  %v6679_v45 = vsub.s32 0, %v6671_v39  ;;  %s6267_s12 = smov 72   ;;  %s7156_s22 = sld [smem:[#allocation48_spill]]  ;;  %vm4668_vm8 = vcmask 58368  }
 0x15b   :  { %v338_v0 = vld [vmem:[%s7154_s13] sm:$0xff]  ;;  %v339_v1 = vld [vmem:[%s7154_s13 + $0x8] sm:$0xff]  ;;  %v340_v5 = vld [vmem:[%s7154_s13 + $0x10] sm:$0xff]  ;;  %s6268_s4 = smov 24   ;;  %s7157_s23 = sld [smem:[#allocation49_spill]] }
 0x15c   :  { %v342_v2 = vld [vmem:[%s7155_s11] sm:$0xff]  ;;  %v5445_v3 = vpack.c.bf16 %v339_v1, %v338_v0  ;;  %v343_v4 = vld [vmem:[%s7155_s11 + $0x8] sm:$0xff]  ;;  %v341_v6 = vld [vmem:[%s7154_s13 + $0x18] sm:$0xff]  ;;  %v6674_v41 = vsub.s32 %v1164_v38, %v6671_v39  ;;  %s7158_s24 = sld [smem:[#allocation50_spill]]  ;;  %s7159_s1 = sld [smem:[#allocation51_spill]] }
 0x15d   :  { %v5453_v7 = vpack.c.bf16 %v343_v4, %v342_v2  ;;  %v5449_v8 = vpack.c.bf16 %v341_v6, %v340_v5  ;;  %v344_v9 = vld [vmem:[%s7155_s11 + $0x10] sm:$0xff]  ;;  %v345_v10 = vld [vmem:[%s7155_s11 + $0x18] sm:$0xff]  ;;  %s7160_s6 = sld [smem:[#allocation52_spill]]  ;;  %s7161_s2 = sld [smem:[#allocation53_spill]] }
 0x15e   :  { %5446 = vmatprep.subr.bf16.mxu0 %v5445_v3  ;;  %v5457_v12 = vpack.c.bf16 %v345_v10, %v344_v9  ;;  %v1168_v42 = vrot.slane %v337_v40, %v6674_v41  ;;  %s7162_s7 = sld [smem:[#allocation54_spill]]  ;;  %s6271_s10 = smov 64  }
 0x15f   :  { %5454 = vmatprep.subr.bf16.mxu1 %v5453_v7  ;;  %5448 = vmatpush3.bf16.msra.mxu0 %v5445_v3  ;;  %s7163_s5 = sld [smem:[#allocation57_spill]]  ;;  %s7164_s19 = sld [smem:[#allocation58_spill]] }
 0x160   :  { %5456 = vmatpush3.bf16.msra.mxu1 %v5453_v7  ;;  %5450 = vmatprep.subr.bf16.mxu0 %v5449_v8  ;;  %v1169_v43 = vcombine.high %v1168_v42, %v1168_v42  ;;  %v1176_v46 = vrot.slane %v1168_v42, %v6674_v41  ;;  %s6273_s9 = smov [#allocation28]  }
 0x161   :  { %5458 = vmatprep.subr.bf16.mxu1 %v5457_v12  ;;  %s4757_s27 = sshll.u32 %s6273_s9, 4  ;;  %s4758_s27 = int_to_ptr.vmem [resolvable:$true] %s4757_s27 }
 0x162   :  { %v1183_v44 = vrot.slane %v1169_v43, %v6674_v41  ;;  %v6686_v49 = vrot.slane %v1176_v46, %v6679_v45  ;;  %s6096_s25 = scalar_lea.vmem %s4758_s27, 256  ;;  %p6101_p3 = scmp.lt.s32.totalorder %s4758_s27, %s4758_s27 }
 0x163   :  { %5452 = vmatpush3.bf16.msra.mxu0 %v5449_v8  ;;  %p6097_p2 = scmp.ne.s32.totalorder %s4758_s27, %s6096_s25  ;;  %p6102_p4 = scmp.lt.s32.totalorder %s6096_s25, %s6096_s25 }
 0x164   :  { %5460 = vmatpush3.bf16.msra.mxu1 %v5457_v12  ;;  %5137 = vmatprep.subr.mxu0 %v6258_v16  ;;  %v6683_v47 = vrot.slane %v1183_v44, %v6679_v45 }
 0x165   :  { %5142 = vmatprep.subr.mxu1 %v6258_v16  ;;  %p6103_p5 = por %p6102_p4, %p6101_p3 }
 0x166   :  { %5124 = vmatmul.mubr.msk.f32.vlgmr.msra.gmra.mrb[0].mxu0 %vm369_vm0, %v6592_v14 }
 0x167   :  { %5135 = vmatmul.mubr.msk.f32.vlgmr.msra.gmra.mrb[0].mxu1 %vm369_vm0, %v6594_v15  ;;  %5139 = vmatprep.mubr.msk.f32.mxu0 %vm6259_vm1, %v6258_v16  ;;  %p6104_p6 = pnand %p6103_p5, %p6097_p2 }
 0x168   :  { %5144 = vmatprep.mubr.msk.f32.mxu1 %vm6259_vm1, %v6258_v16 }
 0x239   :  { %v6606_v17 = vpop.f32.mrb[0].mxu0 }
 0x23a   :  { %v5136_v18 = vpop.f32.mrb[0].mxu1  ;;  %763 = vrot.lane.b32.xlu1 %v6606_v17, %s6260_s15  ;;  %v6610_v19 = vpop.f32.mrb[1].mxu0 }
 0x23b   :  { %765 = vrot.lane.b32.xlu0 %v5136_v18, %s6260_s15  ;;  %v523_v20 = vpop.f32.mrb[1].mxu1  ;;  %5143 = vmatpush3.xpose.msk.msra.mxu1 %vm532_vm2, %v5136_v18 }
 0x23c   :  { %5138 = vmatpush3.xpose.msk.msra.mxu0 %vm532_vm2, %v523_v20  ;;  %5152 = vmatprep.subr.mxu1 %v6258_v16 }
 0x23d   :  { %5147 = vmatprep.subr.mxu0 %v6258_v16 }
 0x23e   :  { %5145 = vmatmul.mubr.msk.f32.vlgmr.msra.gmra.mrb[2].mxu1 %vm532_vm2, %v6606_v17  ;;  %921 = vrot.lane.b32.xlu1 %v5136_v18, %s6261_s16 }
 0x23f   :  { %687 = vrot.lane.b32.xlu0 %v523_v20, %s6260_s15  ;;  %5140 = vmatmul.mubr.msk.f32.vlgmr.msra.gmra.mrb[2].mxu0 %vm532_vm2, %v6610_v19 }
 0x240   :  { %5154 = vmatprep.mubr.msk.f32.mxu1 %vm6259_vm1, %v6258_v16  ;;  %5149 = vmatprep.mubr.msk.f32.mxu0 %vm6259_vm1, %v6258_v16 }
 0x242   :  { %685 = vrot.lane.b32.xlu1 %v6610_v19, %s6260_s15 }
 0x243   :  { %843 = vrot.lane.b32.xlu0 %v523_v20, %s6261_s16 }
 0x246   :  { %919 = vrot.lane.b32.xlu1 %v6606_v17, %s6261_s16 }
 0x247   :  { %841 = vrot.lane.b32.xlu0 %v6610_v19, %s6261_s16 }
 0x24a   :  { %1077 = vrot.lane.b32.xlu1 %v5136_v18, %s6262_s21 }
 0x24b   :  { %999 = vrot.lane.b32.xlu0 %v523_v20, %s6262_s21 }
 0x24e   :  { %1075 = vrot.lane.b32.xlu1 %v6606_v17, %s6262_s21 }
 0x24f   :  { %997 = vrot.lane.b32.xlu0 %v6610_v19, %s6262_s21 }
 0x2ac   :  { %v764_v21 = vpop.permute.xlu1 %763 }
 0x2ad   :  { %v766_v22 = vpop.permute.xlu0 %765 }
 0x2ae   :  { %5153 = vmatpush3.xpose.msk.msra.mxu1 %vm532_vm2, %v766_v22 }
 0x2af   :  { %5162 = vmatprep.subr.mxu1 %v6258_v16 }
 0x2b0   :  { %v922_v23 = vpop.permute.xlu1 %921 }
 0x2b1   :  { %v688_v24 = vpop.permute.xlu0 %687  ;;  %5155 = vmatmul.mubr.msk.f32.vlgmr.msra.gmra.mrb[4].mxu1 %vm532_vm2, %v764_v21 }
 0x2b2   :  { %5148 = vmatpush3.xpose.msk.msra.mxu0 %vm532_vm2, %v688_v24  ;;  %5163 = vmatpush3.xpose.msk.msra.mxu1 %vm532_vm2, %v922_v23 }
 0x2b3   :  { %5157 = vmatprep.subr.mxu0 %v6258_v16  ;;  %5164 = vmatprep.mubr.msk.f32.mxu1 %vm6259_vm1, %v6258_v16 }
 0x2b4   :  { %v686_v25 = vpop.permute.xlu1 %685  ;;  %5172 = vmatprep.subr.mxu1 %v6258_v16 }
 0x2b5   :  { %v844_v26 = vpop.permute.xlu0 %843  ;;  %5150 = vmatmul.mubr.msk.f32.vlgmr.msra.gmra.mrb[4].mxu0 %vm532_vm2, %v686_v25 }
 0x2b6   :  { %5158 = vmatpush3.xpose.msk.msra.mxu0 %vm532_vm2, %v844_v26  ;;  %5159 = vmatprep.mubr.msk.f32.mxu0 %vm6259_vm1, %v6258_v16 }
 0x2b7   :  { %5167 = vmatprep.subr.mxu0 %v6258_v16 }
 0x2b8   :  { %v920_v27 = vpop.permute.xlu1 %919 }
 0x2b9   :  { %v842_v28 = vpop.permute.xlu0 %841  ;;  %5165 = vmatmul.mubr.msk.f32.vlgmr.msra.gmra.mrb[6].mxu1 %vm532_vm2, %v920_v27 }
 0x2ba   :  { %5160 = vmatmul.mubr.msk.f32.vlgmr.msra.gmra.mrb[6].mxu0 %vm532_vm2, %v842_v28  ;;  %5174 = vmatprep.mubr.msk.f32.mxu1 %vm6259_vm1, %v6258_v16 }
 0x2bb   :  { %5169 = vmatprep.mubr.msk.f32.mxu0 %vm6259_vm1, %v6258_v16 }
 0x2bc   :  { %v1078_v29 = vpop.permute.xlu1 %1077 }
 0x2bd   :  { %v1000_v30 = vpop.permute.xlu0 %999  ;;  %5173 = vmatpush3.xpose.msk.msra.mxu1 %vm532_vm2, %v1078_v29 }
 0x2be   :  { %5168 = vmatpush3.xpose.msk.msra.mxu0 %vm532_vm2, %v1000_v30  ;;  %5182 = vmatprep.subr.mxu1 %v6258_v16 }
 0x2bf   :  { %5177 = vmatprep.subr.mxu0 %v6258_v16 }
 0x2c0   :  { %v1076_v31 = vpop.permute.xlu1 %1075 }
 0x2c1   :  { %v998_v32 = vpop.permute.xlu0 %997  ;;  %5175 = vmatmul.mubr.msk.f32.vlgmr.msra.gmra.mrb[8].mxu1 %vm532_vm2, %v1076_v31 }
 0x2c2   :  { %5170 = vmatmul.mubr.msk.f32.vlgmr.msra.gmra.mrb[8].mxu0 %vm532_vm2, %v998_v32  ;;  %5184 = vmatprep.mubr.msk.f32.mxu1 %vm6259_vm1, %v6258_v16 }
 0x2c3   :  { %5179 = vmatprep.mubr.msk.f32.mxu0 %vm6259_vm1, %v6258_v16 }
 0x311   :  { %v681_v48 = vpop.f32.mrb[2].mxu1 }
 0x312   :  { %v1157_v50 = vmul.f32 0.35355338, %v681_v48  ;;  %v605_v51 = vpop.f32.mrb[2].mxu0  ;;  %v5146_v52 = vpop.f32.mrb[3].mxu1 }
 0x313   :  { %v1153_v53 = vmul.f32 0.35355338, %v605_v51  ;;  %v5141_v54 = vpop.f32.mrb[3].mxu0 }
 0x314   :  { %v1198_v55 = vadd.f32 %v6683_v47, %v1157_v50 }
 0x315   :  { %v1194_v56 = vadd.f32 %v6686_v49, %v1153_v53 }
 0x316   :  { %v1214_v57 = vsel %vm532_vm2, %v1198_v55, -inf }
 0x317   :  { %1215 = vmax.xlane.f32.xlu1 %v1214_v57  ;;  %v1202_v58 = vsel %vm532_vm2, %v1194_v56, -inf }
 0x318   :  { %1203 = vmax.xlane.f32.xlu0 %v1202_v58 }
 0x384   :  { %v837_v59 = vpop.f32.mrb[4].mxu1 }
 0x385   :  { %v5156_v60 = vpop.f32.mrb[5].mxu1  ;;  %v1158_v62 = vmul.f32 0.35355338, %v837_v59 }
 0x387   :  { %v1199_v7 = vadd.f32 %v6683_v47, %v1158_v62 }
 0x388   :  { %v759_v61 = vpop.f32.mrb[4].mxu0 }
 0x389   :  { %v1154_v63 = vmul.f32 0.35355338, %v759_v61  ;;  %v5151_v0 = vpop.f32.mrb[5].mxu0  ;;  %v1217_v12 = vsel %vm532_vm2, %v1199_v7, -inf }
 0x38b   :  { %v1195_v1 = vadd.f32 %v6686_v49, %v1154_v63 }
 0x38c   :  { %v993_v2 = vpop.f32.mrb[6].mxu1 }
 0x38d   :  { %v915_v3 = vpop.f32.mrb[6].mxu0  ;;  %v1159_v4 = vmul.f32 0.35355338, %v993_v2  ;;  %v5166_v5 = vpop.f32.mrb[7].mxu1  ;;  %v1205_v6 = vsel %vm532_vm2, %v1195_v1, -inf }
 0x38e   :  { %v1155_v8 = vmul.f32 0.35355338, %v915_v3  ;;  %v5161_v9 = vpop.f32.mrb[7].mxu0  ;;  %1206 = vmax.xlane.f32.xlu0 %v1205_v6 }
 0x38f   :  { %v1200_v18 = vadd.f32 %v6683_v47, %v1159_v4 }
 0x390   :  { %v1196_v10 = vadd.f32 %v6686_v49, %v1155_v8 }
 0x391   :  { %v1220_v25 = vsel %vm532_vm2, %v1200_v18, -inf }
 0x392   :  { %1218 = vmax.xlane.f32.xlu0 %v1217_v12  ;;  %v1208_v20 = vsel %vm532_vm2, %v1196_v10, -inf }
 0x393   :  { %1209 = vmax.xlane.f32.xlu1 %v1208_v20 }
 0x394   :  { %v1149_v21 = vpop.f32.mrb[8].mxu1 }
 0x395   :  { %v1071_v22 = vpop.f32.mrb[8].mxu0  ;;  %v1160_v23 = vmul.f32 0.35355338, %v1149_v21  ;;  %v5176_v24 = vpop.f32.mrb[9].mxu1 }
 0x396   :  { %v1156_v26 = vmul.f32 0.35355338, %v1071_v22  ;;  %v5171_v27 = vpop.f32.mrb[9].mxu0  ;;  %1221 = vmax.xlane.f32.xlu0 %v1220_v25 }
 0x397   :  { %v1201_v28 = vadd.f32 %v6683_v47, %v1160_v23 }
 0x398   :  { %v1197_v29 = vadd.f32 %v6686_v49, %v1156_v26 }
 0x399   :  { %v1223_v30 = vsel %vm532_vm2, %v1201_v28, -inf }
 0x39a   :  { %1224 = vmax.xlane.f32.xlu0 %v1223_v30  ;;  %v1211_v31 = vsel %vm532_vm2, %v1197_v29, -inf }
 0x39b   :  { %1212 = vmax.xlane.f32.xlu1 %v1211_v31 }
 0x3a4   :  { %v1216_v32 = vpop.xlane.xlu1 %1215 }
 0x3a5   :  { %v1230_v33 = vsub.f32 %v1198_v55, %v1216_v32  ;;  %v1204_v36 = vpop.xlane.xlu0 %1203 }
 0x3a6   :  { %v1226_v37 = vsub.f32 %v1194_v56, %v1204_v36 }
 0x3a7   :  { %v1242_v34 = vmul.f32 1.442695, %v1230_v33 }
 0x3a8   :  { %v1234_v38 = vmul.f32 1.442695, %v1226_v37 }
 0x3a9   :  { %5638 = vpow2.f32 %v1242_v34 }
 0x3aa   :  { %5640 = vpow2.f32 %v1234_v38 }
 0x3ac   :  { %1290 = vrot.lane.b32.xlu1 %v6610_v19, %s6264_s17 }
 0x3b0   :  { %1442 = vrot.lane.b32.xlu1 %v6610_v19, %s6265_s29  ;;  %1366 = vrot.lane.b32.xlu0 %v6606_v17, %s6264_s17 }
 0x3b3   :  { %v6716_v40 = vpop.eup %5638 }
 0x3b4   :  { %1518 = vrot.lane.b32.xlu1 %v6606_v17, %s6265_s29  ;;  %1594 = vrot.lane.b32.xlu0 %v6610_v19, %s6266_s18  ;;  %v1262_v42 = vsel %vm532_vm2, %v6716_v40, 0.0  ;;  %v6720_v43 = vpop.eup %5640 }
 0x3b5   :  { %v1250_v44 = vsel %vm532_vm2, %v6720_v43, 0.0 }
 0x3b8   :  { %1670 = vrot.lane.b32.xlu1 %v6606_v17, %s6266_s18 }
 0x3d3   :  { %1263 = vadd.xlane.f32.xlu0 %v1262_v42 }
 0x3dc   :  { %1251 = vadd.xlane.f32.xlu1 %v1250_v44 }
 0x41b   :  { %v1207_v46 = vpop.xlane.xlu0 %1206 }
 0x41c   :  { %v1227_v48 = vsub.f32 %v1195_v1, %v1207_v46 }
 0x41e   :  { %v1236_v50 = vmul.f32 1.442695, %v1227_v48 }
 0x41f   :  { %v1219_v51 = vpop.xlane.xlu0 %1218 }
 0x420   :  { %5642 = vpow2.f32 %v1236_v50  ;;  %v1231_v52 = vsub.f32 %v1199_v7, %v1219_v51  ;;  %v1210_v53 = vpop.xlane.xlu1 %1209 }
 0x421   :  { %v1228_v54 = vsub.f32 %v1196_v10, %v1210_v53 }
 0x422   :  { %v1244_v55 = vmul.f32 1.442695, %v1231_v52 }
 0x423   :  { %v1238_v56 = vmul.f32 1.442695, %v1228_v54  ;;  %v1222_v57 = vpop.xlane.xlu0 %1221 }
 0x424   :  { %5644 = vpow2.f32 %v1244_v55  ;;  %v1232_v58 = vsub.f32 %v1200_v18, %v1222_v57 }
 0x425   :  { %5646 = vpow2.f32 %v1238_v56 }
 0x426   :  { %v1246_v59 = vmul.f32 1.442695, %v1232_v58 }
 0x427   :  { %v1225_v60 = vpop.xlane.xlu0 %1224 }
 0x428   :  { %5648 = vpow2.f32 %v1246_v59  ;;  %v1233_v61 = vsub.f32 %v1201_v28, %v1225_v60  ;;  %v1213_v62 = vpop.xlane.xlu1 %1212 }
 0x429   :  { %v1229_v63 = vsub.f32 %v1197_v29, %v1213_v62  ;;  %v347_v62 = vld [vmem:[%s7156_s22 + $0x8] sm:$0xff] }
 0x42a   :  { %v5643_v0 = vpop.eup %5642  ;;  %v1248_v1 = vmul.f32 1.442695, %v1233_v61  ;;  %v346_v61 = vld [vmem:[%s7156_s22] sm:$0xff] }
 0x42b   :  { %v1240_v2 = vmul.f32 1.442695, %v1229_v63  ;;  %v1367_v3 = vpop.permute.xlu0 %1366  ;;  %v1253_v4 = vsel %vm532_vm2, %v5643_v0, 0.0  ;;  %v5461_v63 = vpack.c.bf16 %v347_v62, %v346_v61  ;;  %v358_v61 = vld [vmem:[%s7157_s23] sm:$0xff]  ;;  %v359_v62 = vld [vmem:[%s7157_s23 + $0x8] sm:$0xff] }
 0x42c   :  { %5650 = vpow2.f32 %v1248_v1  ;;  %v1291_v5 = vpop.permute.xlu1 %1290  ;;  %5183 = vmatpush3.msra.mxu1 %v1367_v3  ;;  %1254 = vadd.xlane.f32.xlu1 %v1253_v4  ;;  %v349_v1 = vld [vmem:[%s7156_s22 + $0x18] sm:$0xff] }
 0x42d   :  { %5652 = vpow2.f32 %v1240_v2  ;;  %5178 = vmatpush3.msra.mxu0 %v1291_v5  ;;  %5192 = vmatprep.subr.mxu1 %v6258_v16 }
 0x42e   :  { %v5645_v6 = vpop.eup %5644  ;;  %5187 = vmatprep.subr.mxu0 %v6258_v16 }
 0x42f   :  { %v5647_v7 = vpop.eup %5646  ;;  %v1265_v8 = vsel %vm532_vm2, %v5645_v6, 0.0  ;;  %v1595_v24 = vpop.permute.xlu0 %1594 }
 0x430   :  { %1266 = vadd.xlane.f32.xlu0 %v1265_v8  ;;  %v1256_v9 = vsel %vm532_vm2, %v5647_v7, 0.0  ;;  %v1443_v23 = vpop.permute.xlu1 %1442 }
 0x431   :  { %1257 = vadd.xlane.f32.xlu1 %v1256_v9 }
 0x432   :  { %v5649_v10 = vpop.eup %5648 }
 0x433   :  { %v1268_v12 = vsel %vm532_vm2, %v5649_v10, 0.0 }
 0x434   :  { %1269 = vadd.xlane.f32.xlu0 %v1268_v12  ;;  %v1519_v25 = vpop.permute.xlu1 %1518 }
 0x436   :  { %v6730_v18 = vpop.eup %5650 }
 0x437   :  { %v6732_v20 = vpop.eup %5652  ;;  %v1271_v21 = vsel %vm532_vm2, %v6730_v18, 0.0 }
 0x438   :  { %1272 = vadd.xlane.f32.xlu0 %v1271_v21  ;;  %v1259_v22 = vsel %vm532_vm2, %v6732_v20, 0.0  ;;  %v1671_v27 = vpop.permute.xlu1 %1670 }
 0x439   :  { %1260 = vadd.xlane.f32.xlu1 %v1259_v22 }
 0x44a   :  { %1822 = vrot.lane.b32.xlu1 %v6606_v17, %s6267_s12 }
 0x44e   :  { %1746 = vrot.lane.b32.xlu0 %v6610_v19, %s6267_s12 }
 0x460   :  { %v1264_v26 = vpop.xlane.xlu0 %1263 }
 0x461   :  { %5654 = vrcp.f32 %v1264_v26 }
 0x469   :  { %v1252_v28 = vpop.xlane.xlu1 %1251 }
 0x46a   :  { %5656 = vrcp.f32 %v1252_v28 }
 0x46b   :  { %v5655_v29 = vpop.eup %5654 }
 0x46c   :  { %v1286_v30 = vmul.f32 %v5655_v29, %v6716_v40 }
 0x46e   :  { %5185 = vmatmul.mubr.msk.f32.vlgmr.msra.gmra.mrb[10].mxu1 %vm532_vm2, %v1286_v30 }
 0x46f   :  { %5193 = vmatpush3.msra.mxu1 %v1519_v25  ;;  %5194 = vmatprep.mubr.msk.f32.mxu1 %vm6259_vm1, %v6258_v16 }
 0x470   :  { %5202 = vmatprep.subr.mxu1 %v6258_v16 }
 0x474   :  { %v5657_v17 = vpop.eup %5656 }
 0x475   :  { %v1282_v19 = vmul.f32 %v5657_v17, %v6720_v43 }
 0x477   :  { %5180 = vmatmul.mubr.msk.f32.vlgmr.msra.gmra.mrb[10].mxu0 %vm532_vm2, %v1282_v19 }
 0x478   :  { %5188 = vmatpush3.msra.mxu0 %v1443_v23  ;;  %5189 = vmatprep.mubr.msk.f32.mxu0 %vm6259_vm1, %v6258_v16 }
 0x479   :  { %5197 = vmatprep.subr.mxu0 %v6258_v16 }
 0x4b9   :  { %v1255_v31 = vpop.xlane.xlu1 %1254 }
 0x4ba   :  { %5658 = vrcp.f32 %v1255_v31 }
 0x4bd   :  { %v1267_v32 = vpop.xlane.xlu0 %1266 }
 0x4be   :  { %5660 = vrcp.f32 %v1267_v32  ;;  %v1258_v33 = vpop.xlane.xlu1 %1257  ;;  %v4877_v32 = vld [vmem:[#allocation14] ss:$0 sm:$0xff] }
 0x4bf   :  { %5662 = vrcp.f32 %v1258_v33 }
 0x4c1   :  { %v1270_v34 = vpop.xlane.xlu0 %1269 }
 0x4c2   :  { %5664 = vrcp.f32 %v1270_v34 }
 0x4c4   :  { %v5659_v36 = vpop.eup %5658 }
 0x4c5   :  { %v1283_v37 = vmul.f32 %v5659_v36, %v5643_v0  ;;  %v1273_v38 = vpop.xlane.xlu0 %1272  ;;  %v348_v0 = vld [vmem:[%s7156_s22 + $0x10] sm:$0xff] }
 0x4c6   :  { %5666 = vrcp.f32 %v1273_v38  ;;  %v1261_v40 = vpop.xlane.xlu1 %1260  ;;  %v5465_v2 = vpack.c.bf16 %v349_v1, %v348_v0  ;;  %v5477_v0 = vpack.c.bf16 %v359_v62, %v358_v61  ;;  %v361_v1 = vld [vmem:[%s7157_s23 + $0x18] sm:$0xff]  ;;  %v4891_v61 = vld [vmem:[%s7154_s13 + $0x28] sm:$0xff] }
 0x4c7   :  { %5668 = vrcp.f32 %v1261_v40  ;;  %5190 = vmatmul.mubr.msk.f32.vlgmr.msra.gmra.mrb[12].mxu0 %vm532_vm2, %v1283_v37 }
 0x4c8   :  { %v5661_v42 = vpop.eup %5660  ;;  %5198 = vmatpush3.msra.mxu0 %v1595_v24  ;;  %5199 = vmatprep.mubr.msk.f32.mxu0 %vm6259_vm1, %v6258_v16 }
 0x4c9   :  { %v5663_v43 = vpop.eup %5662  ;;  %v1287_v44 = vmul.f32 %v5661_v42, %v5645_v6  ;;  %5207 = vmatprep.subr.mxu0 %v6258_v16  ;;  %v1747_v48 = vpop.permute.xlu0 %1746 }
 0x4ca   :  { %v1284_v46 = vmul.f32 %v5663_v43, %v5647_v7  ;;  %v1823_v52 = vpop.permute.xlu1 %1822 }
 0x4cb   :  { %5195 = vmatmul.mubr.msk.f32.vlgmr.msra.gmra.mrb[12].mxu1 %vm532_vm2, %v1287_v44 }
 0x4cc   :  { %v5665_v50 = vpop.eup %5664  ;;  %5200 = vmatmul.mubr.msk.f32.vlgmr.msra.gmra.mrb[14].mxu0 %vm532_vm2, %v1284_v46  ;;  %5203 = vmatpush3.msra.mxu1 %v1671_v27 }
 0x4cd   :  { %v1288_v51 = vmul.f32 %v5665_v50, %v5649_v10  ;;  %5208 = vmatpush3.msra.mxu0 %v1747_v48  ;;  %5204 = vmatprep.mubr.msk.f32.mxu1 %vm6259_vm1, %v6258_v16 }
 0x4ce   :  { %5212 = vmatprep.subr.mxu1 %v6258_v16  ;;  %5209 = vmatprep.mubr.msk.f32.mxu0 %vm6259_vm1, %v6258_v16 }
 0x4cf   :  { %5205 = vmatmul.mubr.msk.f32.vlgmr.msra.gmra.mrb[14].mxu1 %vm532_vm2, %v1288_v51  ;;  %5462 = vmatprep.subr.bf16.mxu0 %v5461_v63 }
 0x4d0   :  { %v5667_v53 = vpop.eup %5666  ;;  %5213 = vmatpush3.msra.mxu1 %v1823_v52  ;;  %5214 = vmatprep.mubr.msk.f32.mxu1 %vm6259_vm1, %v6258_v16 }
 0x4d1   :  { %v5669_v54 = vpop.eup %5668  ;;  %v1289_v55 = vmul.f32 %v5667_v53, %v6730_v18 }
 0x4d2   :  { %v1285_v56 = vmul.f32 %v5669_v54, %v6732_v20 }
 0x4d3   :  { %5215 = vmatmul.mubr.msk.f32.vlgmr.msra.gmra.mrb[16].mxu1 %vm532_vm2, %v1289_v55  ;;  %v353_v55 = vld [vmem:[#allocation19] sm:$0xff] }
 0x4d4   :  { %5210 = vmatmul.mubr.msk.f32.vlgmr.msra.gmra.mrb[16].mxu0 %vm532_vm2, %v1285_v56  ;;  %v354_v56 = vld [vmem:[#allocation19 + $0x8] sm:$0xff] }
 0x4d5   :  { %5464 = vmatpush3.bf16.msra.mxu0 %v5461_v63  ;;  %v360_v63 = vld [vmem:[%s7157_s23 + $0x10] sm:$0xff] }
 0x4d6   :  { %5466 = vmatprep.subr.bf16.mxu0 %v5465_v2 }
 0x4d9   :  { %5468 = vmatpush3.bf16.msra.mxu0 %v5465_v2  ;;  %v5481_v2 = vpack.c.bf16 %v361_v1, %v360_v63  ;;  %v4892_v63 = vld [vmem:[%s7154_s13 + $0x30] sm:$0xff] }
 0x4da   :  { %5478 = vmatprep.subr.bf16.mxu0 %v5477_v0 }
 0x541   :  { %v1438_v57 = vpop.f32.mrb[10].mxu1 }
 0x542   :  { %v5186_v58 = vpop.f32.mrb[11].mxu1 }
 0x543   :  { %v355_v58 = vld [vmem:[#allocation19 + $0x10] sm:$0xff] }
 0x54a   :  { %v1362_v59 = vpop.f32.mrb[10].mxu0 }
 0x54b   :  { %v5181_v60 = vpop.f32.mrb[11].mxu0 }
 0x59a   :  { %v1514_v3 = vpop.f32.mrb[12].mxu0 }
 0x59b   :  { %1900 = vrot.lane.b32.xlu0 %v1514_v3, %s6241_s28  ;;  %v5191_v4 = vpop.f32.mrb[13].mxu0  ;;  %v362_v3 = vld [vmem:[%s7157_s23 + $0x20] sm:$0xff] }
 0x59c   :  { %v363_v4 = vld [vmem:[%s7157_s23 + $0x28] sm:$0xff] }
 0x59e   :  { %v1590_v5 = vpop.f32.mrb[12].mxu1 }
 0x59f   :  { %v1666_v6 = vpop.f32.mrb[14].mxu0  ;;  %1902 = vrot.lane.b32.xlu1 %v1590_v5, %s6241_s28  ;;  %v5196_v7 = vpop.f32.mrb[13].mxu1  ;;  %v5485_v5 = vpack.c.bf16 %v363_v4, %v362_v3  ;;  %v4895_v3 = vld [vmem:[%s7155_s11 + $0x28] sm:$0xff] }
 0x5a0   :  { %1908 = vrot.lane.b32.xlu0 %v1666_v6, %s6244_s0  ;;  %v5201_v8 = vpop.f32.mrb[15].mxu0 }
 0x5a2   :  { %v1742_v9 = vpop.f32.mrb[14].mxu1 }
 0x5a3   :  { %1910 = vrot.lane.b32.xlu1 %v1742_v9, %s6244_s0  ;;  %v5206_v10 = vpop.f32.mrb[15].mxu1 }
 0x5a6   :  { %v1894_v12 = vpop.f32.mrb[16].mxu1 }
 0x5a7   :  { %v1818_v18 = vpop.f32.mrb[16].mxu0  ;;  %1918 = vrot.lane.b32.xlu1 %v1894_v12, %s6268_s4  ;;  %v5216_v20 = vpop.f32.mrb[17].mxu1 }
 0x5a8   :  { %1916 = vrot.lane.b32.xlu0 %v1818_v18, %s6268_s4  ;;  %v5211_v21 = vpop.f32.mrb[17].mxu0  ;;  %v4880_v20 = vld [vmem:[#allocation16] ss:$0 sm:$0xff] }
 0x60d   :  { %v1901_v22 = vpop.permute.xlu0 %1900 }
 0x60e   :  { %v1922_v27 = vsel %vm532_vm2, %v1362_v59, %v1901_v22  ;;  %v356_v59 = vld [vmem:[#allocation19 + $0x18] sm:$0xff] }
 0x60f   :  { %v5473_v60 = vpack.c.bf16 %v356_v59, %v355_v58  ;;  %v4881_v22 = vld [vmem:[#allocation17] ss:$0 sm:$0xff] }
 0x611   :  { %v1903_v23 = vpop.permute.xlu1 %1902 }
 0x612   :  { %v1909_v25 = vpop.permute.xlu0 %1908  ;;  %v1923_v26 = vsel %vm532_vm2, %v1438_v57, %v1903_v23  ;;  %v5469_v57 = vpack.c.bf16 %v354_v56, %v353_v55 }
 0x613   :  { %v1925_v30 = vsel %vm1924_vm3, %v1922_v27, %v1909_v25 }
 0x614   :  { %5470 = vmatprep.subr.bf16.mxu1 %v5469_v57 }
 0x615   :  { %v1911_v24 = vpop.permute.xlu1 %1910  ;;  %5472 = vmatpush3.bf16.msra.mxu1 %v5469_v57 }
 0x616   :  { %v1926_v28 = vsel %vm1924_vm3, %v1923_v26, %v1911_v24  ;;  %5474 = vmatprep.subr.bf16.mxu1 %v5473_v60 }
 0x619   :  { %v1919_v29 = vpop.permute.xlu1 %1918  ;;  %5476 = vmatpush3.bf16.msra.mxu1 %v5473_v60  ;;  %v4890_v60 = vld [vmem:[%s7154_s13 + $0x20] sm:$0xff] }
 0x61a   :  { %v1929_v17 = vsel %vm1927_vm4, %v1926_v28, %v1919_v29  ;;  %v1917_v19 = vpop.permute.xlu0 %1916  ;;  %v364_v29 = vld [vmem:[%s7157_s23 + $0x30] sm:$0xff]  ;;  %v5493_v62 = vpack.c.bf16 %v4891_v61, %v4890_v60 }
 0x61b   :  { %v1928_v31 = vsel %vm1927_vm4, %v1925_v30, %v1917_v19  ;;  %v365_v30 = vld [vmem:[%s7157_s23 + $0x38] sm:$0xff]  ;;  %v4882_v19 = vld [vmem:[#allocation20] ss:$0 sm:$0xff] }
 0x61c   :  { %5225 = vmatprep.mubr.msk.f32.mxu0 %vm369_vm0, %v1928_v31  ;;  %5494 = vmatprep.subr.bf16.mxu1 %v5493_v62 }
 0x61d   :  { %5226 = vmatmul.mubr.msk.f32.vlgmr.msra.gmra.mrb[18].mxu0 %vm369_vm0, %v1929_v17  ;;  %v5489_v17 = vpack.c.bf16 %v365_v30, %v364_v29 }
 0x61e   :  { %5480 = vmatpush3.bf16.msra.mxu0 %v5477_v0  ;;  %v4893_v0 = vld [vmem:[%s7154_s13 + $0x38] sm:$0xff] }
 0x61f   :  { %5482 = vmatprep.subr.bf16.mxu0 %v5481_v2  ;;  %v5497_v1 = vpack.c.bf16 %v4893_v0, %v4892_v63 }
 0x622   :  { %5484 = vmatpush3.bf16.msra.mxu0 %v5481_v2  ;;  %v4894_v2 = vld [vmem:[%s7155_s11 + $0x20] sm:$0xff] }
 0x623   :  { %5486 = vmatprep.subr.bf16.mxu0 %v5485_v5  ;;  %v5501_v4 = vpack.c.bf16 %v4895_v3, %v4894_v2 }
 0x626   :  { %5488 = vmatpush3.bf16.msra.mxu0 %v5485_v5 }
 0x627   :  { %5490 = vmatprep.subr.bf16.mxu0 %v5489_v17 }
 0x62a   :  { %5492 = vmatpush3.bf16.msra.mxu0 %v5489_v17 }
 0x62b   :  { %5280 = vmatprep.subr.mxu0 %v6258_v16 }
 0x6f0   :  { %v5227_v33 = vpop.f32.mrb[18].mxu0 }
 0x6f1   :  { %v2014_v34 = vadd.f32 %v5227_v33, %v4877_v32  ;;  %v2008_v36 = vpop.f32.mrb[19].mxu0 }
 0x6f2   :  { %v2009_v37 = vadd.f32 %v4877_v32, %v2008_v36 }
 0x6f3   :  { %v2018_v38 = vadd.f32 %v2014_v34, %v6592_v14 }
 0x6f4   :  { %v2017_v40 = vadd.f32 %v2009_v37, %v6584_v11 }
 0x6f5   :  { %v2022_v42 = vsel %vm369_vm0, %v2018_v38, 0.0 }
 0x6f6   :  { %2023 = vadd.xlane.f32.xlu1 %v2022_v42  ;;  %v2019_v43 = vsel %vm369_vm0, %v2017_v40, 0.0 }
 0x6f7   :  { %2020 = vadd.xlane.f32.xlu0 %v2019_v43 }
 0x783   :  { %v2024_v44 = vpop.xlane.xlu1 %2023 }
 0x784   :  { %v2027_v46 = vmul.f32 0.03125, %v2024_v44  ;;  %v2021_v48 = vpop.xlane.xlu0 %2020 }
 0x785   :  { %v2026_v50 = vmul.f32 0.03125, %v2021_v48 }
 0x786   :  { %v2029_v51 = vsub.f32 %v2018_v38, %v2027_v46  ;;  %v4885_v38 = vld [vmem:[#allocation22] ss:$0 sm:$0xff] }
 0x787   :  { %v2028_v52 = vsub.f32 %v2017_v40, %v2026_v50 }
 0x788   :  { %v2031_v14 = vmul.f32 %v2029_v51, %v2029_v51 }
 0x789   :  { %v2030_v53 = vmul.f32 %v2028_v52, %v2028_v52 }
 0x78a   :  { %v2035_v11 = vsel %vm369_vm0, %v2031_v14, 0.0 }
 0x78b   :  { %v2032_v54 = vsel %vm369_vm0, %v2030_v53, 0.0 }
 0x78c   :  { %2033 = vadd.xlane.f32.xlu0 %v2032_v54 }
 0x790   :  { %2036 = vadd.xlane.f32.xlu0 %v2035_v11 }
 0x819   :  { %v2034_v6 = vpop.xlane.xlu0 %2033 }
 0x81a   :  { %v2038_v7 = vmul.f32 0.03125, %v2034_v6 }
 0x81c   :  { %v2040_v8 = vadd.f32 1e-05, %v2038_v7 }
 0x81d   :  { %v2037_v9 = vpop.xlane.xlu0 %2036 }
 0x81e   :  { %5670 = vrsqrt.f32 %v2040_v8  ;;  %v2039_v10 = vmul.f32 0.03125, %v2037_v9 }
 0x820   :  { %v2041_v12 = vadd.f32 1e-05, %v2039_v10 }
 0x822   :  { %5672 = vrsqrt.f32 %v2041_v12 }
 0x828   :  { %v5671_v18 = vpop.eup %5670 }
 0x829   :  { %v2044_v21 = vmul.f32 %v5671_v18, %v2028_v52  ;;  %v4888_v18 = vld [vmem:[#allocation23] ss:$0 sm:$0xff] }
 0x82b   :  { %v2052_v23 = vmul.f32 %v4880_v20, %v2044_v21 }
 0x82c   :  { %v5673_v24 = vpop.eup %5672 }
 0x82d   :  { %v2045_v25 = vmul.f32 %v5673_v24, %v2029_v51  ;;  %v2060_v26 = vadd.f32 %v4881_v22, %v2052_v23  ;;  %v4889_v23 = vld [vmem:[%s7158_s24] ss:$0 sm:$0xff] }
 0x82f   :  { %v2053_v27 = vmul.f32 %v4880_v20, %v2045_v25  ;;  %5236 = vmatprep.mubr.msk.f32.mxu1 %vm369_vm0, %v2060_v26 }
 0x831   :  { %v2061_v28 = vadd.f32 %v4881_v22, %v2053_v27  ;;  %v4897_v27 = vld [vmem:[%s7155_s11 + $0x38] sm:$0xff] }
 0x833   :  { %5237 = vmatmul.mubr.msk.f32.vlgmr.msra.gmra.mrb[18].mxu1 %vm369_vm0, %v2061_v28 }
 0x834   :  { %5496 = vmatpush3.bf16.msra.mxu1 %v5493_v62 }
 0x835   :  { %5498 = vmatprep.subr.bf16.mxu1 %v5497_v1 }
 0x838   :  { %5500 = vmatpush3.bf16.msra.mxu1 %v5497_v1 }
 0x839   :  { %5502 = vmatprep.subr.bf16.mxu1 %v5501_v4 }
 0x906   :  { %v5238_v31 = vpop.f32.mrb[18].mxu1 }
 0x907   :  { %v2146_v32 = vadd.f32 %v5238_v31, %v4882_v19  ;;  %v2140_v33 = vpop.f32.mrb[19].mxu1 }
 0x908   :  { %v2141_v34 = vadd.f32 %v4882_v19, %v2140_v33 }
 0x909   :  { %v2150_v37 = vmax.f32 %v2146_v32, 0.0 }
 0x90a   :  { %v2149_v36 = vmax.f32 %v2141_v34, 0.0 }
 0x90c   :  { %5255 = vmatprep.mubr.msk.f32.mxu0 %vm2157_vm5, %v2149_v36 }
 0x90d   :  { %5256 = vmatmul.mubr.msk.f32.vlgmr.msra.gmra.mrb[20].mxu0 %vm2157_vm5, %v2150_v37 }
 0x90e   :  { %5282 = vmatprep.mubr.msk.f32.mxu0 %vm6259_vm1, %v6258_v16 }
 0x9e0   :  { %v5257_v40 = vpop.f32.mrb[20].mxu0 }
 0x9e1   :  { %v2236_v42 = vadd.f32 %v5257_v40, %v4885_v38  ;;  %v2230_v43 = vpop.f32.mrb[21].mxu0 }
 0x9e2   :  { %v2231_v44 = vadd.f32 %v4885_v38, %v2230_v43 }
 0x9e3   :  { %v2240_v46 = vadd.f32 %v2236_v42, %v2061_v28 }
 0x9e4   :  { %v2239_v48 = vadd.f32 %v2231_v44, %v2060_v26  ;;  %v4896_v26 = vld [vmem:[%s7155_s11 + $0x30] sm:$0xff] }
 0x9e5   :  { %v2244_v50 = vsel %vm369_vm0, %v2240_v46, 0.0  ;;  %v5505_v30 = vpack.c.bf16 %v4897_v27, %v4896_v26 }
 0x9e6   :  { %2245 = vadd.xlane.f32.xlu0 %v2244_v50  ;;  %v2241_v51 = vsel %vm369_vm0, %v2239_v48, 0.0 }
 0x9e7   :  { %2242 = vadd.xlane.f32.xlu1 %v2241_v51 }
 0xa73   :  { %v2246_v52 = vpop.xlane.xlu0 %2245 }
 0xa74   :  { %v2248_v53 = vmul.f32 0.03125, %v2246_v52  ;;  %v2243_v54 = vpop.xlane.xlu1 %2242 }
 0xa75   :  { %v2247_v14 = vmul.f32 0.03125, %v2243_v54 }
 0xa76   :  { %v2250_v11 = vsub.f32 %v2240_v46, %v2248_v53 }
 0xa77   :  { %v2249_v55 = vsub.f32 %v2239_v48, %v2247_v14 }
 0xa78   :  { %v2252_v56 = vmul.f32 %v2250_v11, %v2250_v11 }
 0xa79   :  { %v2251_v57 = vmul.f32 %v2249_v55, %v2249_v55 }
 0xa7a   :  { %v2256_v58 = vsel %vm369_vm0, %v2252_v56, 0.0 }
 0xa7b   :  { %2257 = vadd.xlane.f32.xlu0 %v2256_v58  ;;  %v2253_v59 = vsel %vm369_vm0, %v2251_v57, 0.0 }
 0xa7c   :  { %2254 = vadd.xlane.f32.xlu1 %v2253_v59 }
 0xb08   :  { %v2258_v5 = vpop.xlane.xlu0 %2257 }
 0xb09   :  { %v2260_v6 = vmul.f32 0.03125, %v2258_v5  ;;  %v2255_v7 = vpop.xlane.xlu1 %2254 }
 0xb0a   :  { %v2259_v8 = vmul.f32 0.03125, %v2255_v7 }
 0xb0b   :  { %v2262_v9 = vadd.f32 1e-05, %v2260_v6 }
 0xb0c   :  { %v2261_v10 = vadd.f32 1e-05, %v2259_v8 }
 0xb0d   :  { %5674 = vrsqrt.f32 %v2262_v9 }
 0xb0e   :  { %5676 = vrsqrt.f32 %v2261_v10 }
 0xb17   :  { %v5675_v12 = vpop.eup %5674 }
 0xb18   :  { %v5677_v20 = vpop.eup %5676  ;;  %v2266_v21 = vmul.f32 %v5675_v12, %v2250_v11 }
 0xb19   :  { %v2265_v22 = vmul.f32 %v5677_v20, %v2249_v55 }
 0xb1a   :  { %v2274_v24 = vmul.f32 %v4888_v18, %v2266_v21 }
 0xb1b   :  { %v2273_v25 = vmul.f32 %v4888_v18, %v2265_v22 }
 0xb1c   :  { %v6824_v29 = vadd.f32 %v4889_v23, %v2274_v24 }
 0xb1d   :  { %v6822_v28 = vadd.f32 %v4889_v23, %v2273_v25 }
 0xb1f   :  { %5266 = vmatprep.mubr.msk.f32.mxu1 %vm369_vm0, %v6822_v28 }
 0xb20   :  { %5267 = vmatmul.mubr.msk.f32.vlgmr.msra.gmra.mrb[20].mxu1 %vm369_vm0, %v6824_v29 }
 0xb21   :  { %5504 = vmatpush3.bf16.msra.mxu1 %v5501_v4  ;;  %5277 = vmatprep.mubr.msk.f32.mxu1 %vm369_vm0, %v6588_v13 }
 0xb22   :  { %5506 = vmatprep.subr.bf16.mxu1 %v5505_v30 }
 0xb25   :  { %5508 = vmatpush3.bf16.msra.mxu1 %v5505_v30 }
 0xb26   :  { %5285 = vmatprep.subr.mxu1 %v6258_v16 }
 0xb28   :  { %5278 = vmatmul.mubr.msk.f32.vlgmr.msra.gmra.mrb[22].mxu1 %vm369_vm0, %v6594_v15 }
 0xb29   :  { %5287 = vmatprep.mubr.msk.f32.mxu1 %vm6259_vm1, %v6258_v16 }
 0xbf3   :  { %v6837_v17 = vpop.f32.mrb[20].mxu1 }
 0xbf4   :  { %2712 = vrot.lane.b32.xlu1 %v6837_v17, %s6260_s15  ;;  %v6841_v19 = vpop.f32.mrb[21].mxu1 }
 0xbf5   :  { %2790 = vrot.lane.b32.xlu0 %v6841_v19, %s6261_s16 }
 0xbf8   :  { %2634 = vrot.lane.b32.xlu1 %v6841_v19, %s6260_s15 }
 0xbfb   :  { %v5279_v13 = vpop.f32.mrb[22].mxu1 }
 0xbfc   :  { %2714 = vrot.lane.b32.xlu0 %v5279_v13, %s6260_s15  ;;  %v2473_v15 = vpop.f32.mrb[23].mxu1  ;;  %5286 = vmatpush3.xpose.msk.msra.mxu1 %vm532_vm2, %v5279_v13 }
 0xbfd   :  { %2870 = vrot.lane.b32.xlu1 %v5279_v13, %s6261_s16  ;;  %5281 = vmatpush3.xpose.msk.msra.mxu0 %vm532_vm2, %v2473_v15 }
 0xbfe   :  { %5295 = vmatprep.subr.mxu1 %v6258_v16  ;;  %5290 = vmatprep.subr.mxu0 %v6258_v16 }
 0xbff   :  { %5288 = vmatmul.mubr.msk.f32.vlgmr.msra.gmra.mrb[24].mxu1 %vm532_vm2, %v6837_v17 }
 0xc00   :  { %2792 = vrot.lane.b32.xlu0 %v2473_v15, %s6261_s16  ;;  %5283 = vmatmul.mubr.msk.f32.vlgmr.msra.gmra.mrb[22].mxu0 %vm532_vm2, %v6841_v19 }
 0xc01   :  { %2636 = vrot.lane.b32.xlu1 %v2473_v15, %s6260_s15  ;;  %5297 = vmatprep.mubr.msk.f32.mxu1 %vm6259_vm1, %v6258_v16 }
 0xc02   :  { %5292 = vmatprep.mubr.msk.f32.mxu0 %vm6259_vm1, %v6258_v16 }
 0xc04   :  { %2948 = vrot.lane.b32.xlu0 %v2473_v15, %s6262_s21 }
 0xc05   :  { %2868 = vrot.lane.b32.xlu1 %v6837_v17, %s6261_s16 }
 0xc08   :  { %2946 = vrot.lane.b32.xlu0 %v6841_v19, %s6262_s21 }
 0xc09   :  { %3026 = vrot.lane.b32.xlu1 %v5279_v13, %s6262_s21 }
 0xc0d   :  { %3024 = vrot.lane.b32.xlu1 %v6837_v17, %s6262_s21 }
 0xc66   :  { %v2713_v31 = vpop.permute.xlu1 %2712 }
 0xc67   :  { %v2791_v32 = vpop.permute.xlu0 %2790 }
 0xc6a   :  { %v2635_v33 = vpop.permute.xlu1 %2634 }
 0xc6e   :  { %v2715_v34 = vpop.permute.xlu0 %2714 }
 0xc6f   :  { %v2871_v36 = vpop.permute.xlu1 %2870  ;;  %5296 = vmatpush3.xpose.msk.msra.mxu1 %vm532_vm2, %v2715_v34 }
 0xc70   :  { %5305 = vmatprep.subr.mxu1 %v6258_v16 }
 0xc72   :  { %5298 = vmatmul.mubr.msk.f32.vlgmr.msra.gmra.mrb[26].mxu1 %vm532_vm2, %v2713_v31  ;;  %v2793_v37 = vpop.permute.xlu0 %2792 }
 0xc73   :  { %5306 = vmatpush3.xpose.msk.msra.mxu1 %vm532_vm2, %v2871_v36  ;;  %v2637_v38 = vpop.permute.xlu1 %2636  ;;  %5307 = vmatprep.mubr.msk.f32.mxu1 %vm6259_vm1, %v6258_v16 }
 0xc74   :  { %5291 = vmatpush3.xpose.msk.msra.mxu0 %vm532_vm2, %v2637_v38  ;;  %5315 = vmatprep.subr.mxu1 %v6258_v16 }
 0xc75   :  { %5300 = vmatprep.subr.mxu0 %v6258_v16 }
 0xc76   :  { %v2949_v42 = vpop.permute.xlu0 %2948 }
 0xc77   :  { %v2869_v40 = vpop.permute.xlu1 %2868  ;;  %5293 = vmatmul.mubr.msk.f32.vlgmr.msra.gmra.mrb[24].mxu0 %vm532_vm2, %v2635_v33 }
 0xc78   :  { %5301 = vmatpush3.xpose.msk.msra.mxu0 %vm532_vm2, %v2793_v37  ;;  %5308 = vmatmul.mubr.msk.f32.vlgmr.msra.gmra.mrb[28].mxu1 %vm532_vm2, %v2869_v40 }
 0xc79   :  { %5302 = vmatprep.mubr.msk.f32.mxu0 %vm6259_vm1, %v6258_v16  ;;  %5310 = vmatprep.subr.mxu0 %v6258_v16 }
 0xc7a   :  { %5317 = vmatprep.mubr.msk.f32.mxu1 %vm6259_vm1, %v6258_v16  ;;  %v2947_v44 = vpop.permute.xlu0 %2946 }
 0xc7b   :  { %v3027_v43 = vpop.permute.xlu1 %3026  ;;  %5303 = vmatmul.mubr.msk.f32.vlgmr.msra.gmra.mrb[26].mxu0 %vm532_vm2, %v2791_v32 }
 0xc7c   :  { %5311 = vmatpush3.xpose.msk.msra.mxu0 %vm532_vm2, %v2949_v42  ;;  %5316 = vmatpush3.xpose.msk.msra.mxu1 %vm532_vm2, %v3027_v43 }
 0xc7d   :  { %5312 = vmatprep.mubr.msk.f32.mxu0 %vm6259_vm1, %v6258_v16  ;;  %5320 = vmatprep.subr.mxu0 %v6258_v16 }
 0xc7e   :  { %5325 = vmatprep.subr.mxu1 %v6258_v16 }
 0xc7f   :  { %v3025_v46 = vpop.permute.xlu1 %3024  ;;  %5313 = vmatmul.mubr.msk.f32.vlgmr.msra.gmra.mrb[28].mxu0 %vm532_vm2, %v2947_v44 }
 0xc80   :  { %5318 = vmatmul.mubr.msk.f32.vlgmr.msra.gmra.mrb[30].mxu1 %vm532_vm2, %v3025_v46  ;;  %5322 = vmatprep.mubr.msk.f32.mxu0 %vm6259_vm1, %v6258_v16 }
 0xc81   :  { %5327 = vmatprep.mubr.msk.f32.mxu1 %vm6259_vm1, %v6258_v16 }
 0xcd2   :  { %v2630_v48 = vpop.f32.mrb[24].mxu1 }
 0xcd3   :  { %v3106_v50 = vmul.f32 0.35355338, %v2630_v48  ;;  %v2554_v51 = vpop.f32.mrb[22].mxu0  ;;  %v5289_v52 = vpop.f32.mrb[25].mxu1 }
 0xcd4   :  { %v3102_v53 = vmul.f32 0.35355338, %v2554_v51  ;;  %v5284_v54 = vpop.f32.mrb[23].mxu0 }
 0xcd5   :  { %v3114_v14 = vadd.f32 %v3106_v50, %v6683_v47 }
 0xcd6   :  { %v3110_v11 = vadd.f32 %v3102_v53, %v6686_v49 }
 0xcd7   :  { %v3130_v55 = vsel %vm532_vm2, %v3114_v14, -inf }
 0xcd8   :  { %3131 = vmax.xlane.f32.xlu1 %v3130_v55  ;;  %v3118_v56 = vsel %vm532_vm2, %v3110_v11, -inf }
 0xcd9   :  { %3119 = vmax.xlane.f32.xlu0 %v3118_v56 }
 0xd45   :  { %v2786_v57 = vpop.f32.mrb[26].mxu1 }
 0xd46   :  { %v5299_v58 = vpop.f32.mrb[27].mxu1  ;;  %v3107_v60 = vmul.f32 0.35355338, %v2786_v57 }
 0xd48   :  { %v3115_v7 = vadd.f32 %v3107_v60, %v6683_v47 }
 0xd4a   :  { %v2708_v59 = vpop.f32.mrb[24].mxu0  ;;  %v3133_v20 = vsel %vm532_vm2, %v3115_v7, -inf }
 0xd4b   :  { %v3103_v61 = vmul.f32 0.35355338, %v2708_v59  ;;  %v5294_v62 = vpop.f32.mrb[25].mxu0  ;;  %v2942_v63 = vpop.f32.mrb[28].mxu1 }
 0xd4c   :  { %v5309_v0 = vpop.f32.mrb[29].mxu1  ;;  %v3108_v3 = vmul.f32 0.35355338, %v2942_v63 }
 0xd4d   :  { %v3111_v1 = vadd.f32 %v3103_v61, %v6686_v49 }
 0xd4e   :  { %v2864_v2 = vpop.f32.mrb[26].mxu0  ;;  %v3116_v22 = vadd.f32 %v3108_v3, %v6683_v47 }
 0xd4f   :  { %v3104_v4 = vmul.f32 0.35355338, %v2864_v2  ;;  %v5304_v5 = vpop.f32.mrb[27].mxu0  ;;  %v3121_v6 = vsel %vm532_vm2, %v3111_v1, -inf }
 0xd50   :  { %3122 = vmax.xlane.f32.xlu0 %v3121_v6  ;;  %v3136_v26 = vsel %vm532_vm2, %v3116_v22, -inf }
 0xd51   :  { %v3112_v8 = vadd.f32 %v3104_v4, %v6686_v49 }
 0xd52   :  { %v3020_v9 = vpop.f32.mrb[28].mxu0 }
 0xd53   :  { %v3105_v10 = vmul.f32 0.35355338, %v3020_v9  ;;  %v5314_v12 = vpop.f32.mrb[29].mxu0  ;;  %v3098_v18 = vpop.f32.mrb[30].mxu1  ;;  %v3124_v21 = vsel %vm532_vm2, %v3112_v8, -inf }
 0xd54   :  { %v3109_v23 = vmul.f32 0.35355338, %v3098_v18  ;;  %v5319_v24 = vpop.f32.mrb[31].mxu1  ;;  %3134 = vmax.xlane.f32.xlu0 %v3133_v20  ;;  %3125 = vmax.xlane.f32.xlu1 %v3124_v21 }
 0xd55   :  { %v3113_v25 = vadd.f32 %v3105_v10, %v6686_v49 }
 0xd56   :  { %v3117_v30 = vadd.f32 %v3109_v23, %v6683_v47 }
 0xd57   :  { %v3127_v27 = vsel %vm532_vm2, %v3113_v25, -inf }
 0xd58   :  { %3137 = vmax.xlane.f32.xlu0 %v3136_v26  ;;  %3128 = vmax.xlane.f32.xlu1 %v3127_v27  ;;  %v3139_v13 = vsel %vm532_vm2, %v3117_v30, -inf }
 0xd5c   :  { %3140 = vmax.xlane.f32.xlu0 %v3139_v13 }
 0xd65   :  { %v3132_v47 = vpop.xlane.xlu1 %3131 }
 0xd66   :  { %v3146_v49 = vsub.f32 %v3114_v14, %v3132_v47  ;;  %v3120_v15 = vpop.xlane.xlu0 %3119 }
 0xd67   :  { %v3142_v32 = vsub.f32 %v3110_v11, %v3120_v15 }
 0xd68   :  { %v3158_v31 = vmul.f32 1.442695, %v3146_v49 }
 0xd69   :  { %3206 = vrot.lane.b32.xlu1 %v6841_v19, %s6264_s17  ;;  %v3150_v33 = vmul.f32 1.442695, %v3142_v32 }
 0xd6a   :  { %5678 = vpow2.f32 %v3158_v31 }
 0xd6b   :  { %5680 = vpow2.f32 %v3150_v33 }
 0xd6d   :  { %3358 = vrot.lane.b32.xlu1 %v6841_v19, %s6265_s29 }
 0xd71   :  { %3434 = vrot.lane.b32.xlu1 %v6837_v17, %s6265_s29 }
 0xd72   :  { %3282 = vrot.lane.b32.xlu0 %v6837_v17, %s6264_s17 }
 0xd74   :  { %v6929_v34 = vpop.eup %5678 }
 0xd75   :  { %3586 = vrot.lane.b32.xlu1 %v6837_v17, %s6266_s18  ;;  %v3178_v36 = vsel %vm532_vm2, %v6929_v34, 0.0  ;;  %v6933_v37 = vpop.eup %5680 }
 0xd76   :  { %3510 = vrot.lane.b32.xlu0 %v6841_v19, %s6266_s18  ;;  %v3166_v38 = vsel %vm532_vm2, %v6933_v37, 0.0 }
 0xd95   :  { %3179 = vadd.xlane.f32.xlu0 %v3178_v36 }
 0xd99   :  { %3167 = vadd.xlane.f32.xlu1 %v3166_v38 }
 0xddd   :  { %v3123_v40 = vpop.xlane.xlu0 %3122 }
 0xdde   :  { %v3143_v42 = vsub.f32 %v3111_v1, %v3123_v40 }
 0xde0   :  { %v3152_v43 = vmul.f32 1.442695, %v3143_v42 }
 0xde1   :  { %v3135_v44 = vpop.xlane.xlu0 %3134  ;;  %v3126_v46 = vpop.xlane.xlu1 %3125 }
 0xde2   :  { %5682 = vpow2.f32 %v3152_v43  ;;  %v3147_v48 = vsub.f32 %v3115_v7, %v3135_v44  ;;  %v3144_v50 = vsub.f32 %v3112_v8, %v3126_v46 }
 0xde4   :  { %v3160_v51 = vmul.f32 1.442695, %v3147_v48  ;;  %v3154_v52 = vmul.f32 1.442695, %v3144_v50 }
 0xde5   :  { %v3138_v53 = vpop.xlane.xlu0 %3137  ;;  %v3129_v54 = vpop.xlane.xlu1 %3128 }
 0xde6   :  { %5684 = vpow2.f32 %v3160_v51  ;;  %v3148_v14 = vsub.f32 %v3116_v22, %v3138_v53  ;;  %v3145_v11 = vsub.f32 %v3113_v25, %v3129_v54  ;;  %v4898_v53 = vld [vmem:[%s7156_s22 + $0x20] sm:$0xff]  ;;  %v4899_v54 = vld [vmem:[%s7156_s22 + $0x28] sm:$0xff] }
 0xde7   :  { %5686 = vpow2.f32 %v3154_v52 }
 0xde8   :  { %v3162_v55 = vmul.f32 1.442695, %v3148_v14  ;;  %v3156_v56 = vmul.f32 1.442695, %v3145_v11  ;;  %v5509_v14 = vpack.c.bf16 %v4899_v54, %v4898_v53  ;;  %v4900_v11 = vld [vmem:[%s7156_s22 + $0x30] sm:$0xff] }
 0xde9   :  { %v3141_v57 = vpop.xlane.xlu0 %3140  ;;  %v3207_v58 = vpop.permute.xlu1 %3206  ;;  %v4904_v54 = vld [vmem:[%s7157_s23 + $0x50] sm:$0xff] }
 0xdea   :  { %5688 = vpow2.f32 %v3162_v55  ;;  %v3149_v59 = vsub.f32 %v3117_v30, %v3141_v57  ;;  %5321 = vmatpush3.msra.mxu0 %v3207_v58  ;;  %v4901_v55 = vld [vmem:[%s7156_s22 + $0x38] sm:$0xff] }
 0xdeb   :  { %5690 = vpow2.f32 %v3156_v56  ;;  %5330 = vmatprep.subr.mxu0 %v6258_v16  ;;  %v5513_v56 = vpack.c.bf16 %v4901_v55, %v4900_v11  ;;  %v4906_v55 = vld [vmem:[%s7157_s23 + $0x60] sm:$0xff] }
 0xdec   :  { %v5683_v60 = vpop.eup %5682  ;;  %v3164_v61 = vmul.f32 1.442695, %v3149_v59 }
 0xded   :  { %v3283_v62 = vpop.permute.xlu0 %3282  ;;  %v3169_v63 = vsel %vm532_vm2, %v5683_v60, 0.0  ;;  %v3359_v10 = vpop.permute.xlu1 %3358 }
 0xdee   :  { %5692 = vpow2.f32 %v3164_v61  ;;  %5326 = vmatpush3.msra.mxu1 %v3283_v62  ;;  %3170 = vadd.xlane.f32.xlu1 %v3169_v63 }
 0xdef   :  { %5335 = vmatprep.subr.mxu1 %v6258_v16 }
 0xdf0   :  { %v5685_v0 = vpop.eup %5684 }
 0xdf1   :  { %v5687_v1 = vpop.eup %5686  ;;  %v3181_v2 = vsel %vm532_vm2, %v5685_v0, 0.0  ;;  %v3435_v12 = vpop.permute.xlu1 %3434 }
 0xdf2   :  { %3182 = vadd.xlane.f32.xlu0 %v3181_v2  ;;  %v3172_v3 = vsel %vm532_vm2, %v5687_v1, 0.0  ;;  %v3511_v18 = vpop.permute.xlu0 %3510 }
 0xdf3   :  { %3173 = vadd.xlane.f32.xlu1 %v3172_v3 }
 0xdf4   :  { %v5689_v4 = vpop.eup %5688 }
 0xdf5   :  { %v5691_v5 = vpop.eup %5690  ;;  %v3184_v6 = vsel %vm532_vm2, %v5689_v4, 0.0  ;;  %v3587_v20 = vpop.permute.xlu1 %3586 }
 0xdf6   :  { %3185 = vadd.xlane.f32.xlu0 %v3184_v6  ;;  %v3175_v7 = vsel %vm532_vm2, %v5691_v5, 0.0 }
 0xdf7   :  { %3176 = vadd.xlane.f32.xlu1 %v3175_v7 }
 0xdf8   :  { %v6944_v8 = vpop.eup %5692 }
 0xdf9   :  { %v3187_v9 = vsel %vm532_vm2, %v6944_v8, 0.0 }
 0xdfa   :  { %3188 = vadd.xlane.f32.xlu0 %v3187_v9 }
 0xe08   :  { %3738 = vrot.lane.b32.xlu1 %v6837_v17, %s6267_s12 }
 0xe10   :  { %3662 = vrot.lane.b32.xlu0 %v6841_v19, %s6267_s12 }
 0xe22   :  { %v3180_v21 = vpop.xlane.xlu0 %3179 }
 0xe23   :  { %5694 = vrcp.f32 %v3180_v21 }
 0xe26   :  { %v3168_v22 = vpop.xlane.xlu1 %3167 }
 0xe27   :  { %5696 = vrcp.f32 %v3168_v22 }
 0xe2d   :  { %v5695_v23 = vpop.eup %5694 }
 0xe2e   :  { %v3202_v24 = vmul.f32 %v5695_v23, %v6929_v34 }
 0xe30   :  { %5328 = vmatmul.mubr.msk.f32.vlgmr.msra.gmra.mrb[32].mxu1 %vm532_vm2, %v3202_v24  ;;  %v4939_v24 = vld [vmem:[#allocation14 + $0x1] ss:$0 sm:$0xff] }
 0xe31   :  { %v5697_v25 = vpop.eup %5696  ;;  %5336 = vmatpush3.msra.mxu1 %v3435_v12  ;;  %5337 = vmatprep.mubr.msk.f32.mxu1 %vm6259_vm1, %v6258_v16 }
 0xe32   :  { %v3198_v17 = vmul.f32 %v5697_v25, %v6933_v37  ;;  %5345 = vmatprep.subr.mxu1 %v6258_v16 }
 0xe34   :  { %5323 = vmatmul.mubr.msk.f32.vlgmr.msra.gmra.mrb[30].mxu0 %vm532_vm2, %v3198_v17 }
 0xe35   :  { %5331 = vmatpush3.msra.mxu0 %v3359_v10  ;;  %5332 = vmatprep.mubr.msk.f32.mxu0 %vm6259_vm1, %v6258_v16 }
 0xe36   :  { %5340 = vmatprep.subr.mxu0 %v6258_v16 }
 0xe7b   :  { %v3171_v19 = vpop.xlane.xlu1 %3170 }
 0xe7c   :  { %5698 = vrcp.f32 %v3171_v19 }
 0xe7f   :  { %v3183_v26 = vpop.xlane.xlu0 %3182 }
 0xe80   :  { %5700 = vrcp.f32 %v3183_v26  ;;  %v3174_v27 = vpop.xlane.xlu1 %3173 }
 0xe81   :  { %5702 = vrcp.f32 %v3174_v27 }
 0xe83   :  { %v3186_v30 = vpop.xlane.xlu0 %3185 }
 0xe84   :  { %5704 = vrcp.f32 %v3186_v30  ;;  %v3177_v13 = vpop.xlane.xlu1 %3176 }
 0xe85   :  { %5706 = vrcp.f32 %v3177_v13 }
 0xe86   :  { %v5699_v47 = vpop.eup %5698 }
 0xe87   :  { %v3199_v49 = vmul.f32 %v5699_v47, %v5683_v60  ;;  %v3189_v15 = vpop.xlane.xlu0 %3188 }
 0xe88   :  { %5708 = vrcp.f32 %v3189_v15  ;;  %v3739_v43 = vpop.permute.xlu1 %3738 }
 0xe89   :  { %5333 = vmatmul.mubr.msk.f32.vlgmr.msra.gmra.mrb[32].mxu0 %vm532_vm2, %v3199_v49 }
 0xe8a   :  { %v5701_v31 = vpop.eup %5700  ;;  %5341 = vmatpush3.msra.mxu0 %v3511_v18  ;;  %5342 = vmatprep.mubr.msk.f32.mxu0 %vm6259_vm1, %v6258_v16 }
 0xe8b   :  { %v5703_v32 = vpop.eup %5702  ;;  %v3203_v33 = vmul.f32 %v5701_v31, %v5685_v0  ;;  %5350 = vmatprep.subr.mxu0 %v6258_v16  ;;  %v3663_v36 = vpop.permute.xlu0 %3662 }
 0xe8c   :  { %v3200_v34 = vmul.f32 %v5703_v32, %v5687_v1 }
 0xe8d   :  { %5338 = vmatmul.mubr.msk.f32.vlgmr.msra.gmra.mrb[34].mxu1 %vm532_vm2, %v3203_v33 }
 0xe8e   :  { %v5705_v37 = vpop.eup %5704  ;;  %5343 = vmatmul.mubr.msk.f32.vlgmr.msra.gmra.mrb[34].mxu0 %vm532_vm2, %v3200_v34  ;;  %5346 = vmatpush3.msra.mxu1 %v3587_v20 }
 0xe8f   :  { %v5707_v38 = vpop.eup %5706  ;;  %v3204_v40 = vmul.f32 %v5705_v37, %v5689_v4  ;;  %5351 = vmatpush3.msra.mxu0 %v3663_v36  ;;  %5347 = vmatprep.mubr.msk.f32.mxu1 %vm6259_vm1, %v6258_v16 }
 0xe90   :  { %v3201_v42 = vmul.f32 %v5707_v38, %v5691_v5  ;;  %5352 = vmatprep.mubr.msk.f32.mxu0 %vm6259_vm1, %v6258_v16  ;;  %5355 = vmatprep.subr.mxu1 %v6258_v16 }
 0xe91   :  { %5348 = vmatmul.mubr.msk.f32.vlgmr.msra.gmra.mrb[36].mxu1 %vm532_vm2, %v3204_v40  ;;  %5510 = vmatprep.subr.bf16.mxu0 %v5509_v14  ;;  %v2306_v40 = vld [vmem:[#allocation19 + $0x28] sm:$0xff] }
 0xe92   :  { %v5709_v44 = vpop.eup %5708  ;;  %5353 = vmatmul.mubr.msk.f32.vlgmr.msra.gmra.mrb[36].mxu0 %vm532_vm2, %v3201_v42  ;;  %5356 = vmatpush3.msra.mxu1 %v3739_v43  ;;  %v2307_v43 = vld [vmem:[#allocation19 + $0x30] sm:$0xff] }
 0xe93   :  { %v3205_v46 = vmul.f32 %v5709_v44, %v6944_v8  ;;  %5357 = vmatprep.mubr.msk.f32.mxu1 %vm6259_vm1, %v6258_v16  ;;  %5512 = vmatpush3.bf16.msra.mxu0 %v5509_v14  ;;  %v2308_v44 = vld [vmem:[#allocation19 + $0x38] sm:$0xff]  ;;  %v4905_v14 = vld [vmem:[%s7157_s23 + $0x58] sm:$0xff] }
 0xe94   :  { %5514 = vmatprep.subr.bf16.mxu0 %v5513_v56  ;;  %v5529_v11 = vpack.c.bf16 %v4905_v14, %v4904_v54 }
 0xe95   :  { %5358 = vmatmul.mubr.msk.f32.vlgmr.msra.gmra.mrb[38].mxu1 %vm532_vm2, %v3205_v46  ;;  %v5521_v46 = vpack.c.bf16 %v2308_v44, %v2307_v43 }
 0xe97   :  { %5516 = vmatpush3.bf16.msra.mxu0 %v5513_v56  ;;  %v4907_v56 = vld [vmem:[%s7157_s23 + $0x68] sm:$0xff] }
 0xf03   :  { %v3354_v48 = vpop.f32.mrb[32].mxu1 }
 0xf04   :  { %v5329_v50 = vpop.f32.mrb[33].mxu1 }
 0xf05   :  { %v4202_v50 = vld [vmem:[#allocation11] sm:$0x3] }
 0xf07   :  { %v3278_v51 = vpop.f32.mrb[30].mxu0 }
 0xf08   :  { %v5324_v52 = vpop.f32.mrb[31].mxu0 }
 0xf09   :  { %v4903_v52 = vld [vmem:[%s7157_s23 + $0x48] sm:$0xff] }
 0xf5c   :  { %v3430_v57 = vpop.f32.mrb[32].mxu0 }
 0xf5d   :  { %3816 = vrot.lane.b32.xlu0 %v3430_v57, %s6241_s28  ;;  %v5334_v58 = vpop.f32.mrb[33].mxu0  ;;  %v5533_v57 = vpack.c.bf16 %v4907_v56, %v4906_v55  ;;  %v4947_v55 = vld [vmem:[#allocation22 + $0x1] ss:$0 sm:$0xff] }
 0xf60   :  { %v3506_v59 = vpop.f32.mrb[34].mxu1 }
 0xf61   :  { %v3582_v60 = vpop.f32.mrb[34].mxu0  ;;  %3818 = vrot.lane.b32.xlu1 %v3506_v59, %s6241_s28  ;;  %v5339_v61 = vpop.f32.mrb[35].mxu1 }
 0xf62   :  { %3824 = vrot.lane.b32.xlu0 %v3582_v60, %s6244_s0  ;;  %v5344_v62 = vpop.f32.mrb[35].mxu0 }
 0xf64   :  { %v3658_v63 = vpop.f32.mrb[36].mxu1 }
 0xf65   :  { %v3734_v0 = vpop.f32.mrb[36].mxu0  ;;  %3826 = vrot.lane.b32.xlu1 %v3658_v63, %s6244_s0  ;;  %v5349_v1 = vpop.f32.mrb[37].mxu1  ;;  %s6270_s0 = smov 32  }
 0xf66   :  { %3832 = vrot.lane.b32.xlu0 %v3734_v0, %s6268_s4  ;;  %v5354_v2 = vpop.f32.mrb[37].mxu0  ;;  %v4942_v1 = vld [vmem:[#allocation16 + $0x1] ss:$0 sm:$0xff] }
 0xf68   :  { %v3810_v3 = vpop.f32.mrb[38].mxu1 }
 0xf69   :  { %3834 = vrot.lane.b32.xlu1 %v3810_v3, %s6268_s4  ;;  %v5359_v4 = vpop.f32.mrb[39].mxu1  ;;  %v4943_v3 = vld [vmem:[#allocation17 + $0x1] ss:$0 sm:$0xff] }
 0xfcf   :  { %v3817_v5 = vpop.permute.xlu0 %3816 }
 0xfd0   :  { %v3838_v8 = vsel %vm532_vm2, %v3278_v51, %v3817_v5  ;;  %v4902_v51 = vld [vmem:[%s7157_s23 + $0x40] sm:$0xff] }
 0xfd1   :  { %v5525_v53 = vpack.c.bf16 %v4903_v52, %v4902_v51 }
 0xfd3   :  { %v3819_v6 = vpop.permute.xlu1 %3818  ;;  %5526 = vmatprep.subr.bf16.mxu0 %v5525_v53 }
 0xfd4   :  { %v3825_v7 = vpop.permute.xlu0 %3824  ;;  %v3839_v20 = vsel %vm532_vm2, %v3354_v48, %v3819_v6  ;;  %v6269_v48 = vmov 0.0|0.0  }
 0xfd5   :  { %v3840_v10 = vsel %vm1924_vm3, %v3838_v8, %v3825_v7  ;;  %v4203_v8 = vld [vmem:[%s7159_s1] sm:$0xff] }
 0xfd7   :  { %v3827_v9 = vpop.permute.xlu1 %3826 }
 0xfd8   :  { %v3833_v12 = vpop.permute.xlu0 %3832  ;;  %v3841_v21 = vsel %vm1924_vm3, %v3839_v20, %v3827_v9  ;;  %v4204_v9 = vld [vmem:[%s7159_s1 + $0x8] sm:$0xff]  ;;  %v4205_v20 = vld [vmem:[%s7159_s1 + $0x10] sm:$0xff] }
 0xfd9   :  { %v3842_v18 = vsel %vm1927_vm4, %v3840_v10, %v3833_v12  ;;  %v5542_v12 = vpack.c.bf16 %v4204_v9, %v4203_v8 }
 0xfda   :  { %5368 = vmatprep.mubr.msk.f32.mxu0 %vm369_vm0, %v3842_v18 }
 0xfdb   :  { %v3835_v22 = vpop.permute.xlu1 %3834 }
 0xfdc   :  { %v3843_v23 = vsel %vm1927_vm4, %v3841_v21, %v3835_v22  ;;  %v4206_v21 = vld [vmem:[%s7159_s1 + $0x18] sm:$0xff] }
 0xfdd   :  { %5369 = vmatmul.mubr.msk.f32.vlgmr.msra.gmra.mrb[38].mxu0 %vm369_vm0, %v3843_v23  ;;  %v5545_v22 = vpack.c.bf16 %v4206_v21, %v4205_v20  ;;  %v4207_v23 = vld [vmem:[%s7160_s6] sm:$0xff] }
 0xfde   :  { %5528 = vmatpush3.bf16.msra.mxu0 %v5525_v53 }
 0xfdf   :  { %5530 = vmatprep.subr.bf16.mxu0 %v5529_v11 }
 0xfe2   :  { %5532 = vmatpush3.bf16.msra.mxu0 %v5529_v11 }
 0xfe3   :  { %5534 = vmatprep.subr.bf16.mxu0 %v5533_v57 }
 0xfe6   :  { %5536 = vmatpush3.bf16.msra.mxu0 %v5533_v57 }
0x10b0   :  { %v5370_v25 = vpop.f32.mrb[38].mxu0 }
0x10b1   :  { %v3928_v17 = vadd.f32 %v5370_v25, %v4939_v24  ;;  %v3922_v19 = vpop.f32.mrb[39].mxu0  ;;  %v4200_v25 = vld [vmem:[#allocation8] sm:$0x3] }
0x10b2   :  { %v3923_v26 = vadd.f32 %v4939_v24, %v3922_v19  ;;  %v4208_v24 = vld [vmem:[%s7160_s6 + $0x8] sm:$0xff]  ;;  %v4209_v19 = vld [vmem:[%s7160_s6 + $0x10] sm:$0xff] }
0x10b3   :  { %v3932_v27 = vadd.f32 %v3928_v17, %v6824_v29  ;;  %v2305_v29 = vld [vmem:[#allocation19 + $0x20] sm:$0xff]  ;;  %v5548_v17 = vpack.c.bf16 %v4208_v24, %v4207_v23  ;;  %v4218_v23 = vld [vmem:[#allocation26 + $0x8] sm:$0xff] }
0x10b4   :  { %v3931_v30 = vadd.f32 %v3923_v26, %v6822_v28  ;;  %v5517_v42 = vpack.c.bf16 %v2306_v40, %v2305_v29  ;;  %v4210_v26 = vld [vmem:[%s7160_s6 + $0x18] sm:$0xff]  ;;  %v4955_v40 = vld [vmem:[%s7162_s7] ss:$0 sm:$0xff] }
0x10b5   :  { %v3936_v13 = vsel %vm369_vm0, %v3932_v27, 0.0 }
0x10b6   :  { %3937 = vadd.xlane.f32.xlu1 %v3936_v13  ;;  %v3933_v47 = vsel %vm369_vm0, %v3931_v30, 0.0  ;;  %5518 = vmatprep.subr.bf16.mxu1 %v5517_v42  ;;  %v4908_v13 = vld [vmem:[%s7157_s23 + $0x70] sm:$0xff] }
0x10b7   :  { %3934 = vadd.xlane.f32.xlu0 %v3933_v47  ;;  %5520 = vmatpush3.bf16.msra.mxu1 %v5517_v42  ;;  %v4909_v47 = vld [vmem:[%s7157_s23 + $0x78] sm:$0xff] }
0x10b8   :  { %5522 = vmatprep.subr.bf16.mxu1 %v5521_v46 }
0x10bb   :  { %5524 = vmatpush3.bf16.msra.mxu1 %v5521_v46 }
0x10bc   :  { %5541 = vmatprep.subr.bf16.mxu1 %v6269_v48 }
0x1143   :  { %v3938_v49 = vpop.xlane.xlu1 %3937 }
0x1144   :  { %v3940_v15 = vmul.f32 0.03125, %v3938_v49  ;;  %v3935_v31 = vpop.xlane.xlu0 %3934  ;;  %v5537_v49 = vpack.c.bf16 %v4909_v47, %v4908_v13  ;;  %v4214_v13 = vld [vmem:[#allocation25 + $0x8] sm:$0xff]  ;;  %v4215_v47 = vld [vmem:[#allocation25 + $0x10] sm:$0xff] }
0x1145   :  { %v3939_v32 = vmul.f32 0.03125, %v3935_v31 }
0x1146   :  { %v3942_v33 = vsub.f32 %v3932_v27, %v3940_v15  ;;  %v5551_v27 = vpack.c.bf16 %v4210_v26, %v4209_v19  ;;  %5538 = vmatprep.subr.bf16.mxu0 %v5537_v49  ;;  %v4944_v15 = vld [vmem:[#allocation20 + $0x1] ss:$0 sm:$0xff] }
0x1147   :  { %v3941_v34 = vsub.f32 %v3931_v30, %v3939_v32  ;;  %v4201_v30 = vld [vmem:[#allocation10] sm:$0x3]  ;;  %5540 = vmatpush3.bf16.msra.mxu0 %v5537_v49  ;;  %v4220_v19 = vld [vmem:[#allocation26 + $0x18] sm:$0xff] }
0x1148   :  { %v3944_v38 = vmul.f32 %v3942_v33, %v3942_v33 }
0x1149   :  { %v3943_v36 = vmul.f32 %v3941_v34, %v3941_v34 }
0x114a   :  { %v3948_v28 = vsel %vm369_vm0, %v3944_v38, 0.0 }
0x114b   :  { %v3945_v37 = vsel %vm369_vm0, %v3943_v36, 0.0 }
0x114c   :  { %3946 = vadd.xlane.f32.xlu0 %v3945_v37 }
0x1150   :  { %3949 = vadd.xlane.f32.xlu0 %v3948_v28  ;;  %v4952_v28 = vld [vmem:[%s7161_s2] ss:$0 sm:$0xff] }
0x1166   :  { %4391 = vrot.lane.b32.xlu0 %v4202_v50, %s6270_s0 }
0x11d9   :  { %v3947_v58 = vpop.xlane.xlu0 %3946 }
0x11da   :  { %v3951_v59 = vmul.f32 0.03125, %v3947_v58 }
0x11dc   :  { %v3953_v60 = vadd.f32 1e-05, %v3951_v59 }
0x11dd   :  { %v3950_v61 = vpop.xlane.xlu0 %3949 }
0x11de   :  { %5710 = vrsqrt.f32 %v3953_v60  ;;  %v3952_v62 = vmul.f32 0.03125, %v3950_v61 }
0x11e0   :  { %v3954_v63 = vadd.f32 1e-05, %v3952_v62 }
0x11e2   :  { %5712 = vrsqrt.f32 %v3954_v63 }
0x11e8   :  { %v5711_v0 = vpop.eup %5710 }
0x11e9   :  { %v3957_v2 = vmul.f32 %v5711_v0, %v3941_v34  ;;  %v4392_v0 = vpop.permute.xlu0 %4391 }
0x11eb   :  { %v3965_v4 = vmul.f32 %v4942_v1, %v3957_v2 }
0x11ec   :  { %v5713_v5 = vpop.eup %5712 }
0x11ed   :  { %v3958_v6 = vmul.f32 %v5713_v5, %v3942_v33  ;;  %v7011_v7 = vadd.f32 %v4943_v3, %v3965_v4 }
0x11ef   :  { %v3966_v10 = vmul.f32 %v4942_v1, %v3958_v6  ;;  %5379 = vmatprep.mubr.msk.f32.mxu1 %vm369_vm0, %v7011_v7 }
0x11f1   :  { %v7017_v18 = vadd.f32 %v4943_v3, %v3966_v10 }
0x11f3   :  { %5380 = vmatmul.mubr.msk.f32.vlgmr.msra.gmra.mrb[40].mxu1 %vm369_vm0, %v7017_v18 }
0x11f4   :  { %5543 = vmatpush3.bf16.msra.mxu1 %v5542_v12  ;;  %5409 = vmatprep.mubr.msk.f32.mxu1 %vm6259_vm1, %v6258_v16 }
0x11f5   :  { %5544 = vmatprep.subr.bf16.mxu1 %v6269_v48 }
0x11f8   :  { %5546 = vmatpush3.bf16.msra.mxu1 %v5545_v22  ;;  %v4217_v22 = vld [vmem:[#allocation26] sm:$0xff] }
0x11f9   :  { %5547 = vmatprep.subr.bf16.mxu1 %v6269_v48  ;;  %v5562_v24 = vpack.c.bf16 %v4218_v23, %v4217_v22 }
0x11fb   :  { %5410 = vmatmul.mubr.msk.f32.vlgmr.msra.gmra.mrb[42].mxu1 %vm369_vm0, %v4200_v25 }
0x11fc   :  { %5549 = vmatpush3.bf16.msra.mxu1 %v5548_v17  ;;  %5420 = vmatprep.mubr.msk.f32.mxu1 %vm6259_vm1, %v6258_v16  ;;  %v4219_v17 = vld [vmem:[#allocation26 + $0x10] sm:$0xff] }
0x11fd   :  { %5550 = vmatprep.subr.bf16.mxu1 %v6269_v48 }
0x1200   :  { %5552 = vmatpush3.bf16.msra.mxu1 %v5551_v27  ;;  %v5565_v27 = vpack.c.bf16 %v4220_v19, %v4219_v17 }
0x1201   :  { %5561 = vmatprep.subr.bf16.mxu1 %v6269_v48 }
0x1203   :  { %5421 = vmatmul.mubr.msk.f32.vlgmr.msra.gmra.mrb[44].mxu1 %vm369_vm0, %v4201_v30  ;;  %v4213_v30 = vld [vmem:[#allocation25] sm:$0xff] }
0x1204   :  { %5442 = vmatprep.mubr.msk.f32.mxu1 %vm6259_vm1, %v6258_v16  ;;  %5563 = vmatpush3.bf16.msra.mxu1 %v5562_v24  ;;  %v5553_v49 = vpack.c.bf16 %v4214_v13, %v4213_v30  ;;  %v4656_v13 = vand.u32 127, %v1165_v35 }
0x1205   :  { %5564 = vmatprep.subr.bf16.mxu1 %v6269_v48 }
0x1206   :  { %5554 = vmatprep.subr.bf16.mxu0 %v5553_v49 }
0x1208   :  { %5566 = vmatpush3.bf16.msra.mxu1 %v5565_v27 }
0x12c6   :  { %v5381_v31 = vpop.f32.mrb[40].mxu1 }
0x12c7   :  { %v4059_v32 = vadd.f32 %v5381_v31, %v4944_v15  ;;  %v4053_v33 = vpop.f32.mrb[41].mxu1 }
0x12c8   :  { %v4054_v34 = vadd.f32 %v4944_v15, %v4053_v33  ;;  %v4216_v15 = vld [vmem:[#allocation25 + $0x18] sm:$0xff] }
0x12c9   :  { %v4063_v37 = vmax.f32 %v4059_v32, 0.0  ;;  %v5557_v31 = vpack.c.bf16 %v4216_v15, %v4215_v47  ;;  %v7077_v47 = vsub.s32 %v4656_v13, %v6671_v39 }
0x12ca   :  { %v4062_v36 = vmax.f32 %v4054_v34, 0.0 }
0x12cc   :  { %5398 = vmatprep.mubr.msk.f32.mxu0 %vm2157_vm5, %v4062_v36 }
0x12cd   :  { %5399 = vmatmul.mubr.msk.f32.vlgmr.msra.gmra.mrb[40].mxu0 %vm2157_vm5, %v4063_v37 }
0x12ce   :  { %v4298_v38 = vpop.f32.mrb[42].mxu1  ;;  %5556 = vmatpush3.bf16.msra.mxu0 %v5553_v49 }
0x12cf   :  { %v5411_v16 = vpop.f32.mrb[43].mxu1  ;;  %v4299_v29 = vadd.f32 %v4952_v28, %v4298_v38  ;;  %5558 = vmatprep.subr.bf16.mxu0 %v5557_v31  ;;  %v4950_v28 = vld [vmem:[#allocation23 + $0x1] ss:$0 sm:$0xff] }
0x12d2   :  { %5560 = vmatpush3.bf16.msra.mxu0 %v5557_v31 }
0x12d6   :  { %v4371_v42 = vpop.f32.mrb[44].mxu1 }
0x12d7   :  { %v4375_v43 = vadd.f32 %v4371_v42, %v4299_v29  ;;  %v5422_v44 = vpop.f32.mrb[45].mxu1 }
0x12d9   :  { %v4382_v46 = vadd.f32 %v4955_v40, %v4375_v43  ;;  %v4951_v40 = vld [vmem:[%s7158_s24 + $0x1] ss:$0 sm:$0xff] }
0x12db   :  { %5714 = vtanh.f32 %v4382_v46  ;;  %v4956_v51 = vmul.f32 -1.442695, %v4382_v46 }
0x12dd   :  { %5716 = vpow2.f32 %v4956_v51 }
0x12e5   :  { %v5715_v50 = vpop.eup %5714 }
0x12e6   :  { %4396 = vrot.lane.b32.xlu1 %v5715_v50, %s6271_s10 }
0x12e7   :  { %v5717_v52 = vpop.eup %5716 }
0x12e8   :  { %v4386_v53 = vadd.f32 1.0, %v5717_v52  ;;  %v4959_v52 = vld [vmem:[%s7163_s5] ss:$0 sm:$0xff] }
0x12ea   :  { %5718 = vrcp.f32 %v4386_v53 }
0x12f4   :  { %v5719_v54 = vpop.eup %5718 }
0x12f5   :  { %v4394_v1 = vmul.f32 %v5719_v54, %v4392_v0  ;;  %v4197_v0 = vld [vmem:[#allocation13] sm:$0x3] }
0x1358   :  { %v4397_v14 = vpop.permute.xlu1 %4396 }
0x1359   :  { %v4399_v11 = vmul.f32 %v5719_v54, %v4397_v14 }
0x135b   :  { %4401 = vrot.lane.b32.xlu1 %v4399_v11, %s6270_s0 }
0x13a0   :  { %v5400_v56 = vpop.f32.mrb[40].mxu0 }
0x13a1   :  { %v4148_v57 = vadd.f32 %v5400_v56, %v4947_v55  ;;  %v4142_v58 = vpop.f32.mrb[41].mxu0 }
0x13a2   :  { %v4143_v59 = vadd.f32 %v4947_v55, %v4142_v58 }
0x13a3   :  { %v4152_v60 = vadd.f32 %v4148_v57, %v7017_v18 }
0x13a4   :  { %v4151_v61 = vadd.f32 %v4143_v59, %v7011_v7 }
0x13a5   :  { %v4156_v62 = vsel %vm369_vm0, %v4152_v60, 0.0 }
0x13a6   :  { %4157 = vadd.xlane.f32.xlu0 %v4156_v62  ;;  %v4153_v63 = vsel %vm369_vm0, %v4151_v61, 0.0 }
0x13a7   :  { %4154 = vadd.xlane.f32.xlu1 %v4153_v63 }
0x13cd   :  { %v4402_v2 = vpop.permute.xlu1 %4401 }
0x13ce   :  { %v7050_v3 = vadd.f32 %v4402_v2, %v4394_v1  ;;  %v4961_v1 = vld [vmem:[%s7164_s19] ss:$0 sm:$0xff] }
0x13d0   :  { %5720 = vtanh.f32 %v7050_v3 }
0x13da   :  { %v5721_v4 = vpop.eup %5720 }
0x13db   :  { %4407 = vrot.lane.b32.xlu0 %v5721_v4, %s6271_s10 }
0x1433   :  { %v4158_v5 = vpop.xlane.xlu0 %4157 }
0x1434   :  { %v4160_v6 = vmul.f32 0.03125, %v4158_v5  ;;  %v4155_v8 = vpop.xlane.xlu1 %4154 }
0x1435   :  { %v4159_v9 = vmul.f32 0.03125, %v4155_v8 }
0x1436   :  { %v4162_v7 = vsub.f32 %v4152_v60, %v4160_v6 }
0x1437   :  { %v4161_v10 = vsub.f32 %v4151_v61, %v4159_v9 }
0x1438   :  { %v4164_v12 = vmul.f32 %v4162_v7, %v4162_v7 }
0x1439   :  { %v4163_v20 = vmul.f32 %v4161_v10, %v4161_v10 }
0x143a   :  { %v4168_v18 = vsel %vm369_vm0, %v4164_v12, 0.0 }
0x143b   :  { %4169 = vadd.xlane.f32.xlu1 %v4168_v18  ;;  %v4165_v21 = vsel %vm369_vm0, %v4163_v20, 0.0  ;;  %v6272_v20 = vmov 0  }
0x143c   :  { %5637 = vset.pattern.permute.xlu1 %v6272_v20  ;;  %5636 = vset.pattern.permute.xlu0 %v6272_v20 }
0x143f   :  { %4166 = vadd.xlane.f32.xlu1 %v4165_v21 }
0x144d   :  { %v4408_v25 = vpop.permute.xlu0 %4407 }
0x144e   :  { %v4410_v26 = vmul.f32 %v5719_v54, %v4408_v25 }
0x1450   :  { %4499 = vrot.lane.b32.xlu1 %v4410_v26, %s6270_s0 }
0x14c8   :  { %v4170_v32 = vpop.xlane.xlu1 %4169 }
0x14c9   :  { %v4172_v48 = vmul.f32 0.03125, %v4170_v32 }
0x14cb   :  { %v4174_v33 = vadd.f32 1e-05, %v4172_v48 }
0x14cc   :  { %v4167_v34 = vpop.xlane.xlu1 %4166 }
0x14cd   :  { %5722 = vrsqrt.f32 %v4174_v33  ;;  %v4171_v36 = vmul.f32 0.03125, %v4167_v34 }
0x14cf   :  { %v4173_v37 = vadd.f32 1e-05, %v4171_v36 }
0x14d0   :  { %v4500_v38 = vpop.permute.xlu1 %4499 }
0x14d1   :  { %5724 = vrsqrt.f32 %v4173_v37  ;;  %4746 = vst.msk [vmem:[#allocation31] sm:$0x3] %vm4745_vm6, %v4500_v38  ;;  %5443 = vmatmul.mubr.msk.f32.vlgmr.msra.gmra.mrb[46].mxu1 %vm369_vm0, %v4500_v38 }
0x14d7   :  { %v5723_v16 = vpop.eup %5722 }
0x14d8   :  { %v4178_v29 = vmul.f32 %v5723_v16, %v4162_v7 }
0x14da   :  { %v4186_v42 = vmul.f32 %v4950_v28, %v4178_v29 }
0x14db   :  { %v5725_v43 = vpop.eup %5724 }
0x14dc   :  { %v4177_v44 = vmul.f32 %v5725_v43, %v4161_v10  ;;  %v4194_v46 = vadd.f32 %v4951_v40, %v4186_v42  ;;  %v4638_v10 = vsub.s32 1, %v6671_v39 }
0x14de   :  { %v4185_v50 = vmul.f32 %v4950_v28, %v4177_v44  ;;  %4196 = vst.msk [vmem:[#allocation28 + $0x8] sm:$0xff] %vm369_vm0, %v4194_v46 }
0x14e0   :  { %v4193_v51 = vadd.f32 %v4951_v40, %v4185_v50 }
0x14e2   :  { %5431 = vmatprep.mubr.msk.f32.mxu0 %vm369_vm0, %v4193_v51  ;;  %4195 = vst.msk [vmem:[#allocation28] sm:$0xff] %vm369_vm0, %v4193_v51 }
0x14e3   :  { %5432 = vmatmul.mubr.msk.f32.vlgmr.msra.gmra.mrb[42].mxu0 %vm369_vm0, %v4194_v46 }
0x15a4   :  { %v4569_v53 = vpop.f32.mrb[46].mxu1 }
0x15a5   :  { %v4570_v54 = vadd.f32 %v4959_v52, %v4569_v53  ;;  %v5444_v14 = vpop.f32.mrb[47].mxu1 }
0x15a7   :  { %v4580_v11 = vrot.slane %v4570_v54, %v6674_v41 }
0x15a9   :  { %v4581_v55 = vcombine.high %v4580_v11, %v4580_v11  ;;  %v4588_v57 = vrot.slane %v4580_v11, %v6674_v41 }
0x15ab   :  { %v4595_v56 = vrot.slane %v4581_v55, %v6674_v41  ;;  %v4599_v60 = vrot.slane %v4588_v57, %v6679_v45 }
0x15ad   :  { %v4603_v58 = vrot.slane %v4595_v56, %v6679_v45 }
0x15b6   :  { %v5433_v59 = vpop.f32.mrb[42].mxu0 }
0x15b7   :  { %v4607_v61 = vadd.f32 %v5433_v59, %v4603_v58  ;;  %v4483_v62 = vpop.f32.mrb[43].mxu0 }
0x15b8   :  { %v4606_v63 = vadd.f32 %v4599_v60, %v4483_v62 }
0x15b9   :  { %5726 = vtanh.f32 %v4607_v61 }
0x15ba   :  { %5728 = vtanh.f32 %v4606_v63 }
0x15bb   :  { %5730 = vlog2.f32 %v4197_v0 }
0x15c3   :  { %v5727_v2 = vpop.eup %5726 }
0x15c4   :  { %v5729_v4 = vpop.eup %5728  ;;  %v4617_v5 = vmul.f32 %v5727_v2, %v4961_v1 }
0x15c5   :  { %v4616_v6 = vmul.f32 %v5729_v4, %v4961_v1  ;;  %v5731_v9 = vpop.eup %5730 }
0x15c6   :  { %v4621_v8 = vsel %vm369_vm0, %v4617_v5, 0.0  ;;  %v4199_v7 = vmul.f32 0.6931472, %v5731_v9 }
0x15c7   :  { %4622 = vadd.xlane.f32.xlu1 %v4621_v8  ;;  %v4618_v41 = vsel %vm369_vm0, %v4616_v6, 0.0 }
0x15c8   :  { %4619 = vadd.xlane.f32.xlu0 %v4618_v41  ;;  %v4639_v12 = vrot.slane %v4199_v7, %v4638_v10  ;;  %v4632_v18 = vrot.slane %v4199_v7, %v6679_v45 }
0x15d8   :  { %4641 = vbcast.lane.b32.xlu1 %v4639_v12, 256 }
0x15de   :  { %4634 = vbcast.lane.b32.xlu0 %v4632_v18, 256 }
0x1654   :  { %v4623_v21 = vpop.xlane.xlu1 %4622 }
0x1655   :  { %5732 = vtanh.f32 %v4623_v21  ;;  %v4620_v22 = vpop.xlane.xlu0 %4619 }
0x1656   :  { %5734 = vtanh.f32 %v4620_v22 }
0x1658   :  { %v4642_v24 = vpop.permute.xlu1 %4641 }
0x1659   :  { %v4635_v19 = vpop.permute.xlu0 %4634 }
0x165f   :  { %v5733_v23 = vpop.eup %5732 }
0x1660   :  { %v5735_v25 = vpop.eup %5734  ;;  %v4627_v17 = vmul.f32 10.0, %v5733_v23 }
0x1661   :  { %v4626_v26 = vmul.f32 10.0, %v5735_v25 }
0x1662   :  { %v4646_v27 = vadd.f32 %v4642_v24, %v4627_v17 }
0x1663   :  { %v4645_v30 = vadd.f32 %v4635_v19, %v4626_v26 }
0x1664   :  { %4653 = vperm.xlu1 %5637, %v4646_v27  }
0x1665   :  { %4650 = vperm.xlu0 %5636, %v4645_v30  }
0x16e3   :  { %v4654_v49 = vpop.permute.xlu1 %4653 }
0x16e4   :  { %v4664_v15 = vrot.slane %v4654_v49, %v7077_v47  ;;  %v4651_v31 = vpop.permute.xlu0 %4650 }
0x16e5   :  { %v4660_v32 = vrot.slane %v4651_v31, %v7077_v47 }
0x16e7   :  { %v4666_v48 = vsel %vm4665_vm7, %v4664_v15, %v4660_v32 }
0x16e8   :  { %v4669_v33 = vsel %vm4668_vm8, %v4666_v48, -inf }
0x16e9   :  { %4670 = vmax.xlane.f32.xlu0 %v4669_v33 }
0x1776   :  { %v4671_v34 = vpop.xlane.xlu0 %4670 }
0x1777   :  { %v4676_v36 = vrot.slane %v4671_v34, %v6679_v45  ;;  %v4680_v35 = vrot.slane %v4671_v34, %v4638_v10 }
0x1779   :  { %v4683_v37 = vsub.f32 %v4645_v30, %v4676_v36  ;;  %v4684_v39 = vsub.f32 %v4646_v27, %v4680_v35 }
0x177b   :  { %v4685_v38 = vmul.f32 1.442695, %v4683_v37  ;;  %v4687_v16 = vmul.f32 1.442695, %v4684_v39 }
0x177d   :  { %5736 = vpow2.f32 %v4685_v38 }
0x177e   :  { %5738 = vpow2.f32 %v4687_v16 }
0x1787   :  { %v5737_v28 = vpop.eup %5736 }
0x1788   :  { %4692 = vperm.xlu1 %5637, %v5737_v28   ;;  %v5739_v29 = vpop.eup %5738 }
0x178c   :  { %4695 = vperm.xlu1 %5637, %v5739_v29  }
0x1807   :  { %v4693_v40 = vpop.permute.xlu1 %4692 }
0x1808   :  { %v4700_v43 = vrot.slane %v4693_v40, %v7077_v47 }
0x180b   :  { %v4696_v42 = vpop.permute.xlu1 %4695 }
0x180c   :  { %v4704_v44 = vrot.slane %v4696_v42, %v7077_v47 }
0x180e   :  { %v4705_v46 = vsel %vm4665_vm7, %v4704_v44, %v4700_v43 }
0x180f   :  { %v4707_v50 = vsel %vm4668_vm8, %v4705_v46, 0.0 }
0x1810   :  { %4708 = vadd.xlane.f32.xlu1 %v4707_v50 }
0x189d   :  { %v4709_v51 = vpop.xlane.xlu1 %4708 }
0x189e   :  { %v4714_v52 = vrot.slane %v4709_v51, %v6679_v45  ;;  %v4718_v53 = vrot.slane %v4709_v51, %v4638_v10 }
0x18a0   :  { %5740 = vrcp.f32 %v4714_v52 }
0x18a1   :  { %5742 = vrcp.f32 %v4718_v53 }
0x18aa   :  { %v5741_v54 = vpop.eup %5740 }
0x18ab   :  { %v5743_v14 = vpop.eup %5742  ;;  %v4722_v11 = vmul.f32 %v5741_v54, %v5737_v28 }
0x18ac   :  { %v4724_v55 = vmul.f32 %v5743_v14, %v5739_v29 }
0x18ad   :  { %4728 = vperm.xlu0 %5636, %v4722_v11  }
0x18ae   :  { %4731 = vperm.xlu1 %5637, %v4724_v55  }
0x18b1   :  { %4748 = vrot.lane.b32.xlu0 %v7050_v3, %s6264_s17 }
0x18b2   :  { %6107 = shalt.err (!%p6104_p6)
}
0x18b3   :  { %s6108_s30 = scalar_lea.hbm %s6420_s20, 256 }
0x18b4   :  { %p6109_p7 = scmp.ne.s32.totalorder %s6420_s20, %s6108_s30  ;;  %p6112_p8 = scmp.lt.u32.totalorder %s6108_s30, %s6420_s20 }
0x18b6   :  { %p6114_p9 = pnand %p6112_p8, %p6109_p7 }
0x18b8   :  { %6117 = shalt.err (!%p6114_p9)
}
0x18b9   :  { %4763 = dma.vmem_to_hbm [thread:$0]  %s4758_s27, 256, %s6420_s20, [#allocation4], %s6240_s26, %s6240_s26, %s6241_s28  }
0x18ba   :  { %s6274_s13 = smov [#allocation29]   ;;  %s6275_s15 = smov [#allocation31]  }
0x18bb   :  { %s4770_s11 = sshll.u32 %s6274_s13, 4  ;;  %s4780_s16 = sshll.u32 %s6275_s15, 4  ;;  %s4771_s11 = int_to_ptr.vmem [resolvable:$true] %s4770_s11  ;;  %s7101_s16 = int_to_ptr.vmem [resolvable:$true] %s4780_s16 }
0x18bc   :  { %s6276_s21 = smov [#allocation32]   ;;  %s6118_s20 = scalar_lea.vmem %s4771_s11, 32 }
0x18bd   :  { %s4790_s17 = sshll.u32 %s6276_s21, 4  ;;  %p6119_p10 = scmp.ne.s32.totalorder %s4771_s11, %s6118_s20  ;;  %s7105_s17 = int_to_ptr.vmem [resolvable:$true] %s4790_s17 }
0x18be   :  { %p6123_p11 = scmp.lt.s32.totalorder %s4771_s11, %s4771_s11  ;;  %p6124_p12 = scmp.lt.s32.totalorder %s6118_s20, %s6118_s20 }
0x18c0   :  { %p6125_p13 = por %p6124_p12, %p6123_p11 }
0x18c2   :  { %p6126_p0 = pnand %p6125_p13, %p6119_p10 }
0x192c   :  { %v4729_v45 = vpop.permute.xlu0 %4728 }
0x192d   :  { %v4732_v3 = vpop.permute.xlu1 %4731  ;;  %v4736_v56 = vrot.slane %v4729_v45, %v7077_v47 }
0x192e   :  { %v4740_v57 = vrot.slane %v4732_v3, %v7077_v47 }
0x1930   :  { %v4749_v58 = vpop.permute.xlu0 %4748  ;;  %v4741_v59 = vsel %vm4665_vm7, %v4740_v57, %v4736_v56 }
0x1931   :  { %4751 = vst.msk [vmem:[#allocation32] sm:$0x3] %vm4745_vm6, %v4749_v58 }
0x1932   :  { %4743 = vst.msk [vmem:[#allocation29] sm:$0x3] %vm4668_vm8, %v4741_v59 }
0x1933   :  { %6129 = shalt.err (!%p6126_p0)
}
0x1934   :  { %s6130_s26 = scalar_lea.hbm %s6425_s8, 32 }
0x1935   :  { %p6131_p1 = scmp.ne.s32.totalorder %s6425_s8, %s6130_s26  ;;  %p6134_p2 = scmp.lt.u32.totalorder %s6130_s26, %s6425_s8 }
0x1937   :  { %p6136_p3 = pnand %p6134_p2, %p6131_p1 }
0x1939   :  { %6139 = shalt.err (!%p6136_p3)
}
0x193a   :  { %4773 = dma.vmem_to_hbm [thread:$0]  %s4771_s11, 32, %s6425_s8, [#allocation30]  }
0x193b   :  { %s6140_s28 = scalar_lea.vmem %s7101_s16, 32  ;;  %p6145_p5 = scmp.lt.s32.totalorder %s7101_s16, %s7101_s16 }
0x193c   :  { %p6141_p4 = scmp.ne.s32.totalorder %s7101_s16, %s6140_s28  ;;  %p6146_p6 = scmp.lt.s32.totalorder %s6140_s28, %s6140_s28 }
0x193e   :  { %p6147_p7 = por %p6146_p6, %p6145_p5 }
0x1940   :  { %p6148_p8 = pnand %p6147_p7, %p6141_p4 }
0x1942   :  { %6151 = shalt.err (!%p6148_p8)
}
0x1943   :  { %s6152_s29 = scalar_lea.hbm %s6430_s3, 32 }
0x1944   :  { %p6153_p9 = scmp.ne.s32.totalorder %s6430_s3, %s6152_s29  ;;  %p6156_p10 = scmp.lt.u32.totalorder %s6152_s29, %s6430_s3 }
0x1946   :  { %p6158_p11 = pnand %p6156_p10, %p6153_p9 }
0x1948   :  { %6161 = shalt.err (!%p6158_p11)
}
0x1949   :  { %4783 = dma.vmem_to_hbm [thread:$0]  %s7101_s16, 32, %s6430_s3, [#allocation30]  }
0x194a   :  { %s6162_s8 = scalar_lea.vmem %s7105_s17, 32  ;;  %p6167_p13 = scmp.lt.s32.totalorder %s7105_s17, %s7105_s17 }
0x194b   :  { %p6163_p12 = scmp.ne.s32.totalorder %s7105_s17, %s6162_s8  ;;  %p6168_p0 = scmp.lt.s32.totalorder %s6162_s8, %s6162_s8 }
0x194d   :  { %p6169_p1 = por %p6168_p0, %p6167_p13 }
0x194f   :  { %p6170_p2 = pnand %p6169_p1, %p6163_p12 }
0x1951   :  { %6173 = shalt.err (!%p6170_p2)
}
0x1952   :  { %s6174_s18 = scalar_lea.hbm %s6435_s14, 32 }
0x1953   :  { %p6175_p3 = scmp.ne.s32.totalorder %s6435_s14, %s6174_s18  ;;  %p6178_p4 = scmp.lt.u32.totalorder %s6174_s18, %s6435_s14 }
0x1955   :  { %p6180_p5 = pnand %p6178_p4, %p6175_p3 }
0x1957   :  { %6183 = shalt.err (!%p6180_p5)
}
0x1958   :  { %4793 = dma.vmem_to_hbm [thread:$0]  %s7105_s17, 32, %s6435_s14, [#allocation33]  }
0x1959   :  { %6202 = dma.done.wait [#allocation4], 256  }
0x195a   :  { %6203 = vsyncadd [#allocation4], 4294967040 }
0x195b   :  { %6204 = dma.done.wait [#allocation30], 64  }
0x195c   :  { %6205 = vsyncadd [#allocation30], 4294967232 }
0x195d   :  { %6206 = dma.done.wait [#allocation33], 32  }
0x195e   :  { %6207 = vsyncadd [#allocation33], 4294967264 }
0x195f   :  { %4806 = vsyncpa [#allocation3], 1 }
0x1960   :  { %4807 = vsyncpa [#allocation6], 1 }
0x1961   :  { %4808 = vsyncpa [#allocation9], 1 }
0x1962   :  { %4809 = vsyncpa [#allocation12], 1 }
0x1963   :  { %4810 = vsyncpa [#allocation15], 1 }
0x1964   :  { %4811 = vsyncpa [#allocation18], 1 }
0x1965   :  { %4812 = vsyncpa [#allocation21], 1 }
0x1966   :  { %4813 = vsyncpa [#allocation24], 1 }
0x1967   :  { %4814 = vsyncpa [#allocation27], 1 }
0x1968   :  { %4815 = vsyncpa [#allocation4], 1 }
0x1969   :  { %4816 = vsyncpa [#allocation30], 1 }
0x196a   :  { %4817 = vsyncpa [#allocation33], 1 }

</bundles_post_ra>
